<compile_context>
chip_gen: v7x
topology: tpu7x:2x2x1
jax: 0.10.0
libtpu: 0.0.40
codegen_flags: <defaults>
</compile_context>

<pallas_src>
import functools

import jax
import jax.numpy as jnp
from jax.experimental import pallas as pl
from jax.experimental.pallas import tpu as pltpu

LANES = 128


def _round_up(x, m):
    return (x + m - 1) // m * m


def _row_tile(m, k_bytes):
    """Row tile (multiple of 16) keeping the (tm, K) input block ~<= 2 MiB."""
    cap = max(64, (2 * 1024 * 1024 // max(k_bytes, 1)) // 16 * 16)
    return int(min(512, cap, _round_up(m, 16)))


def _ew_tile(rows, n, itemsize=2, budget=1 << 20):
    """Row tile for elementwise kernels (big tiles, ~<= 1 MiB per block)."""
    cap = max(16, budget // max(n * itemsize, 1))
    for t in (2048, 1024, 512, 256, 128, 64, 32, 16):
        if t <= rows and t <= cap and rows % t == 0:
            return t
    return rows


# ----------------------------- Pallas kernels ------------------------------

def _mm_bias_act_kernel(a_ref, w_ref, b_ref, o_ref, *, activation):
    acc = jnp.dot(a_ref[...], w_ref[...], preferred_element_type=jnp.float32)
    acc = acc + b_ref[...]                      # (tm, N) + (1, N) broadcast
    if activation == "tanh":
        acc = jnp.tanh(acc)
    o_ref[...] = acc.astype(o_ref.dtype)


def pallas_matmul_bias(a, w, b, *, activation=None, out_dtype=jnp.float32):
    """(P, M, K)bf16 @ (P, K, N)bf16 + b(N,) [+tanh] -> (P, Mp, N) out_dtype.

    N must be a multiple of 128.  Rows are zero-padded to the tile internally;
    the caller slices the padded rows off.
    """
    p, m, k = a.shape
    n = w.shape[-1]
    tm = _row_tile(m, k * a.dtype.itemsize)
    mp = _round_up(m, tm)
    if mp != m:
        a = jnp.pad(a, ((0, 0), (0, mp - m), (0, 0)))
    return pl.pallas_call(
        functools.partial(_mm_bias_act_kernel, activation=activation),
        out_shape=jax.ShapeDtypeStruct((p, mp, n), out_dtype),
        grid=(p, mp // tm),
        in_specs=[
            pl.BlockSpec((None, tm, k), lambda pi, i: (pi, i, 0)),
            pl.BlockSpec((None, k, n), lambda pi, i: (pi, 0, 0)),
            pl.BlockSpec((1, n), lambda pi, i: (0, 0)),
        ],
        out_specs=pl.BlockSpec((None, tm, n), lambda pi, i: (pi, i, 0)),
        compiler_params=pltpu.CompilerParams(
            dimension_semantics=("parallel", "parallel")),
    )(a, w, b.reshape(1, n).astype(jnp.float32))


def _mm_bn_stats_kernel(a_ref, w_ref, y_ref, stats_ref):
    @pl.when((pl.program_id(0) == 0) & (pl.program_id(1) == 0))
    def _():
        stats_ref[...] = jnp.zeros_like(stats_ref)

    acc = jnp.dot(a_ref[...], w_ref[...], preferred_element_type=jnp.float32)
    y_ref[...] = acc.astype(y_ref.dtype)
    # fused per-channel batch statistics (resident accumulator output)
    stats_ref[0:1, :] += jnp.sum(acc, axis=0, keepdims=True)
    stats_ref[1:2, :] += jnp.sum(acc * acc, axis=0, keepdims=True)


def pallas_matmul_bn_stats(a, w, *, y_dtype=jnp.bfloat16):
    """Matmul (no bias) with fused per-channel sum / sum-of-squares.

    Zero-padded rows contribute nothing to the statistics.
    """
    p, m, k = a.shape
    n = w.shape[-1]
    tm = _row_tile(m, k * a.dtype.itemsize)
    mp = _round_up(m, tm)
    if mp != m:
        a = jnp.pad(a, ((0, 0), (0, mp - m), (0, 0)))
    y, stats = pl.pallas_call(
        _mm_bn_stats_kernel,
        out_shape=(jax.ShapeDtypeStruct((p, mp, n), y_dtype),
                   jax.ShapeDtypeStruct((2, n), jnp.float32)),
        grid=(p, mp // tm),
        in_specs=[
            pl.BlockSpec((None, tm, k), lambda pi, i: (pi, i, 0)),
            pl.BlockSpec((None, k, n), lambda pi, i: (pi, 0, 0)),
        ],
        out_specs=(
            pl.BlockSpec((None, tm, n), lambda pi, i: (pi, i, 0)),
            pl.BlockSpec((2, n), lambda pi, i: (0, 0)),   # resident accumulator
        ),
        compiler_params=pltpu.CompilerParams(
            dimension_semantics=("arbitrary", "arbitrary")),
    )(a, w)
    return y, stats


def _bn_relu_kernel(y_ref, sc_ref, sh_ref, o_ref):
    y = y_ref[...].astype(jnp.float32)
    o_ref[...] = jnp.maximum(y * sc_ref[...] + sh_ref[...], 0.0).astype(o_ref.dtype)


def pallas_bn_relu(y2d, scale, shift, *, out_dtype=jnp.bfloat16):
    m, n = y2d.shape
    tm = _ew_tile(m, n, y2d.dtype.itemsize)
    return pl.pallas_call(
        _bn_relu_kernel,
        out_shape=jax.ShapeDtypeStruct((m, n), out_dtype),
        grid=(m // tm,),
        in_specs=[
            pl.BlockSpec((tm, n), lambda i: (i, 0)),
            pl.BlockSpec((1, n), lambda i: (0, 0)),
            pl.BlockSpec((1, n), lambda i: (0, 0)),
        ],
        out_specs=pl.BlockSpec((tm, n), lambda i: (i, 0)),
        compiler_params=pltpu.CompilerParams(dimension_semantics=("parallel",)),
    )(y2d, scale.reshape(1, n).astype(jnp.float32),
      shift.reshape(1, n).astype(jnp.float32))


# ----------------------------- layers (JAX glue) ----------------------------

# ConvTranspose2d(4, 2, 1) parity taps: output index 2i+par gets contributions
# from padded-input offsets (dh) with kernel taps (kh):
_TAPS = {0: ((0, 3), (1, 1)),   # even output index: (pad-offset, kernel tap)
         1: ((1, 2), (2, 0))}   # odd  output index


def _deconv_patches(h):
    """h: (B, H, W, Ci) NHWC -> (4, B*H*W, 4*Ci) bf16 per-parity patches."""
    B, H, W, Ci = h.shape
    hp = jnp.pad(h, ((0, 0), (1, 1), (1, 1), (0, 0)))
    parities = []
    for po in (0, 1):
        for pw in (0, 1):
            chunks = [hp[:, dh:dh + H, dw:dw + W, :]
                      for dh, _ in _TAPS[po] for dw, _ in _TAPS[pw]]
            parities.append(
                jnp.concatenate(chunks, axis=-1).reshape(B * H * W, 4 * Ci))
    return jnp.stack(parities, axis=0).astype(jnp.bfloat16)


def _deconv_weights(w_t, n_pad):
    """w_t: (Ci, Co, 4, 4) ConvTranspose2d weight -> (4, 4*Ci, n_pad) bf16."""
    Co = w_t.shape[1]
    ws = []
    for po in (0, 1):
        for pw in (0, 1):
            blocks = [w_t[:, :, kh, kw]
                      for _, kh in _TAPS[po] for _, kw in _TAPS[pw]]
            wp = jnp.concatenate(blocks, axis=0)               # (4*Ci, Co)
            ws.append(jnp.pad(wp, ((0, 0), (0, n_pad - Co))))  # lane-pad N
    return jnp.stack(ws, axis=0).astype(jnp.bfloat16)


def upsample(h, w_t, bias, gamma, beta, *, batch_norm=True):
    """ConvTranspose2d(4, 2, 1) [+ BN + ReLU] or [+ bias + Tanh].  NHWC in/out."""
    B, H, W, Ci = h.shape
    Co = w_t.shape[1]
    Np = _round_up(Co, LANES)
    M = B * H * W

    patches = _deconv_patches(h)                   # (4, M, 4*Ci) bf16
    w_par = _deconv_weights(w_t, Np)               # (4, 4*Ci, Np) bf16

    if batch_norm:
        y, stats = pallas_matmul_bn_stats(patches, w_par)   # (4, Mp, Np), (2, Np)
        count = 4.0 * M                                     # = B * (2H) * (2W)
        mean = stats[0] / count
        var = stats[1] / count - mean * mean                # biased variance
        gamma_p = jnp.pad(gamma, (0, Np - Co), constant_values=1.0)
        beta_p = jnp.pad(beta, (0, Np - Co))
        scale = gamma_p * jax.lax.rsqrt(var + 1e-5)
        shift = beta_p - mean * scale
        mp = y.shape[1]
        out = pallas_bn_relu(y.reshape(4 * mp, Np), scale, shift,
                             out_dtype=jnp.bfloat16).reshape(4, mp, Np)
    else:
        bias_p = jnp.pad(bias, (0, Np - Co))
        out = pallas_matmul_bias(patches, w_par, bias_p, activation="tanh",
                                 out_dtype=jnp.float32)

    # drop row / lane padding, then interleave the 4 parities spatially
    out = out[:, :M, :Co].reshape(2, 2, B, H, W, Co)
    out = out.transpose(2, 3, 0, 4, 1, 5).reshape(B, 2 * H, 2 * W, Co)
    return out


def affine(x, w, b):
    """nn.Linear: (B, K) @ (K, N) + b, bf16 matmul, lane-padded N."""
    B, _ = x.shape
    N = w.shape[1]
    Np = _round_up(N, LANES)
    xp = x.astype(jnp.bfloat16)[None]                                  # (1, B, K)
    wp = jnp.pad(w, ((0, 0), (0, Np - N))).astype(jnp.bfloat16)[None]  # (1, K, Np)
    bp = jnp.pad(b, (0, Np - N))
    y = pallas_matmul_bias(xp, wp, bp, activation=None, out_dtype=jnp.bfloat16)
    return y[0, :B, :N]


def init_generator_params(key, image_size, hidden_size, channel_size):
    nc = channel_size * 8
    nh = nw = image_size // 16
    keys = jax.random.split(key, 6)

    def nrm(k, shape, std=0.02):
        return (std * jax.random.normal(k, shape)).astype(jnp.float32)

    params = {
        "affine_w": nrm(keys[0], (hidden_size, nc * nh * nw)),   # x @ W + b
        "affine_b": jnp.zeros((nc * nh * nw,), jnp.float32),
        "ups": [],
    }
    chans = [nc, channel_size * 4, channel_size * 2, channel_size, 3]
    for li in range(4):
        ci, co = chans[li], chans[li + 1]
        k_w, k_g = jax.random.split(keys[1 + li])
        params["ups"].append({
            "w": nrm(k_w, (ci, co, 4, 4)),                      # ConvTranspose2d weight
            "bias": jnp.zeros((co,), jnp.float32),              # only up_4 uses it
            "gamma": (1.0 + 0.02 * jax.random.normal(k_g, (co,))).astype(jnp.float32),
            "beta": jnp.zeros((co,), jnp.float32),
        })
    return params, (nc, nh, nw)


def generator_forward(params, x, *, nc, nh, nw):
    B = x.shape[0]
    y = affine(x, params["affine_w"], params["affine_b"])        # (B, nc*nh*nw)
    h = y.reshape(B, nc, nh, nw).transpose(0, 2, 3, 1)           # NCHW view -> NHWC
    for li in range(4):
        L = params["ups"][li]
        h = upsample(h, L["w"], L["bias"], L["gamma"], L["beta"],
                     batch_norm=(li < 3))
    return h.transpose(0, 3, 1, 2)                               # -> NCHW (f32)


if __name__ == "__main__":
    image_size, hidden_size, channel_size, batch = 32, 32, 4, 2
    key = jax.random.PRNGKey(0)
    pkey, xkey = jax.random.split(key)
    params, (nc, nh, nw) = init_generator_params(pkey, image_size, hidden_size,
                                                 channel_size)
    x = jax.random.normal(xkey, (batch, hidden_size), dtype=jnp.float32)

    fwd = jax.jit(functools.partial(generator_forward, nc=nc, nh=nh, nw=nw))
    out = jax.block_until_ready(fwd(params, x))

    assert out.shape == (batch, 3, image_size, image_size), out.shape
    assert bool(jnp.all(jnp.isfinite(out)))
    assert bool(jnp.all(jnp.abs(out) <= 1.0))   # tanh output range
    print("KERNEL_OK")
</pallas_src>

<mosaic_0001>
module attributes {stable_mosaic.version = 11 : i64} {
  func.func @_mm_bias_act_kernel(%arg0: i32, %arg1: i32, %arg2: memref<1x16x32xbf16, #tpu.memory_space<vmem>>, %arg3: memref<1x32x128xbf16, #tpu.memory_space<vmem>>, %arg4: memref<1x128xf32, #tpu.memory_space<vmem>>, %arg5: memref<1x16x128xbf16, #tpu.memory_space<vmem>>) attributes {dimension_semantics = [#tpu.dimension_semantics<parallel>, #tpu.dimension_semantics<parallel>], iteration_bounds = array<i64: 1, 1>, scalar_prefetch = 0 : i64, scratch_operands = 0 : i64, tpu.core_type = #tpu.core_type<tc>, window_params = [{transform_indices = @transform_0, window_bounds = array<i64: 1, 16, 32>}, {transform_indices = @transform_1, window_bounds = array<i64: 1, 32, 128>}, {pipeline_mode = #tpu.pipeline_mode<synchronous>, transform_indices = @transform_2, window_bounds = array<i64: 1, 128>}, {transform_indices = @transform_3, window_bounds = array<i64: 1, 16, 128>}]} {
    %c0 = arith.constant 0 : index
    %c0_0 = arith.constant 0 : index
    %c0_1 = arith.constant 0 : index
    %0 = vector.load %arg2[%c0, %c0_0, %c0_1] : memref<1x16x32xbf16, #tpu.memory_space<vmem>>, vector<1x16x32xbf16>
    %1 = vector.shape_cast %0 : vector<1x16x32xbf16> to vector<16x32xbf16>
    %c0_2 = arith.constant 0 : index
    %c0_3 = arith.constant 0 : index
    %c0_4 = arith.constant 0 : index
    %2 = vector.load %arg3[%c0_2, %c0_3, %c0_4] : memref<1x32x128xbf16, #tpu.memory_space<vmem>>, vector<1x32x128xbf16>
    %3 = vector.shape_cast %2 : vector<1x32x128xbf16> to vector<32x128xbf16>
    %cst = arith.constant dense<0.000000e+00> : vector<16x128xf32>
    %4 = tpu.matmul %1, %3, %cst {dimension_numbers = #tpu.dot_dimension_numbers<[1], [0], [0], [1], [0, 0, 1, 1], [], []>} : vector<16x32xbf16>, vector<32x128xbf16>, vector<16x128xf32> -> vector<16x128xf32>
    %c0_5 = arith.constant 0 : index
    %c0_6 = arith.constant 0 : index
    %5 = vector.load %arg4[%c0_5, %c0_6] : memref<1x128xf32, #tpu.memory_space<vmem>>, vector<1x128xf32>
    %6 = vector.broadcast %5 : vector<1x128xf32> to vector<16x128xf32>
    %7 = arith.addf %4, %6 : vector<16x128xf32>
    %8 = arith.truncf %7 : vector<16x128xf32> to vector<16x128xbf16>
    %c0_7 = arith.constant 0 : index
    %c0_8 = arith.constant 0 : index
    %c0_9 = arith.constant 0 : index
    %9 = vector.load %arg5[%c0_7, %c0_8, %c0_9] : memref<1x16x128xbf16, #tpu.memory_space<vmem>>, vector<1x16x128xbf16>
    %10 = vector.shape_cast %9 : vector<1x16x128xbf16> to vector<16x128xbf16>
    %11 = vector.shape_cast %8 : vector<16x128xbf16> to vector<1x16x128xbf16>
    tpu.vector_store %arg5[%c0_7, %c0_8, %c0_9], %11 {strides = array<i32>} : memref<1x16x128xbf16, #tpu.memory_space<vmem>>, vector<1x16x128xbf16>,
    return
  }
  func.func @transform_0(%arg0: i32, %arg1: i32) -> (i32, i32, i32) {
    %c0_i32 = arith.constant 0 : i32
    %c0_i32_0 = arith.constant 0 : i32
    return %arg0, %arg1, %c0_i32 : i32, i32, i32
  }
  func.func @transform_1(%arg0: i32, %arg1: i32) -> (i32, i32, i32) {
    %c0_i32 = arith.constant 0 : i32
    %c0_i32_0 = arith.constant 0 : i32
    %c0_i32_1 = arith.constant 0 : i32
    return %arg0, %c0_i32, %c0_i32_0 : i32, i32, i32
  }
  func.func @transform_2(%arg0: i32, %arg1: i32) -> (i32, i32) {
    %c0_i32 = arith.constant 0 : i32
    %c0_i32_0 = arith.constant 0 : i32
    %c0_i32_1 = arith.constant 0 : i32
    return %c0_i32, %c0_i32_0 : i32, i32
  }
  func.func @transform_3(%arg0: i32, %arg1: i32) -> (i32, i32, i32) {
    %c0_i32 = arith.constant 0 : i32
    %c0_i32_0 = arith.constant 0 : i32
    return %arg0, %arg1, %c0_i32 : i32, i32, i32
  }
}

module attributes {stable_mosaic.version = 11 : i64} {
  func.func @_mm_bn_stats_kernel(%arg0: i32, %arg1: i32, %arg2: memref<1x16x128xbf16, #tpu.memory_space<vmem>>, %arg3: memref<1x128x128xbf16, #tpu.memory_space<vmem>>, %arg4: memref<1x16x128xbf16, #tpu.memory_space<vmem>>, %arg5: memref<2x128xf32, #tpu.memory_space<vmem>>) attributes {dimension_semantics = [#tpu.dimension_semantics<arbitrary>, #tpu.dimension_semantics<arbitrary>], iteration_bounds = array<i64: 4, 1>, scalar_prefetch = 0 : i64, scratch_operands = 0 : i64, tpu.core_type = #tpu.core_type<tc>, window_params = [{transform_indices = @transform_0, window_bounds = array<i64: 1, 16, 128>}, {transform_indices = @transform_1, window_bounds = array<i64: 1, 128, 128>}, {transform_indices = @transform_2, window_bounds = array<i64: 1, 16, 128>}, {pipeline_mode = #tpu.pipeline_mode<synchronous>, transform_indices = @transform_3, window_bounds = array<i64: 2, 128>}]} {
    %c0_i32 = arith.constant 0 : i32
    %0 = arith.cmpi eq, %arg0, %c0_i32 : i32
    %c0_i32_0 = arith.constant 0 : i32
    %1 = arith.cmpi eq, %arg1, %c0_i32_0 : i32
    %2 = arith.andi %0, %1 : i1
    %3 = arith.extui %2 : i1 to i32
    %c0_i32_1 = arith.constant 0 : i32
    %4 = arith.cmpi ne, %3, %c0_i32_1 : i32
    scf.if %4 {
      %cst_19 = arith.constant 0.000000e+00 : f32
      %25 = vector.broadcast %cst_19 : f32 to vector<2x128xf32>
      %c0_20 = arith.constant 0 : index
      %c0_21 = arith.constant 0 : index
      %26 = vector.load %arg5[%c0_20, %c0_21] : memref<2x128xf32, #tpu.memory_space<vmem>>, vector<2x128xf32>
      tpu.vector_store %arg5[%c0_20, %c0_21], %25 {strides = array<i32>} : memref<2x128xf32, #tpu.memory_space<vmem>>, vector<2x128xf32>,
    } else {
    }
    %c0 = arith.constant 0 : index
    %c0_2 = arith.constant 0 : index
    %c0_3 = arith.constant 0 : index
    %5 = vector.load %arg2[%c0, %c0_2, %c0_3] : memref<1x16x128xbf16, #tpu.memory_space<vmem>>, vector<1x16x128xbf16>
    %6 = vector.shape_cast %5 : vector<1x16x128xbf16> to vector<16x128xbf16>
    %c0_4 = arith.constant 0 : index
    %c0_5 = arith.constant 0 : index
    %c0_6 = arith.constant 0 : index
    %7 = vector.load %arg3[%c0_4, %c0_5, %c0_6] : memref<1x128x128xbf16, #tpu.memory_space<vmem>>, vector<1x128x128xbf16>
    %8 = vector.shape_cast %7 : vector<1x128x128xbf16> to vector<128x128xbf16>
    %cst = arith.constant dense<0.000000e+00> : vector<16x128xf32>
    %9 = tpu.matmul %6, %8, %cst {dimension_numbers = #tpu.dot_dimension_numbers<[1], [0], [0], [1], [0, 0, 1, 1], [], []>} : vector<16x128xbf16>, vector<128x128xbf16>, vector<16x128xf32> -> vector<16x128xf32>
    %10 = arith.truncf %9 : vector<16x128xf32> to vector<16x128xbf16>
    %c0_7 = arith.constant 0 : index
    %c0_8 = arith.constant 0 : index
    %c0_9 = arith.constant 0 : index
    %11 = vector.load %arg4[%c0_7, %c0_8, %c0_9] : memref<1x16x128xbf16, #tpu.memory_space<vmem>>, vector<1x16x128xbf16>
    %12 = vector.shape_cast %11 : vector<1x16x128xbf16> to vector<16x128xbf16>
    %13 = vector.shape_cast %10 : vector<16x128xbf16> to vector<1x16x128xbf16>
    tpu.vector_store %arg4[%c0_7, %c0_8, %c0_9], %13 {strides = array<i32>} : memref<1x16x128xbf16, #tpu.memory_space<vmem>>, vector<1x16x128xbf16>,
    %c0_10 = arith.constant 0 : index
    %c0_11 = arith.constant 0 : index
    %14 = vector.load %arg5[%c0_10, %c0_11] : memref<2x128xf32, #tpu.memory_space<vmem>>, vector<1x128xf32>
    %cst_12 = arith.constant dense<0.000000e+00> : vector<128xf32>
    %15 = vector.multi_reduction <add>, %9, %cst_12 [0] : vector<16x128xf32> to vector<128xf32>
    %16 = vector.shape_cast %15 : vector<128xf32> to vector<1x128xf32>
    %17 = arith.addf %14, %16 : vector<1x128xf32>
    %c0_13 = arith.constant 0 : index
    %c0_14 = arith.constant 0 : index
    %18 = vector.load %arg5[%c0_13, %c0_14] : memref<2x128xf32, #tpu.memory_space<vmem>>, vector<1x128xf32>
    tpu.vector_store %arg5[%c0_13, %c0_14], %17 {strides = array<i32>} : memref<2x128xf32, #tpu.memory_space<vmem>>, vector<1x128xf32>,
    %c1 = arith.constant 1 : index
    %c0_15 = arith.constant 0 : index
    %19 = vector.load %arg5[%c1, %c0_15] : memref<2x128xf32, #tpu.memory_space<vmem>>, vector<1x128xf32>
    %20 = arith.mulf %9, %9 : vector<16x128xf32>
    %cst_16 = arith.constant dense<0.000000e+00> : vector<128xf32>
    %21 = vector.multi_reduction <add>, %20, %cst_16 [0] : vector<16x128xf32> to vector<128xf32>
    %22 = vector.shape_cast %21 : vector<128xf32> to vector<1x128xf32>
    %23 = arith.addf %19, %22 : vector<1x128xf32>
    %c1_17 = arith.constant 1 : index
    %c0_18 = arith.constant 0 : index
    %24 = vector.load %arg5[%c1_17, %c0_18] : memref<2x128xf32, #tpu.memory_space<vmem>>, vector<1x128xf32>
    tpu.vector_store %arg5[%c1_17, %c0_18], %23 {strides = array<i32>} : memref<2x128xf32, #tpu.memory_space<vmem>>, vector<1x128xf32>,
    return
  }
  func.func @transform_0(%arg0: i32, %arg1: i32) -> (i32, i32, i32) {
    %c0_i32 = arith.constant 0 : i32
    %c0_i32_0 = arith.constant 0 : i32
    return %arg0, %arg1, %c0_i32 : i32, i32, i32
  }
  func.func @transform_1(%arg0: i32, %arg1: i32) -> (i32, i32, i32) {
    %c0_i32 = arith.constant 0 : i32
    %c0_i32_0 = arith.constant 0 : i32
    %c0_i32_1 = arith.constant 0 : i32
    return %arg0, %c0_i32, %c0_i32_0 : i32, i32, i32
  }
  func.func @transform_2(%arg0: i32, %arg1: i32) -> (i32, i32, i32) {
    %c0_i32 = arith.constant 0 : i32
    %c0_i32_0 = arith.constant 0 : i32
    return %arg0, %arg1, %c0_i32 : i32, i32, i32
  }
  func.func @transform_3(%arg0: i32, %arg1: i32) -> (i32, i32) {
    %c0_i32 = arith.constant 0 : i32
    %c0_i32_0 = arith.constant 0 : i32
    %c0_i32_1 = arith.constant 0 : i32
    return %c0_i32, %c0_i32_0 : i32, i32
  }
}

module attributes {stable_mosaic.version = 11 : i64} {
  func.func @_bn_relu_kernel(%arg0: i32, %arg1: memref<64x128xbf16, #tpu.memory_space<vmem>>, %arg2: memref<1x128xf32, #tpu.memory_space<vmem>>, %arg3: memref<1x128xf32, #tpu.memory_space<vmem>>, %arg4: memref<64x128xbf16, #tpu.memory_space<vmem>>) attributes {dimension_semantics = [#tpu.dimension_semantics<parallel>], iteration_bounds = array<i64: 1>, scalar_prefetch = 0 : i64, scratch_operands = 0 : i64, tpu.core_type = #tpu.core_type<tc>, window_params = [{transform_indices = @transform_0, window_bounds = array<i64: 64, 128>}, {pipeline_mode = #tpu.pipeline_mode<synchronous>, transform_indices = @transform_1, window_bounds = array<i64: 1, 128>}, {pipeline_mode = #tpu.pipeline_mode<synchronous>, transform_indices = @transform_2, window_bounds = array<i64: 1, 128>}, {transform_indices = @transform_3, window_bounds = array<i64: 64, 128>}]} {
    %c0 = arith.constant 0 : index
    %c0_0 = arith.constant 0 : index
    %0 = vector.load %arg1[%c0, %c0_0] : memref<64x128xbf16, #tpu.memory_space<vmem>>, vector<64x128xbf16>
    %1 = arith.extf %0 : vector<64x128xbf16> to vector<64x128xf32>
    %c0_1 = arith.constant 0 : index
    %c0_2 = arith.constant 0 : index
    %2 = vector.load %arg2[%c0_1, %c0_2] : memref<1x128xf32, #tpu.memory_space<vmem>>, vector<1x128xf32>
    %3 = vector.broadcast %2 : vector<1x128xf32> to vector<64x128xf32>
    %4 = arith.mulf %1, %3 : vector<64x128xf32>
    %c0_3 = arith.constant 0 : index
    %c0_4 = arith.constant 0 : index
    %5 = vector.load %arg3[%c0_3, %c0_4] : memref<1x128xf32, #tpu.memory_space<vmem>>, vector<1x128xf32>
    %6 = vector.broadcast %5 : vector<1x128xf32> to vector<64x128xf32>
    %7 = arith.addf %4, %6 : vector<64x128xf32>
    %cst = arith.constant 0.000000e+00 : f32
    %8 = vector.broadcast %cst : f32 to vector<64x128xf32>
    %9 = arith.maximumf %7, %8 : vector<64x128xf32>
    %10 = arith.truncf %9 : vector<64x128xf32> to vector<64x128xbf16>
    %c0_5 = arith.constant 0 : index
    %c0_6 = arith.constant 0 : index
    %11 = vector.load %arg4[%c0_5, %c0_6] : memref<64x128xbf16, #tpu.memory_space<vmem>>, vector<64x128xbf16>
    tpu.vector_store %arg4[%c0_5, %c0_6], %10 {strides = array<i32>} : memref<64x128xbf16, #tpu.memory_space<vmem>>, vector<64x128xbf16>,
    return
  }
  func.func @transform_0(%arg0: i32) -> (i32, i32) {
    %c0_i32 = arith.constant 0 : i32
    %c0_i32_0 = arith.constant 0 : i32
    return %arg0, %c0_i32 : i32, i32
  }
  func.func @transform_1(%arg0: i32) -> (i32, i32) {
    %c0_i32 = arith.constant 0 : i32
    %c0_i32_0 = arith.constant 0 : i32
    %c0_i32_1 = arith.constant 0 : i32
    return %c0_i32, %c0_i32_0 : i32, i32
  }
  func.func @transform_2(%arg0: i32) -> (i32, i32) {
    %c0_i32 = arith.constant 0 : i32
    %c0_i32_0 = arith.constant 0 : i32
    %c0_i32_1 = arith.constant 0 : i32
    return %c0_i32, %c0_i32_0 : i32, i32
  }
  func.func @transform_3(%arg0: i32) -> (i32, i32) {
    %c0_i32 = arith.constant 0 : i32
    %c0_i32_0 = arith.constant 0 : i32
    return %arg0, %c0_i32 : i32, i32
  }
}

module attributes {stable_mosaic.version = 11 : i64} {
  func.func @_bn_relu_kernel(%arg0: i32, %arg1: memref<128x128xbf16, #tpu.memory_space<vmem>>, %arg2: memref<1x128xf32, #tpu.memory_space<vmem>>, %arg3: memref<1x128xf32, #tpu.memory_space<vmem>>, %arg4: memref<128x128xbf16, #tpu.memory_space<vmem>>) attributes {dimension_semantics = [#tpu.dimension_semantics<parallel>], iteration_bounds = array<i64: 1>, scalar_prefetch = 0 : i64, scratch_operands = 0 : i64, tpu.core_type = #tpu.core_type<tc>, window_params = [{transform_indices = @transform_0, window_bounds = array<i64: 128, 128>}, {pipeline_mode = #tpu.pipeline_mode<synchronous>, transform_indices = @transform_1, window_bounds = array<i64: 1, 128>}, {pipeline_mode = #tpu.pipeline_mode<synchronous>, transform_indices = @transform_2, window_bounds = array<i64: 1, 128>}, {transform_indices = @transform_3, window_bounds = array<i64: 128, 128>}]} {
    %c0 = arith.constant 0 : index
    %c0_0 = arith.constant 0 : index
    %0 = vector.load %arg1[%c0, %c0_0] : memref<128x128xbf16, #tpu.memory_space<vmem>>, vector<128x128xbf16>
    %1 = arith.extf %0 : vector<128x128xbf16> to vector<128x128xf32>
    %c0_1 = arith.constant 0 : index
    %c0_2 = arith.constant 0 : index
    %2 = vector.load %arg2[%c0_1, %c0_2] : memref<1x128xf32, #tpu.memory_space<vmem>>, vector<1x128xf32>
    %3 = vector.broadcast %2 : vector<1x128xf32> to vector<128x128xf32>
    %4 = arith.mulf %1, %3 : vector<128x128xf32>
    %c0_3 = arith.constant 0 : index
    %c0_4 = arith.constant 0 : index
    %5 = vector.load %arg3[%c0_3, %c0_4] : memref<1x128xf32, #tpu.memory_space<vmem>>, vector<1x128xf32>
    %6 = vector.broadcast %5 : vector<1x128xf32> to vector<128x128xf32>
    %7 = arith.addf %4, %6 : vector<128x128xf32>
    %cst = arith.constant 0.000000e+00 : f32
    %8 = vector.broadcast %cst : f32 to vector<128x128xf32>
    %9 = arith.maximumf %7, %8 : vector<128x128xf32>
    %10 = arith.truncf %9 : vector<128x128xf32> to vector<128x128xbf16>
    %c0_5 = arith.constant 0 : index
    %c0_6 = arith.constant 0 : index
    %11 = vector.load %arg4[%c0_5, %c0_6] : memref<128x128xbf16, #tpu.memory_space<vmem>>, vector<128x128xbf16>
    tpu.vector_store %arg4[%c0_5, %c0_6], %10 {strides = array<i32>} : memref<128x128xbf16, #tpu.memory_space<vmem>>, vector<128x128xbf16>,
    return
  }
  func.func @transform_0(%arg0: i32) -> (i32, i32) {
    %c0_i32 = arith.constant 0 : i32
    %c0_i32_0 = arith.constant 0 : i32
    return %arg0, %c0_i32 : i32, i32
  }
  func.func @transform_1(%arg0: i32) -> (i32, i32) {
    %c0_i32 = arith.constant 0 : i32
    %c0_i32_0 = arith.constant 0 : i32
    %c0_i32_1 = arith.constant 0 : i32
    return %c0_i32, %c0_i32_0 : i32, i32
  }
  func.func @transform_2(%arg0: i32) -> (i32, i32) {
    %c0_i32 = arith.constant 0 : i32
    %c0_i32_0 = arith.constant 0 : i32
    %c0_i32_1 = arith.constant 0 : i32
    return %c0_i32, %c0_i32_0 : i32, i32
  }
  func.func @transform_3(%arg0: i32) -> (i32, i32) {
    %c0_i32 = arith.constant 0 : i32
    %c0_i32_0 = arith.constant 0 : i32
    return %arg0, %c0_i32 : i32, i32
  }
}

module attributes {stable_mosaic.version = 11 : i64} {
  func.func @_mm_bn_stats_kernel(%arg0: i32, %arg1: i32, %arg2: memref<1x32x64xbf16, #tpu.memory_space<vmem>>, %arg3: memref<1x64x128xbf16, #tpu.memory_space<vmem>>, %arg4: memref<1x32x128xbf16, #tpu.memory_space<vmem>>, %arg5: memref<2x128xf32, #tpu.memory_space<vmem>>) attributes {dimension_semantics = [#tpu.dimension_semantics<arbitrary>, #tpu.dimension_semantics<arbitrary>], iteration_bounds = array<i64: 4, 1>, scalar_prefetch = 0 : i64, scratch_operands = 0 : i64, tpu.core_type = #tpu.core_type<tc>, window_params = [{transform_indices = @transform_0, window_bounds = array<i64: 1, 32, 64>}, {transform_indices = @transform_1, window_bounds = array<i64: 1, 64, 128>}, {transform_indices = @transform_2, window_bounds = array<i64: 1, 32, 128>}, {pipeline_mode = #tpu.pipeline_mode<synchronous>, transform_indices = @transform_3, window_bounds = array<i64: 2, 128>}]} {
    %c0_i32 = arith.constant 0 : i32
    %0 = arith.cmpi eq, %arg0, %c0_i32 : i32
    %c0_i32_0 = arith.constant 0 : i32
    %1 = arith.cmpi eq, %arg1, %c0_i32_0 : i32
    %2 = arith.andi %0, %1 : i1
    %3 = arith.extui %2 : i1 to i32
    %c0_i32_1 = arith.constant 0 : i32
    %4 = arith.cmpi ne, %3, %c0_i32_1 : i32
    scf.if %4 {
      %cst_19 = arith.constant 0.000000e+00 : f32
      %25 = vector.broadcast %cst_19 : f32 to vector<2x128xf32>
      %c0_20 = arith.constant 0 : index
      %c0_21 = arith.constant 0 : index
      %26 = vector.load %arg5[%c0_20, %c0_21] : memref<2x128xf32, #tpu.memory_space<vmem>>, vector<2x128xf32>
      tpu.vector_store %arg5[%c0_20, %c0_21], %25 {strides = array<i32>} : memref<2x128xf32, #tpu.memory_space<vmem>>, vector<2x128xf32>,
    } else {
    }
    %c0 = arith.constant 0 : index
    %c0_2 = arith.constant 0 : index
    %c0_3 = arith.constant 0 : index
    %5 = vector.load %arg2[%c0, %c0_2, %c0_3] : memref<1x32x64xbf16, #tpu.memory_space<vmem>>, vector<1x32x64xbf16>
    %6 = vector.shape_cast %5 : vector<1x32x64xbf16> to vector<32x64xbf16>
    %c0_4 = arith.constant 0 : index
    %c0_5 = arith.constant 0 : index
    %c0_6 = arith.constant 0 : index
    %7 = vector.load %arg3[%c0_4, %c0_5, %c0_6] : memref<1x64x128xbf16, #tpu.memory_space<vmem>>, vector<1x64x128xbf16>
    %8 = vector.shape_cast %7 : vector<1x64x128xbf16> to vector<64x128xbf16>
    %cst = arith.constant dense<0.000000e+00> : vector<32x128xf32>
    %9 = tpu.matmul %6, %8, %cst {dimension_numbers = #tpu.dot_dimension_numbers<[1], [0], [0], [1], [0, 0, 1, 1], [], []>} : vector<32x64xbf16>, vector<64x128xbf16>, vector<32x128xf32> -> vector<32x128xf32>
    %10 = arith.truncf %9 : vector<32x128xf32> to vector<32x128xbf16>
    %c0_7 = arith.constant 0 : index
    %c0_8 = arith.constant 0 : index
    %c0_9 = arith.constant 0 : index
    %11 = vector.load %arg4[%c0_7, %c0_8, %c0_9] : memref<1x32x128xbf16, #tpu.memory_space<vmem>>, vector<1x32x128xbf16>
    %12 = vector.shape_cast %11 : vector<1x32x128xbf16> to vector<32x128xbf16>
    %13 = vector.shape_cast %10 : vector<32x128xbf16> to vector<1x32x128xbf16>
    tpu.vector_store %arg4[%c0_7, %c0_8, %c0_9], %13 {strides = array<i32>} : memref<1x32x128xbf16, #tpu.memory_space<vmem>>, vector<1x32x128xbf16>,
    %c0_10 = arith.constant 0 : index
    %c0_11 = arith.constant 0 : index
    %14 = vector.load %arg5[%c0_10, %c0_11] : memref<2x128xf32, #tpu.memory_space<vmem>>, vector<1x128xf32>
    %cst_12 = arith.constant dense<0.000000e+00> : vector<128xf32>
    %15 = vector.multi_reduction <add>, %9, %cst_12 [0] : vector<32x128xf32> to vector<128xf32>
    %16 = vector.shape_cast %15 : vector<128xf32> to vector<1x128xf32>
    %17 = arith.addf %14, %16 : vector<1x128xf32>
    %c0_13 = arith.constant 0 : index
    %c0_14 = arith.constant 0 : index
    %18 = vector.load %arg5[%c0_13, %c0_14] : memref<2x128xf32, #tpu.memory_space<vmem>>, vector<1x128xf32>
    tpu.vector_store %arg5[%c0_13, %c0_14], %17 {strides = array<i32>} : memref<2x128xf32, #tpu.memory_space<vmem>>, vector<1x128xf32>,
    %c1 = arith.constant 1 : index
    %c0_15 = arith.constant 0 : index
    %19 = vector.load %arg5[%c1, %c0_15] : memref<2x128xf32, #tpu.memory_space<vmem>>, vector<1x128xf32>
    %20 = arith.mulf %9, %9 : vector<32x128xf32>
    %cst_16 = arith.constant dense<0.000000e+00> : vector<128xf32>
    %21 = vector.multi_reduction <add>, %20, %cst_16 [0] : vector<32x128xf32> to vector<128xf32>
    %22 = vector.shape_cast %21 : vector<128xf32> to vector<1x128xf32>
    %23 = arith.addf %19, %22 : vector<1x128xf32>
    %c1_17 = arith.constant 1 : index
    %c0_18 = arith.constant 0 : index
    %24 = vector.load %arg5[%c1_17, %c0_18] : memref<2x128xf32, #tpu.memory_space<vmem>>, vector<1x128xf32>
    tpu.vector_store %arg5[%c1_17, %c0_18], %23 {strides = array<i32>} : memref<2x128xf32, #tpu.memory_space<vmem>>, vector<1x128xf32>,
    return
  }
  func.func @transform_0(%arg0: i32, %arg1: i32) -> (i32, i32, i32) {
    %c0_i32 = arith.constant 0 : i32
    %c0_i32_0 = arith.constant 0 : i32
    return %arg0, %arg1, %c0_i32 : i32, i32, i32
  }
  func.func @transform_1(%arg0: i32, %arg1: i32) -> (i32, i32, i32) {
    %c0_i32 = arith.constant 0 : i32
    %c0_i32_0 = arith.constant 0 : i32
    %c0_i32_1 = arith.constant 0 : i32
    return %arg0, %c0_i32, %c0_i32_0 : i32, i32, i32
  }
  func.func @transform_2(%arg0: i32, %arg1: i32) -> (i32, i32, i32) {
    %c0_i32 = arith.constant 0 : i32
    %c0_i32_0 = arith.constant 0 : i32
    return %arg0, %arg1, %c0_i32 : i32, i32, i32
  }
  func.func @transform_3(%arg0: i32, %arg1: i32) -> (i32, i32) {
    %c0_i32 = arith.constant 0 : i32
    %c0_i32_0 = arith.constant 0 : i32
    %c0_i32_1 = arith.constant 0 : i32
    return %c0_i32, %c0_i32_0 : i32, i32
  }
}

module attributes {stable_mosaic.version = 11 : i64} {
  func.func @_mm_bn_stats_kernel(%arg0: i32, %arg1: i32, %arg2: memref<1x128x32xbf16, #tpu.memory_space<vmem>>, %arg3: memref<1x32x128xbf16, #tpu.memory_space<vmem>>, %arg4: memref<1x128x128xbf16, #tpu.memory_space<vmem>>, %arg5: memref<2x128xf32, #tpu.memory_space<vmem>>) attributes {dimension_semantics = [#tpu.dimension_semantics<arbitrary>, #tpu.dimension_semantics<arbitrary>], iteration_bounds = array<i64: 4, 1>, scalar_prefetch = 0 : i64, scratch_operands = 0 : i64, tpu.core_type = #tpu.core_type<tc>, window_params = [{transform_indices = @transform_0, window_bounds = array<i64: 1, 128, 32>}, {transform_indices = @transform_1, window_bounds = array<i64: 1, 32, 128>}, {transform_indices = @transform_2, window_bounds = array<i64: 1, 128, 128>}, {pipeline_mode = #tpu.pipeline_mode<synchronous>, transform_indices = @transform_3, window_bounds = array<i64: 2, 128>}]} {
    %c0_i32 = arith.constant 0 : i32
    %0 = arith.cmpi eq, %arg0, %c0_i32 : i32
    %c0_i32_0 = arith.constant 0 : i32
    %1 = arith.cmpi eq, %arg1, %c0_i32_0 : i32
    %2 = arith.andi %0, %1 : i1
    %3 = arith.extui %2 : i1 to i32
    %c0_i32_1 = arith.constant 0 : i32
    %4 = arith.cmpi ne, %3, %c0_i32_1 : i32
    scf.if %4 {
      %cst_19 = arith.constant 0.000000e+00 : f32
      %25 = vector.broadcast %cst_19 : f32 to vector<2x128xf32>
      %c0_20 = arith.constant 0 : index
      %c0_21 = arith.constant 0 : index
      %26 = vector.load %arg5[%c0_20, %c0_21] : memref<2x128xf32, #tpu.memory_space<vmem>>, vector<2x128xf32>
      tpu.vector_store %arg5[%c0_20, %c0_21], %25 {strides = array<i32>} : memref<2x128xf32, #tpu.memory_space<vmem>>, vector<2x128xf32>,
    } else {
    }
    %c0 = arith.constant 0 : index
    %c0_2 = arith.constant 0 : index
    %c0_3 = arith.constant 0 : index
    %5 = vector.load %arg2[%c0, %c0_2, %c0_3] : memref<1x128x32xbf16, #tpu.memory_space<vmem>>, vector<1x128x32xbf16>
    %6 = vector.shape_cast %5 : vector<1x128x32xbf16> to vector<128x32xbf16>
    %c0_4 = arith.constant 0 : index
    %c0_5 = arith.constant 0 : index
    %c0_6 = arith.constant 0 : index
    %7 = vector.load %arg3[%c0_4, %c0_5, %c0_6] : memref<1x32x128xbf16, #tpu.memory_space<vmem>>, vector<1x32x128xbf16>
    %8 = vector.shape_cast %7 : vector<1x32x128xbf16> to vector<32x128xbf16>
    %cst = arith.constant dense<0.000000e+00> : vector<128x128xf32>
    %9 = tpu.matmul %6, %8, %cst {dimension_numbers = #tpu.dot_dimension_numbers<[1], [0], [0], [1], [0, 0, 1, 1], [], []>} : vector<128x32xbf16>, vector<32x128xbf16>, vector<128x128xf32> -> vector<128x128xf32>
    %10 = arith.truncf %9 : vector<128x128xf32> to vector<128x128xbf16>
    %c0_7 = arith.constant 0 : index
    %c0_8 = arith.constant 0 : index
    %c0_9 = arith.constant 0 : index
    %11 = vector.load %arg4[%c0_7, %c0_8, %c0_9] : memref<1x128x128xbf16, #tpu.memory_space<vmem>>, vector<1x128x128xbf16>
    %12 = vector.shape_cast %11 : vector<1x128x128xbf16> to vector<128x128xbf16>
    %13 = vector.shape_cast %10 : vector<128x128xbf16> to vector<1x128x128xbf16>
    tpu.vector_store %arg4[%c0_7, %c0_8, %c0_9], %13 {strides = array<i32>} : memref<1x128x128xbf16, #tpu.memory_space<vmem>>, vector<1x128x128xbf16>,
    %c0_10 = arith.constant 0 : index
    %c0_11 = arith.constant 0 : index
    %14 = vector.load %arg5[%c0_10, %c0_11] : memref<2x128xf32, #tpu.memory_space<vmem>>, vector<1x128xf32>
    %cst_12 = arith.constant dense<0.000000e+00> : vector<128xf32>
    %15 = vector.multi_reduction <add>, %9, %cst_12 [0] : vector<128x128xf32> to vector<128xf32>
    %16 = vector.shape_cast %15 : vector<128xf32> to vector<1x128xf32>
    %17 = arith.addf %14, %16 : vector<1x128xf32>
    %c0_13 = arith.constant 0 : index
    %c0_14 = arith.constant 0 : index
    %18 = vector.load %arg5[%c0_13, %c0_14] : memref<2x128xf32, #tpu.memory_space<vmem>>, vector<1x128xf32>
    tpu.vector_store %arg5[%c0_13, %c0_14], %17 {strides = array<i32>} : memref<2x128xf32, #tpu.memory_space<vmem>>, vector<1x128xf32>,
    %c1 = arith.constant 1 : index
    %c0_15 = arith.constant 0 : index
    %19 = vector.load %arg5[%c1, %c0_15] : memref<2x128xf32, #tpu.memory_space<vmem>>, vector<1x128xf32>
    %20 = arith.mulf %9, %9 : vector<128x128xf32>
    %cst_16 = arith.constant dense<0.000000e+00> : vector<128xf32>
    %21 = vector.multi_reduction <add>, %20, %cst_16 [0] : vector<128x128xf32> to vector<128xf32>
    %22 = vector.shape_cast %21 : vector<128xf32> to vector<1x128xf32>
    %23 = arith.addf %19, %22 : vector<1x128xf32>
    %c1_17 = arith.constant 1 : index
    %c0_18 = arith.constant 0 : index
    %24 = vector.load %arg5[%c1_17, %c0_18] : memref<2x128xf32, #tpu.memory_space<vmem>>, vector<1x128xf32>
    tpu.vector_store %arg5[%c1_17, %c0_18], %23 {strides = array<i32>} : memref<2x128xf32, #tpu.memory_space<vmem>>, vector<1x128xf32>,
    return
  }
  func.func @transform_0(%arg0: i32, %arg1: i32) -> (i32, i32, i32) {
    %c0_i32 = arith.constant 0 : i32
    %c0_i32_0 = arith.constant 0 : i32
    return %arg0, %arg1, %c0_i32 : i32, i32, i32
  }
  func.func @transform_1(%arg0: i32, %arg1: i32) -> (i32, i32, i32) {
    %c0_i32 = arith.constant 0 : i32
    %c0_i32_0 = arith.constant 0 : i32
    %c0_i32_1 = arith.constant 0 : i32
    return %arg0, %c0_i32, %c0_i32_0 : i32, i32, i32
  }
  func.func @transform_2(%arg0: i32, %arg1: i32) -> (i32, i32, i32) {
    %c0_i32 = arith.constant 0 : i32
    %c0_i32_0 = arith.constant 0 : i32
    return %arg0, %arg1, %c0_i32 : i32, i32, i32
  }
  func.func @transform_3(%arg0: i32, %arg1: i32) -> (i32, i32) {
    %c0_i32 = arith.constant 0 : i32
    %c0_i32_0 = arith.constant 0 : i32
    %c0_i32_1 = arith.constant 0 : i32
    return %c0_i32, %c0_i32_0 : i32, i32
  }
}

module attributes {stable_mosaic.version = 11 : i64} {
  func.func @_bn_relu_kernel(%arg0: i32, %arg1: memref<512x128xbf16, #tpu.memory_space<vmem>>, %arg2: memref<1x128xf32, #tpu.memory_space<vmem>>, %arg3: memref<1x128xf32, #tpu.memory_space<vmem>>, %arg4: memref<512x128xbf16, #tpu.memory_space<vmem>>) attributes {dimension_semantics = [#tpu.dimension_semantics<parallel>], iteration_bounds = array<i64: 1>, scalar_prefetch = 0 : i64, scratch_operands = 0 : i64, tpu.core_type = #tpu.core_type<tc>, window_params = [{transform_indices = @transform_0, window_bounds = array<i64: 512, 128>}, {pipeline_mode = #tpu.pipeline_mode<synchronous>, transform_indices = @transform_1, window_bounds = array<i64: 1, 128>}, {pipeline_mode = #tpu.pipeline_mode<synchronous>, transform_indices = @transform_2, window_bounds = array<i64: 1, 128>}, {transform_indices = @transform_3, window_bounds = array<i64: 512, 128>}]} {
    %c0 = arith.constant 0 : index
    %c0_0 = arith.constant 0 : index
    %0 = vector.load %arg1[%c0, %c0_0] : memref<512x128xbf16, #tpu.memory_space<vmem>>, vector<512x128xbf16>
    %1 = arith.extf %0 : vector<512x128xbf16> to vector<512x128xf32>
    %c0_1 = arith.constant 0 : index
    %c0_2 = arith.constant 0 : index
    %2 = vector.load %arg2[%c0_1, %c0_2] : memref<1x128xf32, #tpu.memory_space<vmem>>, vector<1x128xf32>
    %3 = vector.broadcast %2 : vector<1x128xf32> to vector<512x128xf32>
    %4 = arith.mulf %1, %3 : vector<512x128xf32>
    %c0_3 = arith.constant 0 : index
    %c0_4 = arith.constant 0 : index
    %5 = vector.load %arg3[%c0_3, %c0_4] : memref<1x128xf32, #tpu.memory_space<vmem>>, vector<1x128xf32>
    %6 = vector.broadcast %5 : vector<1x128xf32> to vector<512x128xf32>
    %7 = arith.addf %4, %6 : vector<512x128xf32>
    %cst = arith.constant 0.000000e+00 : f32
    %8 = vector.broadcast %cst : f32 to vector<512x128xf32>
    %9 = arith.maximumf %7, %8 : vector<512x128xf32>
    %10 = arith.truncf %9 : vector<512x128xf32> to vector<512x128xbf16>
    %c0_5 = arith.constant 0 : index
    %c0_6 = arith.constant 0 : index
    %11 = vector.load %arg4[%c0_5, %c0_6] : memref<512x128xbf16, #tpu.memory_space<vmem>>, vector<512x128xbf16>
    tpu.vector_store %arg4[%c0_5, %c0_6], %10 {strides = array<i32>} : memref<512x128xbf16, #tpu.memory_space<vmem>>, vector<512x128xbf16>,
    return
  }
  func.func @transform_0(%arg0: i32) -> (i32, i32) {
    %c0_i32 = arith.constant 0 : i32
    %c0_i32_0 = arith.constant 0 : i32
    return %arg0, %c0_i32 : i32, i32
  }
  func.func @transform_1(%arg0: i32) -> (i32, i32) {
    %c0_i32 = arith.constant 0 : i32
    %c0_i32_0 = arith.constant 0 : i32
    %c0_i32_1 = arith.constant 0 : i32
    return %c0_i32, %c0_i32_0 : i32, i32
  }
  func.func @transform_2(%arg0: i32) -> (i32, i32) {
    %c0_i32 = arith.constant 0 : i32
    %c0_i32_0 = arith.constant 0 : i32
    %c0_i32_1 = arith.constant 0 : i32
    return %c0_i32, %c0_i32_0 : i32, i32
  }
  func.func @transform_3(%arg0: i32) -> (i32, i32) {
    %c0_i32 = arith.constant 0 : i32
    %c0_i32_0 = arith.constant 0 : i32
    return %arg0, %c0_i32 : i32, i32
  }
}

module attributes {stable_mosaic.version = 11 : i64} {
  func.func @_mm_bias_act_kernel(%arg0: i32, %arg1: i32, %arg2: memref<1x512x16xbf16, #tpu.memory_space<vmem>>, %arg3: memref<1x16x128xbf16, #tpu.memory_space<vmem>>, %arg4: memref<1x128xf32, #tpu.memory_space<vmem>>, %arg5: memref<1x512x128xf32, #tpu.memory_space<vmem>>) attributes {dimension_semantics = [#tpu.dimension_semantics<parallel>, #tpu.dimension_semantics<parallel>], iteration_bounds = array<i64: 4, 1>, scalar_prefetch = 0 : i64, scratch_operands = 0 : i64, tpu.core_type = #tpu.core_type<tc>, window_params = [{transform_indices = @transform_0, window_bounds = array<i64: 1, 512, 16>}, {transform_indices = @transform_1, window_bounds = array<i64: 1, 16, 128>}, {pipeline_mode = #tpu.pipeline_mode<synchronous>, transform_indices = @transform_2, window_bounds = array<i64: 1, 128>}, {transform_indices = @transform_3, window_bounds = array<i64: 1, 512, 128>}]} {
    %c0 = arith.constant 0 : index
    %c0_0 = arith.constant 0 : index
    %c0_1 = arith.constant 0 : index
    %0 = vector.load %arg2[%c0, %c0_0, %c0_1] : memref<1x512x16xbf16, #tpu.memory_space<vmem>>, vector<1x512x16xbf16>
    %1 = vector.shape_cast %0 : vector<1x512x16xbf16> to vector<512x16xbf16>
    %c0_2 = arith.constant 0 : index
    %c0_3 = arith.constant 0 : index
    %c0_4 = arith.constant 0 : index
    %2 = vector.load %arg3[%c0_2, %c0_3, %c0_4] : memref<1x16x128xbf16, #tpu.memory_space<vmem>>, vector<1x16x128xbf16>
    %3 = vector.shape_cast %2 : vector<1x16x128xbf16> to vector<16x128xbf16>
    %cst = arith.constant dense<0.000000e+00> : vector<512x128xf32>
    %4 = tpu.matmul %1, %3, %cst {dimension_numbers = #tpu.dot_dimension_numbers<[1], [0], [0], [1], [0, 0, 1, 1], [], []>} : vector<512x16xbf16>, vector<16x128xbf16>, vector<512x128xf32> -> vector<512x128xf32>
    %c0_5 = arith.constant 0 : index
    %c0_6 = arith.constant 0 : index
    %5 = vector.load %arg4[%c0_5, %c0_6] : memref<1x128xf32, #tpu.memory_space<vmem>>, vector<1x128xf32>
    %6 = vector.broadcast %5 : vector<1x128xf32> to vector<512x128xf32>
    %7 = arith.addf %4, %6 : vector<512x128xf32>
    %8 = math.tanh %7 : vector<512x128xf32>
    %c0_7 = arith.constant 0 : index
    %c0_8 = arith.constant 0 : index
    %c0_9 = arith.constant 0 : index
    %9 = vector.load %arg5[%c0_7, %c0_8, %c0_9] : memref<1x512x128xf32, #tpu.memory_space<vmem>>, vector<1x512x128xf32>
    %10 = vector.shape_cast %9 : vector<1x512x128xf32> to vector<512x128xf32>
    %11 = vector.shape_cast %8 : vector<512x128xf32> to vector<1x512x128xf32>
    tpu.vector_store %arg5[%c0_7, %c0_8, %c0_9], %11 {strides = array<i32>} : memref<1x512x128xf32, #tpu.memory_space<vmem>>, vector<1x512x128xf32>,
    return
  }
  func.func @transform_0(%arg0: i32, %arg1: i32) -> (i32, i32, i32) {
    %c0_i32 = arith.constant 0 : i32
    %c0_i32_0 = arith.constant 0 : i32
    return %arg0, %arg1, %c0_i32 : i32, i32, i32
  }
  func.func @transform_1(%arg0: i32, %arg1: i32) -> (i32, i32, i32) {
    %c0_i32 = arith.constant 0 : i32
    %c0_i32_0 = arith.constant 0 : i32
    %c0_i32_1 = arith.constant 0 : i32
    return %arg0, %c0_i32, %c0_i32_0 : i32, i32, i32
  }
  func.func @transform_2(%arg0: i32, %arg1: i32) -> (i32, i32) {
    %c0_i32 = arith.constant 0 : i32
    %c0_i32_0 = arith.constant 0 : i32
    %c0_i32_1 = arith.constant 0 : i32
    return %c0_i32, %c0_i32_0 : i32, i32
  }
  func.func @transform_3(%arg0: i32, %arg1: i32) -> (i32, i32, i32) {
    %c0_i32 = arith.constant 0 : i32
    %c0_i32_0 = arith.constant 0 : i32
    return %arg0, %arg1, %c0_i32 : i32, i32, i32
  }
}

</mosaic_0001>

<bundles_post_ra>
// kernel: squeeze.71
= control target key start
LH: loop header
LB: loop body
LE: loop exit
PB: predicated region body
PF: predicated region fallthrough
CT: control target
= control target key end

     0   :  { %s1165_s8 = smov 122   ;;  %s1166_s9 = smov 124   ;;  %vm19_vm0 = vcmask 15360   ;;  %s1625_s0 = inlined_call_operand.vmem [shape: bf16[1,2,128], index: 0, kind: input, shape index: {}]   ;;  %s1626_s1 = inlined_call_operand.vmem [shape: bf16[2,32,2,2], index: 1, kind: output, shape index: {}]  }
   0x1   :  { %v14_v0 = vld [vmem:[%s1625_s0] sm:$0x1]  ;;  %s1164_s0 = smov 126   ;;  %s1167_s10 = smov 120  }
   0x2   :  { %v15_v1 = vunpack.c.l.bf16 %v14_v0  ;;  %s1168_s11 = smov 118   ;;  %s1169_s12 = smov 116  }
   0x3   :  { %s1170_s13 = smov 114   ;;  %s1171_s14 = smov 112  }
   0x4   :  { %17 = vst [vmem:[#allocation1] sm:$0x3] %v15_v1  ;;  %s1172_s15 = smov 110   ;;  %s1173_s16 = smov 108  }
   0x5   :  { %s1174_s17 = smov 106   ;;  %s1175_s18 = smov 104  }
   0x6   :  { %s1176_s19 = smov 102   ;;  %s1177_s20 = smov 100  }
   0x7   :  { %s1178_s21 = smov 98   ;;  %s1179_s22 = smov 96  }
   0x8   :  { %s1180_s23 = smov 94   ;;  %s1181_s24 = smov 92  }
   0x9   :  { %s1182_s25 = smov 90   ;;  %s1183_s26 = smov 88  }
   0xa   :  { %s1184_s27 = smov 86   ;;  %s1185_s28 = smov 84  }
   0xb   :  { %v23_v2 = vld [vmem:[#allocation1] sm:$0x3]   ;;  %s1186_s29 = smov 82   ;;  %s1187_s30 = smov 80  }
   0xc   :  { %v39_v3 = vld [vmem:[#allocation1] sm:$0x3]   ;;  %24 = vrot.lane.b32.xlu0 %v23_v2, %s1164_s0  ;;  %s1188_s2 = smov 78   ;;  %s1189_s3 = smov 76  }
   0xd   :  { %40 = vrot.lane.b32.xlu1 %v39_v3, %s1165_s8  ;;  %v31_v4 = vld [vmem:[#allocation1] sm:$0x3]   ;;  %s1190_s4 = smov 74   ;;  %s1191_s5 = smov 72  }
   0xe   :  { %v47_v5 = vld [vmem:[#allocation1] sm:$0x3]   ;;  %s1192_s6 = smov 70   ;;  %s1193_s7 = smov 68  }
   0xf   :  { %v55_v6 = vld [vmem:[#allocation1] sm:$0x3]   ;;  %s1194_s0 = smov 66   ;;  %s1195_s8 = smov 64  }
  0x10   :  { %32 = vrot.lane.b32.xlu0 %v31_v4, %s1166_s9  ;;  %v63_v7 = vld [vmem:[#allocation1] sm:$0x3]   ;;  %s1196_s9 = smov 62  }
  0x11   :  { %48 = vrot.lane.b32.xlu1 %v47_v5, %s1167_s10  ;;  %v71_v8 = vld [vmem:[#allocation1] sm:$0x3]   ;;  %s1197_s10 = smov 60  }
  0x12   :  { %v79_v9 = vld [vmem:[#allocation1] sm:$0x3]  }
  0x13   :  { %v87_v10 = vld [vmem:[#allocation1] sm:$0x3]  }
  0x14   :  { %56 = vrot.lane.b32.xlu0 %v55_v6, %s1168_s11  ;;  %v95_v11 = vld [vmem:[#allocation1] sm:$0x3]   ;;  %s1198_s11 = smov 58  }
  0x15   :  { %64 = vrot.lane.b32.xlu1 %v63_v7, %s1169_s12  ;;  %v103_v12 = vld [vmem:[#allocation1] sm:$0x3]   ;;  %s1199_s12 = smov 56  }
  0x16   :  { %v111_v13 = vld [vmem:[#allocation1] sm:$0x3]  }
  0x17   :  { %v119_v14 = vld [vmem:[#allocation1] sm:$0x3]  }
  0x18   :  { %72 = vrot.lane.b32.xlu0 %v71_v8, %s1170_s13  ;;  %v127_v15 = vld [vmem:[#allocation1] sm:$0x3]   ;;  %s1200_s13 = smov 54  }
  0x19   :  { %80 = vrot.lane.b32.xlu1 %v79_v9, %s1171_s14  ;;  %v18_v16 = vld [vmem:[#allocation1] sm:$0x3]   ;;  %s1201_s14 = smov 52  }
  0x1a   :  { %v135_v17 = vld [vmem:[#allocation1] sm:$0x3]   ;;  %20 = vst.msk [vmem:[#allocation0] sm:$0x1] %vm19_vm0, %v18_v16   ;;  %22 = vst.msk [vmem:[#allocation0 + $0xff] sm:$0x2] %vm19_vm0, %v18_v16  }
  0x1b   :  { %v143_v18 = vld [vmem:[#allocation1] sm:$0x3]  }
  0x1c   :  { %88 = vrot.lane.b32.xlu0 %v87_v10, %s1172_s15  ;;  %v151_v19 = vld [vmem:[#allocation1] sm:$0x3]   ;;  %s1202_s15 = smov 50   ;;  %v1226_v10 = vmov 0.0  }
  0x1d   :  { %96 = vrot.lane.b32.xlu1 %v95_v11, %s1173_s16  ;;  %v159_v20 = vld [vmem:[#allocation1] sm:$0x3]   ;;  %s1203_s16 = smov 48  }
  0x1e   :  { %v167_v21 = vld [vmem:[#allocation1] sm:$0x3]  }
  0x1f   :  { %v175_v22 = vld [vmem:[#allocation1] sm:$0x3]  }
  0x20   :  { %104 = vrot.lane.b32.xlu0 %v103_v12, %s1174_s17  ;;  %v183_v23 = vld [vmem:[#allocation1] sm:$0x3]   ;;  %s1204_s17 = smov 46  }
  0x21   :  { %112 = vrot.lane.b32.xlu1 %v111_v13, %s1175_s18  ;;  %v191_v24 = vld [vmem:[#allocation1] sm:$0x3]   ;;  %s1205_s18 = smov 44  }
  0x22   :  { %v199_v25 = vld [vmem:[#allocation1] sm:$0x3]  }
  0x23   :  { %v207_v26 = vld [vmem:[#allocation1] sm:$0x3]  }
  0x24   :  { %120 = vrot.lane.b32.xlu0 %v119_v14, %s1176_s19  ;;  %v215_v27 = vld [vmem:[#allocation1] sm:$0x3]   ;;  %s1206_s19 = smov 42  }
  0x25   :  { %128 = vrot.lane.b32.xlu1 %v127_v15, %s1177_s20  ;;  %v223_v28 = vld [vmem:[#allocation1] sm:$0x3]   ;;  %s1207_s20 = smov 40  }
  0x26   :  { %v231_v29 = vld [vmem:[#allocation1] sm:$0x3]  }
  0x27   :  { %v239_v30 = vld [vmem:[#allocation1] sm:$0x3]  }
  0x28   :  { %136 = vrot.lane.b32.xlu0 %v135_v17, %s1178_s21  ;;  %v247_v31 = vld [vmem:[#allocation1] sm:$0x3]   ;;  %s1208_s21 = smov 38  }
  0x29   :  { %144 = vrot.lane.b32.xlu1 %v143_v18, %s1179_s22  ;;  %v255_v32 = vld [vmem:[#allocation1] sm:$0x3]   ;;  %s1209_s22 = smov 36  }
  0x2a   :  { %v263_v33 = vld [vmem:[#allocation1] sm:$0x3]  }
  0x2b   :  { %v271_v34 = vld [vmem:[#allocation1] sm:$0x3]  }
  0x2c   :  { %152 = vrot.lane.b32.xlu0 %v151_v19, %s1180_s23  ;;  %v279_v35 = vld [vmem:[#allocation1] sm:$0x3]   ;;  %s1210_s23 = smov 34  }
  0x2d   :  { %160 = vrot.lane.b32.xlu1 %v159_v20, %s1181_s24  ;;  %v287_v36 = vld [vmem:[#allocation1] sm:$0x3]   ;;  %s1211_s24 = smov 32  }
  0x2e   :  { %v295_v37 = vld [vmem:[#allocation1] sm:$0x3]  }
  0x2f   :  { %v303_v38 = vld [vmem:[#allocation1] sm:$0x3]  }
  0x30   :  { %168 = vrot.lane.b32.xlu0 %v167_v21, %s1182_s25  ;;  %v311_v39 = vld [vmem:[#allocation1] sm:$0x3]   ;;  %s1212_s25 = smov 30  }
  0x31   :  { %176 = vrot.lane.b32.xlu1 %v175_v22, %s1183_s26  ;;  %v319_v40 = vld [vmem:[#allocation1] sm:$0x3]   ;;  %s1213_s26 = smov 28  }
  0x32   :  { %v327_v41 = vld [vmem:[#allocation1] sm:$0x3]  }
  0x33   :  { %v335_v42 = vld [vmem:[#allocation1] sm:$0x3]  }
  0x34   :  { %184 = vrot.lane.b32.xlu0 %v183_v23, %s1184_s27  ;;  %v343_v43 = vld [vmem:[#allocation1] sm:$0x3]   ;;  %s1214_s27 = smov 26  }
  0x35   :  { %192 = vrot.lane.b32.xlu1 %v191_v24, %s1185_s28  ;;  %v351_v44 = vld [vmem:[#allocation1] sm:$0x3]   ;;  %s1215_s28 = smov 24  }
  0x36   :  { %v359_v45 = vld [vmem:[#allocation1] sm:$0x3]  }
  0x37   :  { %v367_v46 = vld [vmem:[#allocation1] sm:$0x3]  }
  0x38   :  { %200 = vrot.lane.b32.xlu0 %v199_v25, %s1186_s29  ;;  %v375_v47 = vld [vmem:[#allocation1] sm:$0x3]   ;;  %s1216_s29 = smov 22  }
  0x39   :  { %208 = vrot.lane.b32.xlu1 %v207_v26, %s1187_s30  ;;  %v383_v48 = vld [vmem:[#allocation1] sm:$0x3]   ;;  %s1217_s30 = smov 20  }
  0x3a   :  { %v391_v49 = vld [vmem:[#allocation1] sm:$0x3]  }
  0x3b   :  { %v399_v50 = vld [vmem:[#allocation1] sm:$0x3]  }
  0x3c   :  { %216 = vrot.lane.b32.xlu0 %v215_v27, %s1188_s2  ;;  %v407_v51 = vld [vmem:[#allocation1] sm:$0x3]   ;;  %s1218_s2 = smov 18  }
  0x3d   :  { %224 = vrot.lane.b32.xlu1 %v223_v28, %s1189_s3  ;;  %v415_v52 = vld [vmem:[#allocation1] sm:$0x3]   ;;  %s1219_s3 = smov 16  }
  0x3e   :  { %v423_v53 = vld [vmem:[#allocation1] sm:$0x3]  }
  0x3f   :  { %v431_v54 = vld [vmem:[#allocation1] sm:$0x3]  }
  0x40   :  { %232 = vrot.lane.b32.xlu0 %v231_v29, %s1190_s4  ;;  %v439_v55 = vld [vmem:[#allocation1] sm:$0x3]   ;;  %s1220_s4 = smov 14  }
  0x41   :  { %240 = vrot.lane.b32.xlu1 %v239_v30, %s1191_s5  ;;  %v447_v56 = vld [vmem:[#allocation1] sm:$0x3]   ;;  %s1221_s5 = smov 12  }
  0x42   :  { %v455_v57 = vld [vmem:[#allocation1] sm:$0x3]  }
  0x43   :  { %v463_v58 = vld [vmem:[#allocation1] sm:$0x3]  }
  0x44   :  { %248 = vrot.lane.b32.xlu0 %v247_v31, %s1192_s6  ;;  %v471_v59 = vld [vmem:[#allocation1] sm:$0x3]   ;;  %s1222_s6 = smov 10  }
  0x45   :  { %256 = vrot.lane.b32.xlu1 %v255_v32, %s1193_s7  ;;  %v479_v60 = vld [vmem:[#allocation1] sm:$0x3]   ;;  %s1223_s7 = smov 8  }
  0x46   :  { %v487_v61 = vld [vmem:[#allocation1] sm:$0x3]  }
  0x47   :  { %v495_v62 = vld [vmem:[#allocation1] sm:$0x3]  }
  0x48   :  { %264 = vrot.lane.b32.xlu0 %v263_v33, %s1194_s0  ;;  %v503_v1 = vld [vmem:[#allocation1] sm:$0x3]   ;;  %s1224_s0 = smov 6  }
  0x49   :  { %272 = vrot.lane.b32.xlu1 %v271_v34, %s1195_s8  ;;  %v511_v2 = vld [vmem:[#allocation1] sm:$0x3]   ;;  %s1225_s8 = smov 4  }
  0x4a   :  { %v519_v5 = vld [vmem:[#allocation1] sm:$0x3]  }
  0x4c   :  { %280 = vrot.lane.b32.xlu0 %v279_v35, %s1196_s9  ;;  %s1227_s9 = smov 2  }
  0x4d   :  { %288 = vrot.lane.b32.xlu1 %v287_v36, %s1197_s10 }
  0x50   :  { %296 = vrot.lane.b32.xlu0 %v295_v37, %s1198_s11 }
  0x51   :  { %304 = vrot.lane.b32.xlu1 %v303_v38, %s1199_s12 }
  0x54   :  { %312 = vrot.lane.b32.xlu0 %v311_v39, %s1200_s13 }
  0x55   :  { %320 = vrot.lane.b32.xlu1 %v319_v40, %s1201_s14 }
  0x58   :  { %328 = vrot.lane.b32.xlu0 %v327_v41, %s1202_s15 }
  0x59   :  { %336 = vrot.lane.b32.xlu1 %v335_v42, %s1203_s16 }
  0x5c   :  { %344 = vrot.lane.b32.xlu0 %v343_v43, %s1204_s17 }
  0x5d   :  { %352 = vrot.lane.b32.xlu1 %v351_v44, %s1205_s18 }
  0x60   :  { %360 = vrot.lane.b32.xlu0 %v359_v45, %s1206_s19 }
  0x61   :  { %368 = vrot.lane.b32.xlu1 %v367_v46, %s1207_s20 }
  0x64   :  { %376 = vrot.lane.b32.xlu0 %v375_v47, %s1208_s21 }
  0x65   :  { %384 = vrot.lane.b32.xlu1 %v383_v48, %s1209_s22 }
  0x68   :  { %392 = vrot.lane.b32.xlu0 %v391_v49, %s1210_s23 }
  0x69   :  { %400 = vrot.lane.b32.xlu1 %v399_v50, %s1211_s24 }
  0x6c   :  { %408 = vrot.lane.b32.xlu0 %v407_v51, %s1212_s25 }
  0x6d   :  { %416 = vrot.lane.b32.xlu1 %v415_v52, %s1213_s26 }
  0x70   :  { %424 = vrot.lane.b32.xlu0 %v423_v53, %s1214_s27 }
  0x71   :  { %432 = vrot.lane.b32.xlu1 %v431_v54, %s1215_s28 }
  0x74   :  { %440 = vrot.lane.b32.xlu0 %v439_v55, %s1216_s29 }
  0x75   :  { %448 = vrot.lane.b32.xlu1 %v447_v56, %s1217_s30 }
  0x78   :  { %456 = vrot.lane.b32.xlu0 %v455_v57, %s1218_s2 }
  0x79   :  { %464 = vrot.lane.b32.xlu1 %v463_v58, %s1219_s3 }
  0x7c   :  { %472 = vrot.lane.b32.xlu0 %v471_v59, %s1220_s4 }
  0x7d   :  { %480 = vrot.lane.b32.xlu1 %v479_v60, %s1221_s5 }
  0x7e   :  { %v25_v63 = vpop.permute.xlu0 %24  }
  0x7f   :  { %v41_v0 = vpop.permute.xlu1 %40   ;;  %28 = vst.msk [vmem:[#allocation0 + $0x1] sm:$0x1] %vm19_vm0, %v25_v63   ;;  %30 = vst.msk [vmem:[#allocation0 + $0x100] sm:$0x2] %vm19_vm0, %v25_v63  }
  0x80   :  { %44 = vst.msk [vmem:[#allocation0 + $0x9] sm:$0x1] %vm19_vm0, %v41_v0   ;;  %46 = vst.msk [vmem:[#allocation0 + $0x108] sm:$0x2] %vm19_vm0, %v41_v0   ;;  %488 = vrot.lane.b32.xlu0 %v487_v61, %s1222_s6 }
  0x81   :  { %496 = vrot.lane.b32.xlu1 %v495_v62, %s1223_s7 }
  0x82   :  { %v33_v3 = vpop.permute.xlu0 %32  }
  0x83   :  { %v49_v4 = vpop.permute.xlu1 %48   ;;  %36 = vst.msk [vmem:[#allocation0 + $0x8] sm:$0x1] %vm19_vm0, %v33_v3   ;;  %38 = vst.msk [vmem:[#allocation0 + $0x107] sm:$0x2] %vm19_vm0, %v33_v3  }
  0x84   :  { %52 = vst.msk [vmem:[#allocation0 + $0x10] sm:$0x1] %vm19_vm0, %v49_v4   ;;  %54 = vst.msk [vmem:[#allocation0 + $0x10f] sm:$0x2] %vm19_vm0, %v49_v4   ;;  %504 = vrot.lane.b32.xlu0 %v503_v1, %s1224_s0 }
  0x85   :  { %512 = vrot.lane.b32.xlu1 %v511_v2, %s1225_s8 }
  0x86   :  { %v531_v6 = vld [vmem:[#allocation0] sm:$0x3]  ;;  %v57_v8 = vpop.permute.xlu0 %56  }
  0x87   :  { %v752_v7 = vld [vmem:[#allocation0 + $0x100] sm:$0x3]  ;;  %v65_v9 = vpop.permute.xlu1 %64   ;;  %v532_v11 = vpack.c.bf16 %v1226_v10, %v531_v6  ;;  %60 = vst.msk [vmem:[#allocation0 + $0x11] sm:$0x1] %vm19_vm0, %v57_v8   ;;  %62 = vst.msk [vmem:[#allocation0 + $0x110] sm:$0x2] %vm19_vm0, %v57_v8  }
  0x88   :  { %v753_v12 = vpack.c.bf16 %v1226_v10, %v752_v7  ;;  %68 = vst.msk [vmem:[#allocation0 + $0x18] sm:$0x1] %vm19_vm0, %v65_v9   ;;  %70 = vst.msk [vmem:[#allocation0 + $0x117] sm:$0x2] %vm19_vm0, %v65_v9   ;;  %520 = vrot.lane.b32.xlu0 %v519_v5, %s1227_s9 }
  0x89   :  { %534 = vst [vmem:[%s1626_s1] sm:$0x1] %v532_v11 }
  0x8a   :  { %1068 = vst [vmem:[%s1626_s1 + $0x20] sm:$0x1] %v753_v12  ;;  %v536_v13 = vld [vmem:[#allocation0 + $0x8] sm:$0x3]  ;;  %v73_v15 = vpop.permute.xlu0 %72  }
  0x8b   :  { %v759_v14 = vld [vmem:[#allocation0 + $0x108] sm:$0x3]  ;;  %v81_v16 = vpop.permute.xlu1 %80   ;;  %v537_v17 = vpack.c.bf16 %v1226_v10, %v536_v13  ;;  %76 = vst.msk [vmem:[#allocation0 + $0x19] sm:$0x1] %vm19_vm0, %v73_v15   ;;  %78 = vst.msk [vmem:[#allocation0 + $0x118] sm:$0x2] %vm19_vm0, %v73_v15  }
  0x8c   :  { %v760_v18 = vpack.c.bf16 %v1226_v10, %v759_v14  ;;  %84 = vst.msk [vmem:[#allocation0 + $0x20] sm:$0x1] %vm19_vm0, %v81_v16   ;;  %86 = vst.msk [vmem:[#allocation0 + $0x11f] sm:$0x2] %vm19_vm0, %v81_v16  }
  0x8d   :  { %1037 = vst [vmem:[%s1626_s1 + $0x1] sm:$0x1] %v537_v17 }
  0x8e   :  { %1069 = vst [vmem:[%s1626_s1 + $0x21] sm:$0x1] %v760_v18  ;;  %v766_v19 = vld [vmem:[#allocation0 + $0x110] sm:$0x3]  ;;  %v89_v21 = vpop.permute.xlu0 %88  }
  0x8f   :  { %v542_v20 = vld [vmem:[#allocation0 + $0x10] sm:$0x3]  ;;  %v97_v22 = vpop.permute.xlu1 %96   ;;  %v767_v23 = vpack.c.bf16 %v1226_v10, %v766_v19  ;;  %92 = vst.msk [vmem:[#allocation0 + $0x21] sm:$0x1] %vm19_vm0, %v89_v21   ;;  %94 = vst.msk [vmem:[#allocation0 + $0x120] sm:$0x2] %vm19_vm0, %v89_v21  }
  0x90   :  { %v543_v24 = vpack.c.bf16 %v1226_v10, %v542_v20  ;;  %100 = vst.msk [vmem:[#allocation0 + $0x28] sm:$0x1] %vm19_vm0, %v97_v22   ;;  %102 = vst.msk [vmem:[#allocation0 + $0x127] sm:$0x2] %vm19_vm0, %v97_v22  }
  0x91   :  { %1070 = vst [vmem:[%s1626_s1 + $0x22] sm:$0x1] %v767_v23 }
  0x92   :  { %1038 = vst [vmem:[%s1626_s1 + $0x2] sm:$0x1] %v543_v24  ;;  %v549_v25 = vld [vmem:[#allocation0 + $0x18] sm:$0x3]  ;;  %v105_v27 = vpop.permute.xlu0 %104  }
  0x93   :  { %v773_v26 = vld [vmem:[#allocation0 + $0x118] sm:$0x3]  ;;  %v113_v28 = vpop.permute.xlu1 %112   ;;  %v550_v29 = vpack.c.bf16 %v1226_v10, %v549_v25  ;;  %108 = vst.msk [vmem:[#allocation0 + $0x29] sm:$0x1] %vm19_vm0, %v105_v27   ;;  %110 = vst.msk [vmem:[#allocation0 + $0x128] sm:$0x2] %vm19_vm0, %v105_v27  }
  0x94   :  { %v774_v30 = vpack.c.bf16 %v1226_v10, %v773_v26  ;;  %116 = vst.msk [vmem:[#allocation0 + $0x30] sm:$0x1] %vm19_vm0, %v113_v28   ;;  %118 = vst.msk [vmem:[#allocation0 + $0x12f] sm:$0x2] %vm19_vm0, %v113_v28  }
  0x95   :  { %1039 = vst [vmem:[%s1626_s1 + $0x3] sm:$0x1] %v550_v29 }
  0x96   :  { %1071 = vst [vmem:[%s1626_s1 + $0x23] sm:$0x1] %v774_v30  ;;  %v556_v31 = vld [vmem:[#allocation0 + $0x20] sm:$0x3]  ;;  %v121_v33 = vpop.permute.xlu0 %120  }
  0x97   :  { %v780_v32 = vld [vmem:[#allocation0 + $0x120] sm:$0x3]  ;;  %v129_v34 = vpop.permute.xlu1 %128   ;;  %v557_v35 = vpack.c.bf16 %v1226_v10, %v556_v31  ;;  %124 = vst.msk [vmem:[#allocation0 + $0x31] sm:$0x1] %vm19_vm0, %v121_v33   ;;  %126 = vst.msk [vmem:[#allocation0 + $0x130] sm:$0x2] %vm19_vm0, %v121_v33  }
  0x98   :  { %v781_v36 = vpack.c.bf16 %v1226_v10, %v780_v32  ;;  %132 = vst.msk [vmem:[#allocation0 + $0x38] sm:$0x1] %vm19_vm0, %v129_v34   ;;  %134 = vst.msk [vmem:[#allocation0 + $0x137] sm:$0x2] %vm19_vm0, %v129_v34  }
  0x99   :  { %1040 = vst [vmem:[%s1626_s1 + $0x4] sm:$0x1] %v557_v35 }
  0x9a   :  { %1072 = vst [vmem:[%s1626_s1 + $0x24] sm:$0x1] %v781_v36  ;;  %v787_v37 = vld [vmem:[#allocation0 + $0x128] sm:$0x3]  ;;  %v137_v39 = vpop.permute.xlu0 %136  }
  0x9b   :  { %v563_v38 = vld [vmem:[#allocation0 + $0x28] sm:$0x3]  ;;  %v145_v40 = vpop.permute.xlu1 %144   ;;  %v788_v41 = vpack.c.bf16 %v1226_v10, %v787_v37  ;;  %140 = vst.msk [vmem:[#allocation0 + $0x39] sm:$0x1] %vm19_vm0, %v137_v39   ;;  %142 = vst.msk [vmem:[#allocation0 + $0x138] sm:$0x2] %vm19_vm0, %v137_v39  }
  0x9c   :  { %v564_v42 = vpack.c.bf16 %v1226_v10, %v563_v38  ;;  %148 = vst.msk [vmem:[#allocation0 + $0x40] sm:$0x1] %vm19_vm0, %v145_v40   ;;  %150 = vst.msk [vmem:[#allocation0 + $0x13f] sm:$0x2] %vm19_vm0, %v145_v40  }
  0x9d   :  { %1073 = vst [vmem:[%s1626_s1 + $0x25] sm:$0x1] %v788_v41 }
  0x9e   :  { %1041 = vst [vmem:[%s1626_s1 + $0x5] sm:$0x1] %v564_v42  ;;  %v570_v43 = vld [vmem:[#allocation0 + $0x30] sm:$0x3]  ;;  %v153_v45 = vpop.permute.xlu0 %152  }
  0x9f   :  { %v794_v44 = vld [vmem:[#allocation0 + $0x130] sm:$0x3]  ;;  %v161_v46 = vpop.permute.xlu1 %160   ;;  %v571_v47 = vpack.c.bf16 %v1226_v10, %v570_v43  ;;  %156 = vst.msk [vmem:[#allocation0 + $0x41] sm:$0x1] %vm19_vm0, %v153_v45   ;;  %158 = vst.msk [vmem:[#allocation0 + $0x140] sm:$0x2] %vm19_vm0, %v153_v45  }
  0xa0   :  { %v795_v48 = vpack.c.bf16 %v1226_v10, %v794_v44  ;;  %164 = vst.msk [vmem:[#allocation0 + $0x48] sm:$0x1] %vm19_vm0, %v161_v46   ;;  %166 = vst.msk [vmem:[#allocation0 + $0x147] sm:$0x2] %vm19_vm0, %v161_v46  }
  0xa1   :  { %1042 = vst [vmem:[%s1626_s1 + $0x6] sm:$0x1] %v571_v47 }
  0xa2   :  { %1074 = vst [vmem:[%s1626_s1 + $0x26] sm:$0x1] %v795_v48  ;;  %v577_v49 = vld [vmem:[#allocation0 + $0x38] sm:$0x3]  ;;  %v169_v51 = vpop.permute.xlu0 %168  }
  0xa3   :  { %v801_v50 = vld [vmem:[#allocation0 + $0x138] sm:$0x3]  ;;  %v177_v52 = vpop.permute.xlu1 %176   ;;  %v578_v53 = vpack.c.bf16 %v1226_v10, %v577_v49  ;;  %172 = vst.msk [vmem:[#allocation0 + $0x49] sm:$0x1] %vm19_vm0, %v169_v51   ;;  %174 = vst.msk [vmem:[#allocation0 + $0x148] sm:$0x2] %vm19_vm0, %v169_v51  }
  0xa4   :  { %v802_v54 = vpack.c.bf16 %v1226_v10, %v801_v50  ;;  %180 = vst.msk [vmem:[#allocation0 + $0x50] sm:$0x1] %vm19_vm0, %v177_v52   ;;  %182 = vst.msk [vmem:[#allocation0 + $0x14f] sm:$0x2] %vm19_vm0, %v177_v52  }
  0xa5   :  { %1043 = vst [vmem:[%s1626_s1 + $0x7] sm:$0x1] %v578_v53 }
  0xa6   :  { %1075 = vst [vmem:[%s1626_s1 + $0x27] sm:$0x1] %v802_v54  ;;  %v584_v55 = vld [vmem:[#allocation0 + $0x40] sm:$0x3]  ;;  %v185_v57 = vpop.permute.xlu0 %184  }
  0xa7   :  { %v808_v56 = vld [vmem:[#allocation0 + $0x140] sm:$0x3]  ;;  %v193_v58 = vpop.permute.xlu1 %192   ;;  %v585_v59 = vpack.c.bf16 %v1226_v10, %v584_v55  ;;  %188 = vst.msk [vmem:[#allocation0 + $0x51] sm:$0x1] %vm19_vm0, %v185_v57   ;;  %190 = vst.msk [vmem:[#allocation0 + $0x150] sm:$0x2] %vm19_vm0, %v185_v57  }
  0xa8   :  { %v809_v60 = vpack.c.bf16 %v1226_v10, %v808_v56  ;;  %196 = vst.msk [vmem:[#allocation0 + $0x58] sm:$0x1] %vm19_vm0, %v193_v58   ;;  %198 = vst.msk [vmem:[#allocation0 + $0x157] sm:$0x2] %vm19_vm0, %v193_v58  }
  0xa9   :  { %1044 = vst [vmem:[%s1626_s1 + $0x8] sm:$0x1] %v585_v59 }
  0xaa   :  { %1076 = vst [vmem:[%s1626_s1 + $0x28] sm:$0x1] %v809_v60  ;;  %v591_v61 = vld [vmem:[#allocation0 + $0x48] sm:$0x3]  ;;  %v201_v63 = vpop.permute.xlu0 %200  }
  0xab   :  { %v815_v62 = vld [vmem:[#allocation0 + $0x148] sm:$0x3]  ;;  %v209_v0 = vpop.permute.xlu1 %208   ;;  %v592_v1 = vpack.c.bf16 %v1226_v10, %v591_v61  ;;  %204 = vst.msk [vmem:[#allocation0 + $0x59] sm:$0x1] %vm19_vm0, %v201_v63   ;;  %206 = vst.msk [vmem:[#allocation0 + $0x158] sm:$0x2] %vm19_vm0, %v201_v63  }
  0xac   :  { %v816_v2 = vpack.c.bf16 %v1226_v10, %v815_v62  ;;  %212 = vst.msk [vmem:[#allocation0 + $0x60] sm:$0x1] %vm19_vm0, %v209_v0   ;;  %214 = vst.msk [vmem:[#allocation0 + $0x15f] sm:$0x2] %vm19_vm0, %v209_v0  }
  0xad   :  { %1045 = vst [vmem:[%s1626_s1 + $0x9] sm:$0x1] %v592_v1 }
  0xae   :  { %1077 = vst [vmem:[%s1626_s1 + $0x29] sm:$0x1] %v816_v2  ;;  %v598_v3 = vld [vmem:[#allocation0 + $0x50] sm:$0x3]  ;;  %v217_v5 = vpop.permute.xlu0 %216  }
  0xaf   :  { %v822_v4 = vld [vmem:[#allocation0 + $0x150] sm:$0x3]  ;;  %v225_v6 = vpop.permute.xlu1 %224   ;;  %v599_v7 = vpack.c.bf16 %v1226_v10, %v598_v3  ;;  %220 = vst.msk [vmem:[#allocation0 + $0x61] sm:$0x1] %vm19_vm0, %v217_v5   ;;  %222 = vst.msk [vmem:[#allocation0 + $0x160] sm:$0x2] %vm19_vm0, %v217_v5  }
  0xb0   :  { %v823_v8 = vpack.c.bf16 %v1226_v10, %v822_v4  ;;  %228 = vst.msk [vmem:[#allocation0 + $0x68] sm:$0x1] %vm19_vm0, %v225_v6   ;;  %230 = vst.msk [vmem:[#allocation0 + $0x167] sm:$0x2] %vm19_vm0, %v225_v6  }
  0xb1   :  { %1046 = vst [vmem:[%s1626_s1 + $0xa] sm:$0x1] %v599_v7 }
  0xb2   :  { %1078 = vst [vmem:[%s1626_s1 + $0x2a] sm:$0x1] %v823_v8  ;;  %v605_v9 = vld [vmem:[#allocation0 + $0x58] sm:$0x3]  ;;  %v233_v12 = vpop.permute.xlu0 %232  }
  0xb3   :  { %v829_v11 = vld [vmem:[#allocation0 + $0x158] sm:$0x3]  ;;  %v241_v13 = vpop.permute.xlu1 %240   ;;  %v606_v14 = vpack.c.bf16 %v1226_v10, %v605_v9  ;;  %236 = vst.msk [vmem:[#allocation0 + $0x69] sm:$0x1] %vm19_vm0, %v233_v12   ;;  %238 = vst.msk [vmem:[#allocation0 + $0x168] sm:$0x2] %vm19_vm0, %v233_v12  }
  0xb4   :  { %v830_v15 = vpack.c.bf16 %v1226_v10, %v829_v11  ;;  %244 = vst.msk [vmem:[#allocation0 + $0x70] sm:$0x1] %vm19_vm0, %v241_v13   ;;  %246 = vst.msk [vmem:[#allocation0 + $0x16f] sm:$0x2] %vm19_vm0, %v241_v13  }
  0xb5   :  { %1047 = vst [vmem:[%s1626_s1 + $0xb] sm:$0x1] %v606_v14 }
  0xb6   :  { %1079 = vst [vmem:[%s1626_s1 + $0x2b] sm:$0x1] %v830_v15  ;;  %v612_v16 = vld [vmem:[#allocation0 + $0x60] sm:$0x3]  ;;  %v249_v18 = vpop.permute.xlu0 %248  }
  0xb7   :  { %v836_v17 = vld [vmem:[#allocation0 + $0x160] sm:$0x3]  ;;  %v257_v19 = vpop.permute.xlu1 %256   ;;  %v613_v20 = vpack.c.bf16 %v1226_v10, %v612_v16  ;;  %252 = vst.msk [vmem:[#allocation0 + $0x71] sm:$0x1] %vm19_vm0, %v249_v18   ;;  %254 = vst.msk [vmem:[#allocation0 + $0x170] sm:$0x2] %vm19_vm0, %v249_v18  }
  0xb8   :  { %v837_v21 = vpack.c.bf16 %v1226_v10, %v836_v17  ;;  %260 = vst.msk [vmem:[#allocation0 + $0x78] sm:$0x1] %vm19_vm0, %v257_v19   ;;  %262 = vst.msk [vmem:[#allocation0 + $0x177] sm:$0x2] %vm19_vm0, %v257_v19  }
  0xb9   :  { %1048 = vst [vmem:[%s1626_s1 + $0xc] sm:$0x1] %v613_v20 }
  0xba   :  { %1080 = vst [vmem:[%s1626_s1 + $0x2c] sm:$0x1] %v837_v21  ;;  %v619_v22 = vld [vmem:[#allocation0 + $0x68] sm:$0x3]  ;;  %v265_v24 = vpop.permute.xlu0 %264  }
  0xbb   :  { %v843_v23 = vld [vmem:[#allocation0 + $0x168] sm:$0x3]  ;;  %v273_v25 = vpop.permute.xlu1 %272   ;;  %v620_v26 = vpack.c.bf16 %v1226_v10, %v619_v22  ;;  %268 = vst.msk [vmem:[#allocation0 + $0x79] sm:$0x1] %vm19_vm0, %v265_v24   ;;  %270 = vst.msk [vmem:[#allocation0 + $0x178] sm:$0x2] %vm19_vm0, %v265_v24  }
  0xbc   :  { %v844_v27 = vpack.c.bf16 %v1226_v10, %v843_v23  ;;  %276 = vst.msk [vmem:[#allocation0 + $0x80] sm:$0x1] %vm19_vm0, %v273_v25   ;;  %278 = vst.msk [vmem:[#allocation0 + $0x17f] sm:$0x2] %vm19_vm0, %v273_v25  }
  0xbd   :  { %1049 = vst [vmem:[%s1626_s1 + $0xd] sm:$0x1] %v620_v26 }
  0xbe   :  { %1081 = vst [vmem:[%s1626_s1 + $0x2d] sm:$0x1] %v844_v27  ;;  %v850_v28 = vld [vmem:[#allocation0 + $0x170] sm:$0x3]  ;;  %v281_v30 = vpop.permute.xlu0 %280  }
  0xbf   :  { %v626_v29 = vld [vmem:[#allocation0 + $0x70] sm:$0x3]  ;;  %v289_v31 = vpop.permute.xlu1 %288   ;;  %v851_v32 = vpack.c.bf16 %v1226_v10, %v850_v28  ;;  %284 = vst.msk [vmem:[#allocation0 + $0x81] sm:$0x1] %vm19_vm0, %v281_v30   ;;  %286 = vst.msk [vmem:[#allocation0 + $0x180] sm:$0x2] %vm19_vm0, %v281_v30  }
  0xc0   :  { %v627_v33 = vpack.c.bf16 %v1226_v10, %v626_v29  ;;  %292 = vst.msk [vmem:[#allocation0 + $0x88] sm:$0x1] %vm19_vm0, %v289_v31   ;;  %294 = vst.msk [vmem:[#allocation0 + $0x187] sm:$0x2] %vm19_vm0, %v289_v31  }
  0xc1   :  { %1082 = vst [vmem:[%s1626_s1 + $0x2e] sm:$0x1] %v851_v32 }
  0xc2   :  { %1050 = vst [vmem:[%s1626_s1 + $0xe] sm:$0x1] %v627_v33  ;;  %v633_v34 = vld [vmem:[#allocation0 + $0x78] sm:$0x3]  ;;  %v297_v36 = vpop.permute.xlu0 %296  }
  0xc3   :  { %v857_v35 = vld [vmem:[#allocation0 + $0x178] sm:$0x3]  ;;  %v305_v37 = vpop.permute.xlu1 %304   ;;  %v634_v38 = vpack.c.bf16 %v1226_v10, %v633_v34  ;;  %300 = vst.msk [vmem:[#allocation0 + $0x89] sm:$0x1] %vm19_vm0, %v297_v36   ;;  %302 = vst.msk [vmem:[#allocation0 + $0x188] sm:$0x2] %vm19_vm0, %v297_v36  }
  0xc4   :  { %v858_v39 = vpack.c.bf16 %v1226_v10, %v857_v35  ;;  %308 = vst.msk [vmem:[#allocation0 + $0x90] sm:$0x1] %vm19_vm0, %v305_v37   ;;  %310 = vst.msk [vmem:[#allocation0 + $0x18f] sm:$0x2] %vm19_vm0, %v305_v37  }
  0xc5   :  { %1051 = vst [vmem:[%s1626_s1 + $0xf] sm:$0x1] %v634_v38 }
  0xc6   :  { %1083 = vst [vmem:[%s1626_s1 + $0x2f] sm:$0x1] %v858_v39  ;;  %v640_v40 = vld [vmem:[#allocation0 + $0x80] sm:$0x3]  ;;  %v313_v42 = vpop.permute.xlu0 %312  }
  0xc7   :  { %v864_v41 = vld [vmem:[#allocation0 + $0x180] sm:$0x3]  ;;  %v321_v43 = vpop.permute.xlu1 %320   ;;  %v641_v44 = vpack.c.bf16 %v1226_v10, %v640_v40  ;;  %316 = vst.msk [vmem:[#allocation0 + $0x91] sm:$0x1] %vm19_vm0, %v313_v42   ;;  %318 = vst.msk [vmem:[#allocation0 + $0x190] sm:$0x2] %vm19_vm0, %v313_v42  }
  0xc8   :  { %v865_v45 = vpack.c.bf16 %v1226_v10, %v864_v41  ;;  %324 = vst.msk [vmem:[#allocation0 + $0x98] sm:$0x1] %vm19_vm0, %v321_v43   ;;  %326 = vst.msk [vmem:[#allocation0 + $0x197] sm:$0x2] %vm19_vm0, %v321_v43  }
  0xc9   :  { %1052 = vst [vmem:[%s1626_s1 + $0x10] sm:$0x1] %v641_v44 }
  0xca   :  { %1084 = vst [vmem:[%s1626_s1 + $0x30] sm:$0x1] %v865_v45  ;;  %v647_v46 = vld [vmem:[#allocation0 + $0x88] sm:$0x3]  ;;  %v329_v48 = vpop.permute.xlu0 %328  }
  0xcb   :  { %v871_v47 = vld [vmem:[#allocation0 + $0x188] sm:$0x3]  ;;  %v337_v49 = vpop.permute.xlu1 %336   ;;  %v648_v50 = vpack.c.bf16 %v1226_v10, %v647_v46  ;;  %332 = vst.msk [vmem:[#allocation0 + $0x99] sm:$0x1] %vm19_vm0, %v329_v48   ;;  %334 = vst.msk [vmem:[#allocation0 + $0x198] sm:$0x2] %vm19_vm0, %v329_v48  }
  0xcc   :  { %v872_v51 = vpack.c.bf16 %v1226_v10, %v871_v47  ;;  %340 = vst.msk [vmem:[#allocation0 + $0xa0] sm:$0x1] %vm19_vm0, %v337_v49   ;;  %342 = vst.msk [vmem:[#allocation0 + $0x19f] sm:$0x2] %vm19_vm0, %v337_v49  }
  0xcd   :  { %1053 = vst [vmem:[%s1626_s1 + $0x11] sm:$0x1] %v648_v50 }
  0xce   :  { %1085 = vst [vmem:[%s1626_s1 + $0x31] sm:$0x1] %v872_v51  ;;  %v654_v52 = vld [vmem:[#allocation0 + $0x90] sm:$0x3]  ;;  %v345_v54 = vpop.permute.xlu0 %344  }
  0xcf   :  { %v878_v53 = vld [vmem:[#allocation0 + $0x190] sm:$0x3]  ;;  %v353_v55 = vpop.permute.xlu1 %352   ;;  %v655_v56 = vpack.c.bf16 %v1226_v10, %v654_v52  ;;  %348 = vst.msk [vmem:[#allocation0 + $0xa1] sm:$0x1] %vm19_vm0, %v345_v54   ;;  %350 = vst.msk [vmem:[#allocation0 + $0x1a0] sm:$0x2] %vm19_vm0, %v345_v54  }
  0xd0   :  { %v879_v57 = vpack.c.bf16 %v1226_v10, %v878_v53  ;;  %356 = vst.msk [vmem:[#allocation0 + $0xa8] sm:$0x1] %vm19_vm0, %v353_v55   ;;  %358 = vst.msk [vmem:[#allocation0 + $0x1a7] sm:$0x2] %vm19_vm0, %v353_v55  }
  0xd1   :  { %1054 = vst [vmem:[%s1626_s1 + $0x12] sm:$0x1] %v655_v56 }
  0xd2   :  { %1086 = vst [vmem:[%s1626_s1 + $0x32] sm:$0x1] %v879_v57  ;;  %v661_v58 = vld [vmem:[#allocation0 + $0x98] sm:$0x3]  ;;  %v361_v60 = vpop.permute.xlu0 %360  }
  0xd3   :  { %v885_v59 = vld [vmem:[#allocation0 + $0x198] sm:$0x3]  ;;  %v369_v61 = vpop.permute.xlu1 %368   ;;  %v662_v62 = vpack.c.bf16 %v1226_v10, %v661_v58  ;;  %364 = vst.msk [vmem:[#allocation0 + $0xa9] sm:$0x1] %vm19_vm0, %v361_v60   ;;  %366 = vst.msk [vmem:[#allocation0 + $0x1a8] sm:$0x2] %vm19_vm0, %v361_v60  }
  0xd4   :  { %v886_v63 = vpack.c.bf16 %v1226_v10, %v885_v59  ;;  %372 = vst.msk [vmem:[#allocation0 + $0xb0] sm:$0x1] %vm19_vm0, %v369_v61   ;;  %374 = vst.msk [vmem:[#allocation0 + $0x1af] sm:$0x2] %vm19_vm0, %v369_v61  }
  0xd5   :  { %1055 = vst [vmem:[%s1626_s1 + $0x13] sm:$0x1] %v662_v62 }
  0xd6   :  { %1087 = vst [vmem:[%s1626_s1 + $0x33] sm:$0x1] %v886_v63  ;;  %v892_v0 = vld [vmem:[#allocation0 + $0x1a0] sm:$0x3]  ;;  %v377_v2 = vpop.permute.xlu0 %376  }
  0xd7   :  { %v668_v1 = vld [vmem:[#allocation0 + $0xa0] sm:$0x3]  ;;  %v385_v3 = vpop.permute.xlu1 %384   ;;  %v893_v4 = vpack.c.bf16 %v1226_v10, %v892_v0  ;;  %380 = vst.msk [vmem:[#allocation0 + $0xb1] sm:$0x1] %vm19_vm0, %v377_v2   ;;  %382 = vst.msk [vmem:[#allocation0 + $0x1b0] sm:$0x2] %vm19_vm0, %v377_v2  }
  0xd8   :  { %v669_v5 = vpack.c.bf16 %v1226_v10, %v668_v1  ;;  %388 = vst.msk [vmem:[#allocation0 + $0xb8] sm:$0x1] %vm19_vm0, %v385_v3   ;;  %390 = vst.msk [vmem:[#allocation0 + $0x1b7] sm:$0x2] %vm19_vm0, %v385_v3  }
  0xd9   :  { %1088 = vst [vmem:[%s1626_s1 + $0x34] sm:$0x1] %v893_v4 }
  0xda   :  { %1056 = vst [vmem:[%s1626_s1 + $0x14] sm:$0x1] %v669_v5  ;;  %v675_v6 = vld [vmem:[#allocation0 + $0xa8] sm:$0x3]  ;;  %v393_v8 = vpop.permute.xlu0 %392  }
  0xdb   :  { %v899_v7 = vld [vmem:[#allocation0 + $0x1a8] sm:$0x3]  ;;  %v401_v9 = vpop.permute.xlu1 %400   ;;  %v676_v11 = vpack.c.bf16 %v1226_v10, %v675_v6  ;;  %396 = vst.msk [vmem:[#allocation0 + $0xb9] sm:$0x1] %vm19_vm0, %v393_v8   ;;  %398 = vst.msk [vmem:[#allocation0 + $0x1b8] sm:$0x2] %vm19_vm0, %v393_v8  }
  0xdc   :  { %v900_v12 = vpack.c.bf16 %v1226_v10, %v899_v7  ;;  %404 = vst.msk [vmem:[#allocation0 + $0xc0] sm:$0x1] %vm19_vm0, %v401_v9   ;;  %406 = vst.msk [vmem:[#allocation0 + $0x1bf] sm:$0x2] %vm19_vm0, %v401_v9  }
  0xdd   :  { %1057 = vst [vmem:[%s1626_s1 + $0x15] sm:$0x1] %v676_v11 }
  0xde   :  { %1089 = vst [vmem:[%s1626_s1 + $0x35] sm:$0x1] %v900_v12  ;;  %v682_v13 = vld [vmem:[#allocation0 + $0xb0] sm:$0x3]  ;;  %v409_v15 = vpop.permute.xlu0 %408  }
  0xdf   :  { %v906_v14 = vld [vmem:[#allocation0 + $0x1b0] sm:$0x3]  ;;  %v417_v16 = vpop.permute.xlu1 %416   ;;  %v683_v17 = vpack.c.bf16 %v1226_v10, %v682_v13  ;;  %412 = vst.msk [vmem:[#allocation0 + $0xc1] sm:$0x1] %vm19_vm0, %v409_v15   ;;  %414 = vst.msk [vmem:[#allocation0 + $0x1c0] sm:$0x2] %vm19_vm0, %v409_v15  }
  0xe0   :  { %v907_v18 = vpack.c.bf16 %v1226_v10, %v906_v14  ;;  %420 = vst.msk [vmem:[#allocation0 + $0xc8] sm:$0x1] %vm19_vm0, %v417_v16   ;;  %422 = vst.msk [vmem:[#allocation0 + $0x1c7] sm:$0x2] %vm19_vm0, %v417_v16  }
  0xe1   :  { %1058 = vst [vmem:[%s1626_s1 + $0x16] sm:$0x1] %v683_v17 }
  0xe2   :  { %1090 = vst [vmem:[%s1626_s1 + $0x36] sm:$0x1] %v907_v18  ;;  %v689_v19 = vld [vmem:[#allocation0 + $0xb8] sm:$0x3]  ;;  %v425_v21 = vpop.permute.xlu0 %424  }
  0xe3   :  { %v913_v20 = vld [vmem:[#allocation0 + $0x1b8] sm:$0x3]  ;;  %v433_v22 = vpop.permute.xlu1 %432   ;;  %v690_v23 = vpack.c.bf16 %v1226_v10, %v689_v19  ;;  %428 = vst.msk [vmem:[#allocation0 + $0xc9] sm:$0x1] %vm19_vm0, %v425_v21   ;;  %430 = vst.msk [vmem:[#allocation0 + $0x1c8] sm:$0x2] %vm19_vm0, %v425_v21  }
  0xe4   :  { %v914_v24 = vpack.c.bf16 %v1226_v10, %v913_v20  ;;  %436 = vst.msk [vmem:[#allocation0 + $0xd0] sm:$0x1] %vm19_vm0, %v433_v22   ;;  %438 = vst.msk [vmem:[#allocation0 + $0x1cf] sm:$0x2] %vm19_vm0, %v433_v22  }
  0xe5   :  { %1059 = vst [vmem:[%s1626_s1 + $0x17] sm:$0x1] %v690_v23 }
  0xe6   :  { %1091 = vst [vmem:[%s1626_s1 + $0x37] sm:$0x1] %v914_v24  ;;  %v696_v25 = vld [vmem:[#allocation0 + $0xc0] sm:$0x3]  ;;  %v441_v27 = vpop.permute.xlu0 %440  }
  0xe7   :  { %v920_v26 = vld [vmem:[#allocation0 + $0x1c0] sm:$0x3]  ;;  %v449_v28 = vpop.permute.xlu1 %448   ;;  %v697_v29 = vpack.c.bf16 %v1226_v10, %v696_v25  ;;  %444 = vst.msk [vmem:[#allocation0 + $0xd1] sm:$0x1] %vm19_vm0, %v441_v27   ;;  %446 = vst.msk [vmem:[#allocation0 + $0x1d0] sm:$0x2] %vm19_vm0, %v441_v27  }
  0xe8   :  { %v921_v30 = vpack.c.bf16 %v1226_v10, %v920_v26  ;;  %452 = vst.msk [vmem:[#allocation0 + $0xd8] sm:$0x1] %vm19_vm0, %v449_v28   ;;  %454 = vst.msk [vmem:[#allocation0 + $0x1d7] sm:$0x2] %vm19_vm0, %v449_v28  }
  0xe9   :  { %1060 = vst [vmem:[%s1626_s1 + $0x18] sm:$0x1] %v697_v29 }
  0xea   :  { %1092 = vst [vmem:[%s1626_s1 + $0x38] sm:$0x1] %v921_v30  ;;  %v703_v31 = vld [vmem:[#allocation0 + $0xc8] sm:$0x3]  ;;  %v457_v33 = vpop.permute.xlu0 %456  }
  0xeb   :  { %v927_v32 = vld [vmem:[#allocation0 + $0x1c8] sm:$0x3]  ;;  %v465_v34 = vpop.permute.xlu1 %464   ;;  %v704_v35 = vpack.c.bf16 %v1226_v10, %v703_v31  ;;  %460 = vst.msk [vmem:[#allocation0 + $0xd9] sm:$0x1] %vm19_vm0, %v457_v33   ;;  %462 = vst.msk [vmem:[#allocation0 + $0x1d8] sm:$0x2] %vm19_vm0, %v457_v33  }
  0xec   :  { %v928_v36 = vpack.c.bf16 %v1226_v10, %v927_v32  ;;  %468 = vst.msk [vmem:[#allocation0 + $0xe0] sm:$0x1] %vm19_vm0, %v465_v34   ;;  %470 = vst.msk [vmem:[#allocation0 + $0x1df] sm:$0x2] %vm19_vm0, %v465_v34  }
  0xed   :  { %1061 = vst [vmem:[%s1626_s1 + $0x19] sm:$0x1] %v704_v35 }
  0xee   :  { %1093 = vst [vmem:[%s1626_s1 + $0x39] sm:$0x1] %v928_v36  ;;  %v710_v37 = vld [vmem:[#allocation0 + $0xd0] sm:$0x3]  ;;  %v473_v39 = vpop.permute.xlu0 %472  }
  0xef   :  { %v934_v38 = vld [vmem:[#allocation0 + $0x1d0] sm:$0x3]  ;;  %v481_v40 = vpop.permute.xlu1 %480   ;;  %v711_v41 = vpack.c.bf16 %v1226_v10, %v710_v37  ;;  %476 = vst.msk [vmem:[#allocation0 + $0xe1] sm:$0x1] %vm19_vm0, %v473_v39   ;;  %478 = vst.msk [vmem:[#allocation0 + $0x1e0] sm:$0x2] %vm19_vm0, %v473_v39  }
  0xf0   :  { %v935_v42 = vpack.c.bf16 %v1226_v10, %v934_v38  ;;  %484 = vst.msk [vmem:[#allocation0 + $0xe8] sm:$0x1] %vm19_vm0, %v481_v40   ;;  %486 = vst.msk [vmem:[#allocation0 + $0x1e7] sm:$0x2] %vm19_vm0, %v481_v40  }
  0xf1   :  { %1062 = vst [vmem:[%s1626_s1 + $0x1a] sm:$0x1] %v711_v41 }
  0xf2   :  { %1094 = vst [vmem:[%s1626_s1 + $0x3a] sm:$0x1] %v935_v42  ;;  %v717_v43 = vld [vmem:[#allocation0 + $0xd8] sm:$0x3]  ;;  %v489_v45 = vpop.permute.xlu0 %488  }
  0xf3   :  { %v941_v44 = vld [vmem:[#allocation0 + $0x1d8] sm:$0x3]  ;;  %v497_v46 = vpop.permute.xlu1 %496   ;;  %v718_v47 = vpack.c.bf16 %v1226_v10, %v717_v43  ;;  %492 = vst.msk [vmem:[#allocation0 + $0xe9] sm:$0x1] %vm19_vm0, %v489_v45   ;;  %494 = vst.msk [vmem:[#allocation0 + $0x1e8] sm:$0x2] %vm19_vm0, %v489_v45  }
  0xf4   :  { %v942_v48 = vpack.c.bf16 %v1226_v10, %v941_v44  ;;  %500 = vst.msk [vmem:[#allocation0 + $0xf0] sm:$0x1] %vm19_vm0, %v497_v46   ;;  %502 = vst.msk [vmem:[#allocation0 + $0x1ef] sm:$0x2] %vm19_vm0, %v497_v46  }
  0xf5   :  { %1063 = vst [vmem:[%s1626_s1 + $0x1b] sm:$0x1] %v718_v47 }
  0xf6   :  { %1095 = vst [vmem:[%s1626_s1 + $0x3b] sm:$0x1] %v942_v48  ;;  %v724_v49 = vld [vmem:[#allocation0 + $0xe0] sm:$0x3]  ;;  %v505_v51 = vpop.permute.xlu0 %504  }
  0xf7   :  { %v948_v50 = vld [vmem:[#allocation0 + $0x1e0] sm:$0x3]  ;;  %v513_v52 = vpop.permute.xlu1 %512   ;;  %v725_v53 = vpack.c.bf16 %v1226_v10, %v724_v49  ;;  %508 = vst.msk [vmem:[#allocation0 + $0xf1] sm:$0x1] %vm19_vm0, %v505_v51   ;;  %510 = vst.msk [vmem:[#allocation0 + $0x1f0] sm:$0x2] %vm19_vm0, %v505_v51  }
  0xf8   :  { %v949_v54 = vpack.c.bf16 %v1226_v10, %v948_v50  ;;  %516 = vst.msk [vmem:[#allocation0 + $0xf8] sm:$0x1] %vm19_vm0, %v513_v52   ;;  %518 = vst.msk [vmem:[#allocation0 + $0x1f7] sm:$0x2] %vm19_vm0, %v513_v52  }
  0xf9   :  { %1064 = vst [vmem:[%s1626_s1 + $0x1c] sm:$0x1] %v725_v53 }
  0xfa   :  { %1096 = vst [vmem:[%s1626_s1 + $0x3c] sm:$0x1] %v949_v54  ;;  %v731_v55 = vld [vmem:[#allocation0 + $0xe8] sm:$0x3]  ;;  %v521_v57 = vpop.permute.xlu0 %520  }
  0xfb   :  { %v955_v56 = vld [vmem:[#allocation0 + $0x1e8] sm:$0x3]  ;;  %v732_v58 = vpack.c.bf16 %v1226_v10, %v731_v55  ;;  %524 = vst.msk [vmem:[#allocation0 + $0xf9] sm:$0x1] %vm19_vm0, %v521_v57   ;;  %526 = vst.msk [vmem:[#allocation0 + $0x1f8] sm:$0x2] %vm19_vm0, %v521_v57  }
  0xfc   :  { %v956_v59 = vpack.c.bf16 %v1226_v10, %v955_v56 }
  0xfd   :  { %1065 = vst [vmem:[%s1626_s1 + $0x1d] sm:$0x1] %v732_v58 }
  0xfe   :  { %1097 = vst [vmem:[%s1626_s1 + $0x3d] sm:$0x1] %v956_v59  ;;  %v738_v60 = vld [vmem:[#allocation0 + $0xf0] sm:$0x3] }
  0xff   :  { %v962_v61 = vld [vmem:[#allocation0 + $0x1f0] sm:$0x3]  ;;  %v739_v62 = vpack.c.bf16 %v1226_v10, %v738_v60 }
 0x100   :  { %v963_v63 = vpack.c.bf16 %v1226_v10, %v962_v61 }
 0x101   :  { %1066 = vst [vmem:[%s1626_s1 + $0x1e] sm:$0x1] %v739_v62 }
 0x102   :  { %1098 = vst [vmem:[%s1626_s1 + $0x3e] sm:$0x1] %v963_v63  ;;  %v745_v0 = vld [vmem:[#allocation0 + $0xf8] sm:$0x3] }
 0x103   :  { %v969_v1 = vld [vmem:[#allocation0 + $0x1f8] sm:$0x3]  ;;  %v746_v2 = vpack.c.bf16 %v1226_v10, %v745_v0 }
 0x104   :  { %v970_v10 = vpack.c.bf16 %v1226_v10, %v969_v1 }
 0x105   :  { %1067 = vst [vmem:[%s1626_s1 + $0x1f] sm:$0x1] %v746_v2 }
 0x106   :  { %1099 = vst [vmem:[%s1626_s1 + $0x3f] sm:$0x1] %v970_v10 }

// kernel: generator_forward.8
= control target key start
LH: loop header
LB: loop body
LE: loop exit
PB: predicated region body
PF: predicated region fallthrough
CT: control target
= control target key end

     0   :  { %8 = vsyncpa [#allocation3], 0  ;;  %s172_s12 = smov [#allocation2]   ;;  %s219_s0 = inlined_call_operand.vmem [shape: bf16[1,16,32], index: 0, kind: input, shape index: {}]   ;;  %s220_s1 = inlined_call_operand.vmem [shape: bf16[1,32,128], index: 1, kind: input, shape index: {}]   ;;  %s221_s2 = inlined_call_operand.hbm [shape: f32[1,128], index: 2, kind: input, shape index: {}]   ;;  %s222_s3 = inlined_call_operand.vmem [shape: bf16[1,16,128], index: 3, kind: output, shape index: {}]  }
   0x1   :  { %s19_s13 = sshll.u32 %s172_s12, 4  ;;  %s148_s16 = scalar_lea.hbm %s221_s2, 16  ;;  %s20_s13 = int_to_ptr.vmem [resolvable:$true] %s19_s13 }
   0x2   :  { %p149_p0 = scmp.ne.s32.totalorder %s221_s2, %s148_s16  ;;  %p152_p1 = scmp.lt.u32.totalorder %s148_s16, %s221_s2 }
   0x4   :  { %p154_p2 = pnand %p152_p1, %p149_p0 }
   0x6   :  { %157 = shalt.err (!%p154_p2)
}
   0x7   :  { %s158_s21 = scalar_lea.vmem %s20_s13, 16  ;;  %s162_s22 = scalar_lea.vmem %s20_s13, 32 }
   0x8   :  { %p159_p3 = scmp.ne.s32.totalorder %s20_s13, %s158_s21  ;;  %p163_p4 = scmp.lt.s32.totalorder %s20_s13, %s20_s13 }
   0x9   :  { %p164_p5 = scmp.lt.s32.totalorder %s162_s22, %s158_s21 }
   0xb   :  { %p165_p6 = por %p164_p5, %p163_p4 }
   0xd   :  { %p166_p7 = pnand %p165_p6, %p159_p3 }
   0xf   :  { %169 = shalt.err (!%p166_p7)
}
  0x10   :  { %22 = dma.hbm_to_vmem [thread:$0]  %s221_s2, 16, %s20_s13, [#allocation3]  }
  0x11   :  { %170 = dma.done.wait [#allocation3], 16  }
  0x12   :  { %171 = vsyncadd [#allocation3], 4294967280  ;;  %v173_v0 = vmov 0.0   ;;  %vm174_vm0 = vmmov 0   ;;  %v145_v1 = vld [vmem:[%s220_s1] sm:$0xff]   ;;  %v146_v2 = vld [vmem:[%s220_s1 + $0x8] sm:$0xff]  }
  0x13   :  { %134 = vmatprep.subr.bf16.mxu0 %v173_v0  ;;  %138 = vmatprep.mubr.msk.bf16.mxu0 %vm174_vm0, %v173_v0  ;;  %v147_v3 = vld [vmem:[%s219_s0] sm:$0xff]   ;;  %vm57_vm1 = vcmask 261120  }
  0x14   :  { %135 = vmatpush3.bf16.msra.mxu0 %v145_v1  ;;  %v117_v4 = vld [vmem:[#allocation2] ss:$0 sm:$0xff] }
  0x15   :  { %136 = vmatprep.subr.bf16.mxu0 %v173_v0 }
  0x18   :  { %137 = vmatpush3.bf16.msra.mxu0 %v146_v2 }
  0x1b   :  { %139 = vmatmul.mubr.msk.bf16.vlgmr.msra.gmra.mrb[0].mxu0 %vm57_vm1, %v147_v3 }
  0xee   :  { %v95_v5 = vpop.f32.mrb[0].mxu0 }
  0xef   :  { %v140_v6 = vpop.f32.mrb[1].mxu0  ;;  %v96_v8 = vadd.f32 %v117_v4, %v95_v5 }
  0xf0   :  { %v98_v7 = vpop.f32.mrb[2].mxu0 }
  0xf1   :  { %v99_v9 = vadd.f32 %v117_v4, %v98_v7  ;;  %v141_v10 = vpop.f32.mrb[3].mxu0 }
  0xf3   :  { %v129_v11 = vpack.c.bf16 %v99_v9, %v96_v8 }
  0xf5   :  { %130 = vst [vmem:[%s222_s3] sm:$0xff] %v129_v11  }
  0xf6   :  { %116 = vsyncpa [#allocation3], 1 }

// kernel: generator_forward.9
= control target key start
LH: loop header
LB: loop body
LE: loop exit
PB: predicated region body
PF: predicated region fallthrough
CT: control target
= control target key end

     0   :  { %s634_s12 = smov 0   ;;  %s636_s13 = smov 0   ;;  %s691_s0 = inlined_call_operand.vmem [shape: bf16[4,16,128], index: 0, kind: input, shape index: {}]   ;;  %s692_s1 = inlined_call_operand.vmem [shape: bf16[4,128,128], index: 1, kind: input, shape index: {}]   ;;  %s693_s2 = inlined_call_operand.vmem [shape: bf16[4,16,128], index: 2, kind: output, shape index: {0}]   ;;  %s694_s3 = inlined_call_operand.vmem [shape: f32[2,128], index: 3, kind: output, shape index: {1}]  }
   0x1   :  { %s638_s14 = smov 0  }
   0x2 LB: > { %s26_s15 = sadd.s32 1, %s605_s13  ;;  %p490_p0 = scmp.ge.s32.totalorder %s609_s14, 1  ;;  %s609_s14 = sphi %s638_s14, %s14_s14   ;;  %s605_s13 = sphi %s636_s13, %s696_s13   ;;  %s601_s12 = sphi %s634_s12, %s695_s12  }
   0x3   : > { %p28_p1 = scmp.ge.s32.totalorder %s26_s15, 4  ;;  %p166_p2 = scmp.lt.s32.totalorder %s609_s14, 5 }
   0x5   : > { %s698_s15 = smov (%p28_p1, %s26_s15), 0  ;;  %p167_p3 = pnand %p490_p0, %p166_p2 }
   0x6   : > { %p204_p4 = scmp.lt.s32.totalorder (!%p167_p3), %s601_s12, 3  ;;  %p229_p5 = scmp.eq.s32.totalorder (!%p167_p3), %s601_s12, 0 }
   0x7   : > { %170 = sbr.rel (%p167_p3) target bundleno = 287 (0x11f), region = 28 }
   0xe   : > { %s700_s12 = smov (!%p204_p4, %s601_s12), 3  ;;  %234 = sbr.rel (!%p229_p5) target bundleno = 21 (0x15), region = 32 }
   0xf   : > { %s511_s16 = sshll.u32 %s700_s12, 3  ;;  %s512_s17 = sshll.u32 %s700_s12, 6  ;;  %v611_v0 = vmov (%p229_p5), 0.0  }
  0x10   : > { %s655_s20 = scalar_lea.vmem %s691_s0, %s511_s16  ;;  %s217_s23 = scalar_lea.vmem %s692_s1, %s512_s17  ;;  %235 = vst [vmem:[%s694_s3] sm:$0x3] (%p229_p5), %v611_v0 }
  0x11   : > { %s663_s26 = scalar_lea.vmem %s693_s2, %s511_s16 }
  0x15 PF: > { %v578_v1 = vld [vmem:[%s217_s23] sm:$0xff]   ;;  %v612_v2 = vmov 0.0   ;;  %v579_v3 = vld [vmem:[%s217_s23 + $0x8] sm:$0xff]   ;;  %vm613_vm0 = vmmov 0   ;;  %v580_v4 = vld [vmem:[%s217_s23 + $0x10] sm:$0xff]  }
  0x16   : > { %531 = vmatprep.subr.bf16.mxu0 %v612_v2  ;;  %547 = vmatprep.mubr.msk.bf16.mxu0 %vm613_vm0, %v612_v2  ;;  %v581_v5 = vld [vmem:[%s217_s23 + $0x18] sm:$0xff]   ;;  %v582_v6 = vld [vmem:[%s217_s23 + $0x20] sm:$0xff]   ;;  %v583_v7 = vld [vmem:[%s217_s23 + $0x28] sm:$0xff]  }
  0x17   : > { %532 = vmatpush3.bf16.msra.mxu0 %v578_v1  ;;  %v584_v8 = vld [vmem:[%s217_s23 + $0x30] sm:$0xff]   ;;  %v585_v9 = vld [vmem:[%s217_s23 + $0x38] sm:$0xff]   ;;  %v586_v10 = vld [vmem:[%s655_s20] sm:$0xff]  }
  0x18   : > { %533 = vmatprep.subr.bf16.mxu0 %v612_v2  ;;  %v359_v29 = vld [vmem:[%s694_s3] sm:$0x1]  ;;  %v369_v32 = vld [vmem:[%s694_s3 + $0x1] sm:$0x1] }
  0x1b   : > { %534 = vmatpush3.bf16.msra.mxu0 %v579_v3 }
  0x1c   : > { %535 = vmatprep.subr.bf16.mxu0 %v612_v2 }
  0x1f   : > { %536 = vmatpush3.bf16.msra.mxu0 %v580_v4 }
  0x20   : > { %537 = vmatprep.subr.bf16.mxu0 %v612_v2 }
  0x23   : > { %538 = vmatpush3.bf16.msra.mxu0 %v581_v5 }
  0x24   : > { %539 = vmatprep.subr.bf16.mxu0 %v612_v2 }
  0x27   : > { %540 = vmatpush3.bf16.msra.mxu0 %v582_v6 }
  0x28   : > { %541 = vmatprep.subr.bf16.mxu0 %v612_v2 }
  0x2b   : > { %542 = vmatpush3.bf16.msra.mxu0 %v583_v7 }
  0x2c   : > { %543 = vmatprep.subr.bf16.mxu0 %v612_v2 }
  0x2f   : > { %544 = vmatpush3.bf16.msra.mxu0 %v584_v8 }
  0x30   : > { %545 = vmatprep.subr.bf16.mxu0 %v612_v2 }
  0x33   : > { %546 = vmatpush3.bf16.msra.mxu0 %v585_v9 }
  0x36   : > { %548 = vmatmul.mubr.bf16.vlgmr.msra.gmra.mrb[0].mxu0 %v586_v10 }
 0x109   : > { %v342_v11 = vpop.f32.mrb[0].mxu0 }
 0x10a   : > { %v549_v12 = vpop.f32.mrb[1].mxu0  ;;  %v370_v14 = vmul.f32 %v342_v11, %v342_v11 }
 0x10b   : > { %v345_v13 = vpop.f32.mrb[2].mxu0 }
 0x10c   : > { %v520_v15 = vpack.c.bf16 %v345_v13, %v342_v11  ;;  %v360_v16 = vadd.f32 %v345_v13, %v342_v11  ;;  %v371_v17 = vmul.f32 %v345_v13, %v345_v13  ;;  %v550_v18 = vpop.f32.mrb[3].mxu0 }
 0x10e   : > { %521 = vst [vmem:[%s663_s26] sm:$0xff] %v520_v15   ;;  %v361_v19 = vrot.slane %v360_v16, 4  ;;  %v372_v20 = vadd.f32 %v371_v17, %v370_v14 }
 0x110   : > { %v362_v21 = vadd.f32 %v361_v19, %v360_v16  ;;  %v373_v22 = vrot.slane %v372_v20, 4 }
 0x112   : > { %v363_v23 = vrot.slane %v362_v21, 2  ;;  %v374_v24 = vadd.f32 %v373_v22, %v372_v20 }
 0x114   : > { %v364_v25 = vadd.f32 %v363_v23, %v362_v21  ;;  %v375_v26 = vrot.slane %v374_v24, 2 }
 0x116   : > { %v365_v27 = vrot.slane %v364_v25, 1  ;;  %v376_v28 = vadd.f32 %v375_v26, %v374_v24 }
 0x118   : > { %v366_v30 = vadd.f32 %v365_v27, %v364_v25  ;;  %v377_v31 = vrot.slane %v376_v28, 1 }
 0x11a   : > { %v367_v33 = vadd.f32 %v366_v30, %v359_v29  ;;  %v378_v34 = vadd.f32 %v377_v31, %v376_v28 }
 0x11c   : > { %368 = vst [vmem:[%s694_s3] sm:$0x1] %v367_v33  ;;  %v379_v35 = vadd.f32 %v378_v34, %v369_v32 }
 0x11e   : > { %380 = vst [vmem:[%s694_s3 + $0x1] sm:$0x1] %v379_v35 }
 0x11f PF: > { %s14_s14 = sadd.s32 1, %s609_s14   ;;  %s695_s12 = smov %s605_s13 }
 0x120   : > { %p11_p6 = scmp.ge.s32.totalorder %s14_s14, 6   ;;  %s696_s13 = smov %s698_s15 }
 0x122   :  { %13 = sbr.rel (!%p11_p6) target bundleno = 2 (0x2), region = 73 }

// kernel: generator_forward.10
= control target key start
LH: loop header
LB: loop body
LE: loop exit
PB: predicated region body
PF: predicated region fallthrough
CT: control target
= control target key end

     0   :  { %s222_s0 = inlined_call_operand.vmem [shape: bf16[64,128], index: 0, kind: input, shape index: {}]   ;;  %s223_s1 = inlined_call_operand.vmem [shape: f32[1,128], index: 1, kind: input, shape index: {}]   ;;  %s224_s2 = inlined_call_operand.vmem [shape: f32[1,128], index: 2, kind: input, shape index: {}]   ;;  %s225_s3 = inlined_call_operand.vmem [shape: bf16[64,128], index: 3, kind: output, shape index: {}]  }
   0x1   :  { %v131_v0 = vld [vmem:[%s222_s0] sm:$0xff]   ;;  %v166_v4 = vld [vmem:[%s222_s0 + $0x8] sm:$0xff]   ;;  %v167_v5 = vld [vmem:[%s222_s0 + $0x10] sm:$0xff]  }
   0x2   :  { %v112_v1 = vld [vmem:[%s223_s1] ss:$0 sm:$0xff]  ;;  %v132_v2 = vunpack.c.l.bf16 %v131_v0  ;;  %v133_v3 = vunpack.c.h.bf16 %v131_v0  ;;  %v168_v6 = vld [vmem:[%s222_s0 + $0x18] sm:$0xff]   ;;  %v136_v8 = vunpack.c.l.bf16 %v166_v4  ;;  %v137_v9 = vunpack.c.h.bf16 %v166_v4 }
   0x3   :  { %v113_v7 = vld [vmem:[%s224_s2] ss:$0 sm:$0xff]  ;;  %v140_v10 = vunpack.c.l.bf16 %v167_v5  ;;  %v141_v11 = vunpack.c.h.bf16 %v167_v5  ;;  %v144_v14 = vunpack.c.l.bf16 %v168_v6  ;;  %v145_v15 = vunpack.c.h.bf16 %v168_v6 }
   0x4   :  { %v37_v12 = vmul.f32 %v132_v2, %v112_v1  ;;  %v38_v13 = vmul.f32 %v133_v3, %v112_v1  ;;  %v39_v16 = vmul.f32 %v136_v8, %v112_v1  ;;  %v40_v17 = vmul.f32 %v137_v9, %v112_v1 }
   0x5   :  { %v41_v18 = vmul.f32 %v140_v10, %v112_v1  ;;  %v42_v19 = vmul.f32 %v141_v11, %v112_v1  ;;  %v43_v22 = vmul.f32 %v144_v14, %v112_v1  ;;  %v44_v23 = vmul.f32 %v145_v15, %v112_v1 }
   0x6   :  { %v52_v20 = vadd.f32 %v113_v7, %v37_v12  ;;  %v53_v21 = vadd.f32 %v113_v7, %v38_v13  ;;  %v54_v24 = vadd.f32 %v113_v7, %v39_v16  ;;  %v55_v25 = vadd.f32 %v113_v7, %v40_v17 }
   0x7   :  { %v56_v26 = vadd.f32 %v113_v7, %v41_v18  ;;  %v57_v27 = vadd.f32 %v113_v7, %v42_v19  ;;  %v58_v30 = vadd.f32 %v113_v7, %v43_v22  ;;  %v59_v31 = vadd.f32 %v113_v7, %v44_v23 }
   0x8   :  { %v60_v28 = vmax.f32 %v52_v20, 0.0  ;;  %v61_v29 = vmax.f32 %v53_v21, 0.0  ;;  %v62_v32 = vmax.f32 %v54_v24, 0.0  ;;  %v63_v33 = vmax.f32 %v55_v25, 0.0 }
   0x9   :  { %v64_v34 = vmax.f32 %v56_v26, 0.0  ;;  %v65_v35 = vmax.f32 %v57_v27, 0.0  ;;  %v66_v37 = vmax.f32 %v58_v30, 0.0  ;;  %v67_v38 = vmax.f32 %v59_v31, 0.0 }
   0xa   :  { %v149_v36 = vpack.c.bf16 %v61_v29, %v60_v28  ;;  %v154_v39 = vpack.c.bf16 %v63_v33, %v62_v32 }
   0xb   :  { %v159_v40 = vpack.c.bf16 %v65_v35, %v64_v34  ;;  %v164_v41 = vpack.c.bf16 %v67_v38, %v66_v37 }
   0xc   :  { %150 = vst [vmem:[%s225_s3] sm:$0xff] %v149_v36   ;;  %169 = vst [vmem:[%s225_s3 + $0x8] sm:$0xff] %v154_v39  }
   0xd   :  { %170 = vst [vmem:[%s225_s3 + $0x10] sm:$0xff] %v159_v40   ;;  %171 = vst [vmem:[%s225_s3 + $0x18] sm:$0xff] %v164_v41  }

// kernel: generator_forward.12
= control target key start
LH: loop header
LB: loop body
LE: loop exit
PB: predicated region body
PF: predicated region fallthrough
CT: control target
= control target key end

     0   :  { %s422_s0 = inlined_call_operand.vmem [shape: bf16[128,128], index: 0, kind: input, shape index: {}]   ;;  %s423_s1 = inlined_call_operand.vmem [shape: f32[1,128], index: 1, kind: input, shape index: {}]   ;;  %s424_s2 = inlined_call_operand.vmem [shape: f32[1,128], index: 2, kind: input, shape index: {}]   ;;  %s425_s3 = inlined_call_operand.vmem [shape: bf16[128,128], index: 3, kind: output, shape index: {}]  }
   0x1   :  { %v227_v0 = vld [vmem:[%s422_s0] sm:$0xff]   ;;  %v298_v4 = vld [vmem:[%s422_s0 + $0x8] sm:$0xff]   ;;  %v299_v5 = vld [vmem:[%s422_s0 + $0x10] sm:$0xff]  }
   0x2   :  { %v338_v1 = vld [vmem:[%s423_s1] ss:$0 sm:$0xff]  ;;  %v228_v2 = vunpack.c.l.bf16 %v227_v0  ;;  %v229_v3 = vunpack.c.h.bf16 %v227_v0  ;;  %v300_v6 = vld [vmem:[%s422_s0 + $0x18] sm:$0xff]   ;;  %v232_v8 = vunpack.c.l.bf16 %v298_v4  ;;  %v233_v9 = vunpack.c.h.bf16 %v298_v4  ;;  %v302_v33 = vld [vmem:[%s422_s0 + $0x28] sm:$0xff]  }
   0x3   :  { %v352_v7 = vld [vmem:[%s424_s2] ss:$0 sm:$0xff]  ;;  %v236_v10 = vunpack.c.l.bf16 %v299_v5  ;;  %v237_v11 = vunpack.c.h.bf16 %v299_v5  ;;  %v240_v14 = vunpack.c.l.bf16 %v300_v6  ;;  %v241_v15 = vunpack.c.h.bf16 %v300_v6  ;;  %v303_v38 = vld [vmem:[%s422_s0 + $0x30] sm:$0xff]   ;;  %v304_v43 = vld [vmem:[%s422_s0 + $0x38] sm:$0xff]  }
   0x4   :  { %v53_v12 = vmul.f32 %v228_v2, %v338_v1  ;;  %v54_v13 = vmul.f32 %v229_v3, %v338_v1  ;;  %v55_v16 = vmul.f32 %v232_v8, %v338_v1  ;;  %v56_v17 = vmul.f32 %v233_v9, %v338_v1  ;;  %v301_v28 = vld [vmem:[%s422_s0 + $0x20] sm:$0xff]  }
   0x5   :  { %v57_v18 = vmul.f32 %v236_v10, %v338_v1  ;;  %v58_v19 = vmul.f32 %v237_v11, %v338_v1  ;;  %v59_v22 = vmul.f32 %v240_v14, %v338_v1  ;;  %v60_v23 = vmul.f32 %v241_v15, %v338_v1 }
   0x6   :  { %v76_v20 = vadd.f32 %v352_v7, %v53_v12  ;;  %v77_v21 = vadd.f32 %v352_v7, %v54_v13  ;;  %v78_v24 = vadd.f32 %v352_v7, %v55_v16  ;;  %v79_v25 = vadd.f32 %v352_v7, %v56_v17 }
   0x7   :  { %v80_v26 = vadd.f32 %v352_v7, %v57_v18  ;;  %v81_v27 = vadd.f32 %v352_v7, %v58_v19  ;;  %v82_v31 = vadd.f32 %v352_v7, %v59_v22  ;;  %v83_v32 = vadd.f32 %v352_v7, %v60_v23 }
   0x8   :  { %v92_v29 = vmax.f32 %v76_v20, 0.0  ;;  %v93_v30 = vmax.f32 %v77_v21, 0.0  ;;  %v94_v34 = vmax.f32 %v78_v24, 0.0  ;;  %v95_v35 = vmax.f32 %v79_v25, 0.0 }
   0x9   :  { %v96_v36 = vmax.f32 %v80_v26, 0.0  ;;  %v97_v37 = vmax.f32 %v81_v27, 0.0  ;;  %v98_v40 = vmax.f32 %v82_v31, 0.0  ;;  %v99_v41 = vmax.f32 %v83_v32, 0.0 }
   0xa   :  { %v261_v39 = vpack.c.bf16 %v93_v30, %v92_v29  ;;  %v244_v42 = vunpack.c.l.bf16 %v301_v28  ;;  %v266_v44 = vpack.c.bf16 %v95_v35, %v94_v34  ;;  %v245_v46 = vunpack.c.h.bf16 %v301_v28 }
   0xb   :  { %v271_v45 = vpack.c.bf16 %v97_v37, %v96_v36  ;;  %v248_v47 = vunpack.c.l.bf16 %v302_v33  ;;  %v276_v48 = vpack.c.bf16 %v99_v41, %v98_v40  ;;  %v249_v50 = vunpack.c.h.bf16 %v302_v33 }
   0xc   :  { %262 = vst [vmem:[%s425_s3] sm:$0xff] %v261_v39   ;;  %v61_v49 = vmul.f32 %v244_v42, %v338_v1  ;;  %v252_v51 = vunpack.c.l.bf16 %v303_v38  ;;  %305 = vst [vmem:[%s425_s3 + $0x8] sm:$0xff] %v266_v44   ;;  %v62_v52 = vmul.f32 %v245_v46, %v338_v1  ;;  %v253_v54 = vunpack.c.h.bf16 %v303_v38 }
   0xd   :  { %306 = vst [vmem:[%s425_s3 + $0x10] sm:$0xff] %v271_v45   ;;  %v63_v53 = vmul.f32 %v248_v47, %v338_v1  ;;  %v256_v55 = vunpack.c.l.bf16 %v304_v43  ;;  %307 = vst [vmem:[%s425_s3 + $0x18] sm:$0xff] %v276_v48   ;;  %v64_v57 = vmul.f32 %v249_v50, %v338_v1  ;;  %v257_v59 = vunpack.c.h.bf16 %v304_v43 }
   0xe   :  { %v84_v56 = vadd.f32 %v352_v7, %v61_v49  ;;  %v65_v58 = vmul.f32 %v252_v51, %v338_v1  ;;  %v85_v60 = vadd.f32 %v352_v7, %v62_v52  ;;  %v66_v62 = vmul.f32 %v253_v54, %v338_v1 }
   0xf   :  { %v86_v61 = vadd.f32 %v352_v7, %v63_v53  ;;  %v67_v63 = vmul.f32 %v256_v55, %v338_v1  ;;  %v87_v2 = vadd.f32 %v352_v7, %v64_v57  ;;  %v68_v4 = vmul.f32 %v257_v59, %v338_v1 }
  0x10   :  { %v100_v0 = vmax.f32 %v84_v56, 0.0  ;;  %v88_v3 = vadd.f32 %v352_v7, %v65_v58  ;;  %v101_v5 = vmax.f32 %v85_v60, 0.0  ;;  %v89_v8 = vadd.f32 %v352_v7, %v66_v62 }
  0x11   :  { %v102_v6 = vmax.f32 %v86_v61, 0.0  ;;  %v90_v9 = vadd.f32 %v352_v7, %v67_v63  ;;  %v103_v10 = vmax.f32 %v87_v2, 0.0  ;;  %v91_v12 = vadd.f32 %v352_v7, %v68_v4 }
  0x12   :  { %v104_v11 = vmax.f32 %v88_v3, 0.0  ;;  %v281_v13 = vpack.c.bf16 %v101_v5, %v100_v0  ;;  %v105_v14 = vmax.f32 %v89_v8, 0.0 }
  0x13   :  { %v106_v15 = vmax.f32 %v90_v9, 0.0  ;;  %v286_v16 = vpack.c.bf16 %v103_v10, %v102_v6  ;;  %v107_v17 = vmax.f32 %v91_v12, 0.0 }
  0x14   :  { %308 = vst [vmem:[%s425_s3 + $0x20] sm:$0xff] %v281_v13   ;;  %v291_v1 = vpack.c.bf16 %v105_v14, %v104_v11 }
  0x15   :  { %309 = vst [vmem:[%s425_s3 + $0x28] sm:$0xff] %v286_v16   ;;  %v296_v18 = vpack.c.bf16 %v107_v17, %v106_v15 }
  0x16   :  { %310 = vst [vmem:[%s425_s3 + $0x30] sm:$0xff] %v291_v1  }
  0x17   :  { %311 = vst [vmem:[%s425_s3 + $0x38] sm:$0xff] %v296_v18  }

// kernel: generator_forward.11
= control target key start
LH: loop header
LB: loop body
LE: loop exit
PB: predicated region body
PF: predicated region fallthrough
CT: control target
= control target key end

     0   :  { %s630_s12 = smov 0   ;;  %s632_s13 = smov 0   ;;  %s685_s0 = inlined_call_operand.vmem [shape: bf16[4,32,64], index: 0, kind: input, shape index: {}]   ;;  %s686_s1 = inlined_call_operand.vmem [shape: bf16[4,64,128], index: 1, kind: input, shape index: {}]   ;;  %s687_s2 = inlined_call_operand.vmem [shape: bf16[4,32,128], index: 2, kind: output, shape index: {0}]   ;;  %s688_s3 = inlined_call_operand.vmem [shape: f32[2,128], index: 3, kind: output, shape index: {1}]  }
   0x1   :  { %s634_s14 = smov 0  }
   0x2 LB: > { %s26_s15 = sadd.s32 1, %s603_s13  ;;  %p495_p0 = scmp.ge.s32.totalorder %s607_s14, 1  ;;  %s607_s14 = sphi %s634_s14, %s14_s14   ;;  %s603_s13 = sphi %s632_s13, %s690_s13   ;;  %s599_s12 = sphi %s630_s12, %s689_s12  }
   0x3   : > { %p28_p1 = scmp.ge.s32.totalorder %s26_s15, 4  ;;  %p166_p2 = scmp.lt.s32.totalorder %s607_s14, 5 }
   0x5   : > { %s692_s15 = smov (%p28_p1, %s26_s15), 0  ;;  %p167_p3 = pnand %p495_p0, %p166_p2 }
   0x6   : > { %p204_p4 = scmp.lt.s32.totalorder (!%p167_p3), %s599_s12, 3  ;;  %p229_p5 = scmp.eq.s32.totalorder (!%p167_p3), %s599_s12, 0 }
   0x7   : > { %170 = sbr.rel (%p167_p3) target bundleno = 276 (0x114), region = 28 }
   0xe   : > { %s694_s12 = smov (!%p204_p4, %s599_s12), 3  ;;  %234 = sbr.rel (!%p229_p5) target bundleno = 21 (0x15), region = 32 }
   0xf   : > { %s517_s16 = sshll.u32 %s694_s12, 4  ;;  %s518_s17 = sshll.u32 %s694_s12, 5  ;;  %v609_v0 = vmov (%p229_p5), 0.0  }
  0x10   : > { %s211_s20 = scalar_lea.vmem %s685_s0, %s517_s16  ;;  %s217_s23 = scalar_lea.vmem %s686_s1, %s518_s17  ;;  %235 = vst [vmem:[%s688_s3] sm:$0x3] (%p229_p5), %v609_v0 }
  0x11   : > { %s657_s26 = scalar_lea.vmem %s687_s2, %s517_s16 }
  0x15 PF: > { %v579_v1 = vld [vmem:[%s217_s23] sm:$0xff]   ;;  %v580_v2 = vld [vmem:[%s217_s23 + $0x8] sm:$0xff]   ;;  %v581_v3 = vld [vmem:[%s217_s23 + $0x10] sm:$0xff]   ;;  %vm282_vm0 = vcmask 523264  }
  0x16   : > { %542 = vmatprep.subr.bf16.mxu0 %v579_v1  ;;  %v583_v4 = vld [vmem:[%s211_s20] sm:$0xff]   ;;  %v582_v5 = vld [vmem:[%s217_s23 + $0x18] sm:$0xff]   ;;  %v584_v6 = vld [vmem:[%s211_s20 + $0x8] sm:$0xff]  }
  0x17   : > { %543 = vmatpush3.bf16.msra.mxu0 %v579_v1  ;;  %550 = vmatprep.mubr.msk.bf16.mxu0 %vm282_vm0, %v583_v4  ;;  %v358_v32 = vld [vmem:[%s688_s3] sm:$0x1]  ;;  %v370_v35 = vld [vmem:[%s688_s3 + $0x1] sm:$0x1] }
  0x18   : > { %544 = vmatprep.subr.bf16.mxu0 %v580_v2 }
  0x1b   : > { %545 = vmatpush3.bf16.msra.mxu0 %v580_v2 }
  0x1c   : > { %546 = vmatprep.subr.bf16.mxu0 %v581_v3 }
  0x1f   : > { %547 = vmatpush3.bf16.msra.mxu0 %v581_v3 }
  0x20   : > { %548 = vmatprep.subr.bf16.mxu0 %v582_v5 }
  0x23   : > { %549 = vmatpush3.bf16.msra.mxu0 %v582_v5 }
  0x26   : > { %551 = vmatmul.mubr.msk.bf16.vlgmr.msra.gmra.mrb[0].mxu0 %vm282_vm0, %v584_v6 }
  0xf9   : > { %v552_v7 = vpop.f32.mrb[0].mxu0 }
  0xfa   : > { %v323_v8 = vpop.f32.mrb[1].mxu0  ;;  %v373_v16 = vmul.f32 %v552_v7, %v552_v7 }
  0xfb   : > { %v553_v9 = vpop.f32.mrb[2].mxu0  ;;  %v371_v12 = vmul.f32 %v323_v8, %v323_v8 }
  0xfc   : > { %v533_v10 = vpack.c.bf16 %v553_v9, %v552_v7  ;;  %v326_v11 = vpop.f32.mrb[3].mxu0  ;;  %v374_v19 = vmul.f32 %v553_v9, %v553_v9 }
  0xfd   : > { %v528_v13 = vpack.c.bf16 %v326_v11, %v323_v8  ;;  %v359_v14 = vadd.f32 %v326_v11, %v323_v8  ;;  %v372_v15 = vmul.f32 %v326_v11, %v326_v11 }
  0xfe   : > { %535 = vst [vmem:[%s657_s26 + $0x8] sm:$0xff] %v533_v10  }
  0xff   : > { %529 = vst [vmem:[%s657_s26] sm:$0xff] %v528_v13   ;;  %v360_v17 = vadd.f32 %v552_v7, %v359_v14  ;;  %v375_v18 = vadd.f32 %v372_v15, %v371_v12 }
 0x101   : > { %v361_v20 = vadd.f32 %v553_v9, %v360_v17  ;;  %v376_v21 = vadd.f32 %v375_v18, %v373_v16 }
 0x103   : > { %v362_v22 = vrot.slane %v361_v20, 4  ;;  %v377_v23 = vadd.f32 %v376_v21, %v374_v19 }
 0x105   : > { %v363_v24 = vadd.f32 %v362_v22, %v361_v20  ;;  %v378_v25 = vrot.slane %v377_v23, 4 }
 0x107   : > { %v364_v26 = vrot.slane %v363_v24, 2  ;;  %v379_v27 = vadd.f32 %v378_v25, %v377_v23 }
 0x109   : > { %v365_v28 = vadd.f32 %v364_v26, %v363_v24  ;;  %v380_v29 = vrot.slane %v379_v27, 2 }
 0x10b   : > { %v366_v30 = vrot.slane %v365_v28, 1  ;;  %v381_v31 = vadd.f32 %v380_v29, %v379_v27 }
 0x10d   : > { %v367_v33 = vadd.f32 %v366_v30, %v365_v28  ;;  %v382_v34 = vrot.slane %v381_v31, 1 }
 0x10f   : > { %v368_v36 = vadd.f32 %v367_v33, %v358_v32  ;;  %v383_v37 = vadd.f32 %v382_v34, %v381_v31 }
 0x111   : > { %369 = vst [vmem:[%s688_s3] sm:$0x1] %v368_v36  ;;  %v384_v38 = vadd.f32 %v383_v37, %v370_v35 }
 0x113   : > { %385 = vst [vmem:[%s688_s3 + $0x1] sm:$0x1] %v384_v38 }
 0x114 PF: > { %s14_s14 = sadd.s32 1, %s607_s14   ;;  %s689_s12 = smov %s603_s13 }
 0x115   : > { %p11_p6 = scmp.ge.s32.totalorder %s14_s14, 6   ;;  %s690_s13 = smov %s692_s15 }
 0x117   :  { %13 = sbr.rel (!%p11_p6) target bundleno = 2 (0x2), region = 73 }

// kernel: generator_forward.13
= control target key start
LH: loop header
LB: loop body
LE: loop exit
PB: predicated region body
PF: predicated region fallthrough
CT: control target
= control target key end

     0   :  { %s908_s12 = smov 0   ;;  %s910_s13 = smov 0   ;;  %s987_s0 = inlined_call_operand.vmem [shape: bf16[4,128,32], index: 0, kind: input, shape index: {}]   ;;  %s988_s1 = inlined_call_operand.vmem [shape: bf16[4,32,128], index: 1, kind: input, shape index: {}]   ;;  %s989_s2 = inlined_call_operand.vmem [shape: bf16[4,128,128], index: 2, kind: output, shape index: {0}]   ;;  %s990_s3 = inlined_call_operand.vmem [shape: f32[2,128], index: 3, kind: output, shape index: {1}]  }
   0x1   :  { %s912_s14 = smov 0  }
   0x2 LB: > { %s26_s15 = sadd.s32 1, %s881_s13  ;;  %p683_p0 = scmp.ge.s32.totalorder %s885_s14, 1  ;;  %s885_s14 = sphi %s912_s14, %s14_s14   ;;  %s881_s13 = sphi %s910_s13, %s992_s13   ;;  %s877_s12 = sphi %s908_s12, %s991_s12  }
   0x3   : > { %p28_p1 = scmp.ge.s32.totalorder %s26_s15, 4  ;;  %p166_p2 = scmp.lt.s32.totalorder %s885_s14, 5 }
   0x5   : > { %s994_s15 = smov (%p28_p1, %s26_s15), 0  ;;  %p167_p3 = pnand %p683_p0, %p166_p2 }
   0x6   : > { %p204_p4 = scmp.lt.s32.totalorder (!%p167_p3), %s877_s12, 3  ;;  %p229_p5 = scmp.eq.s32.totalorder (!%p167_p3), %s877_s12, 0 }
   0x7   : > { %170 = sbr.rel (%p167_p3) target bundleno = 292 (0x124), region = 28 }
   0xe   : > { %s996_s12 = smov (!%p204_p4, %s877_s12), 3  ;;  %234 = sbr.rel (!%p229_p5) target bundleno = 21 (0x15), region = 32 }
   0xf   : > { %s727_s16 = sshll.u32 %s996_s12, 6  ;;  %s728_s17 = sshll.u32 %s996_s12, 4  ;;  %v887_v0 = vmov (%p229_p5), 0.0  }
  0x10   : > { %s929_s20 = scalar_lea.vmem %s987_s0, %s727_s16  ;;  %s217_s23 = scalar_lea.vmem %s988_s1, %s728_s17  ;;  %235 = vst [vmem:[%s990_s3] sm:$0x3] (%p229_p5), %v887_v0 }
  0x11   : > { %s937_s26 = scalar_lea.vmem %s989_s2, %s727_s16 }
  0x15 PF: > { %v853_v1 = vld [vmem:[%s217_s23] sm:$0xff]   ;;  %v854_v2 = vld [vmem:[%s217_s23 + $0x8] sm:$0xff]   ;;  %vm308_vm0 = vcmask 261120   ;;  %v857_v5 = vld [vmem:[%s929_s20 + $0x10] sm:$0xff]  }
  0x16   : > { %804 = vmatprep.subr.bf16.mxu0 %v853_v1  ;;  %v855_v3 = vld [vmem:[%s929_s20] sm:$0xff]   ;;  %824 = vmatprep.subr.bf16.mxu1 %v853_v1  ;;  %v856_v4 = vld [vmem:[%s929_s20 + $0x8] sm:$0xff]   ;;  %v861_v8 = vld [vmem:[%s929_s20 + $0x30] sm:$0xff]  }
  0x17   : > { %805 = vmatpush3.bf16.msra.mxu0 %v853_v1  ;;  %826 = vmatpush3.bf16.msra.mxu1 %v853_v1  ;;  %v859_v6 = vld [vmem:[%s929_s20 + $0x20] sm:$0xff]   ;;  %v860_v7 = vld [vmem:[%s929_s20 + $0x28] sm:$0xff]   ;;  %v858_v9 = vld [vmem:[%s929_s20 + $0x18] sm:$0xff]  }
  0x18   : > { %806 = vmatprep.subr.bf16.mxu0 %v854_v2  ;;  %808 = vmatprep.mubr.msk.bf16.mxu0 %vm308_vm0, %v855_v3  ;;  %v862_v10 = vld [vmem:[%s929_s20 + $0x38] sm:$0xff]  }
  0x19   : > { %825 = vmatprep.subr.bf16.mxu1 %v854_v2  ;;  %816 = vmatprep.mubr.msk.bf16.mxu1 %vm308_vm0, %v859_v6 }
  0x1b   : > { %807 = vmatpush3.bf16.msra.mxu0 %v854_v2  ;;  %827 = vmatpush3.bf16.msra.mxu1 %v854_v2 }
  0x1e   : > { %809 = vmatmul.mubr.msk.bf16.vlgmr.msra.gmra.mrb[0].mxu0 %vm308_vm0, %v856_v4  ;;  %817 = vmatmul.mubr.msk.bf16.vlgmr.msra.gmra.mrb[0].mxu1 %vm308_vm0, %v860_v7 }
  0x1f   : > { %812 = vmatprep.mubr.msk.bf16.mxu0 %vm308_vm0, %v857_v5  ;;  %820 = vmatprep.mubr.msk.bf16.mxu1 %vm308_vm0, %v861_v8 }
  0x26   : > { %813 = vmatmul.mubr.msk.bf16.gmra.mrb[4].mxu0 %vm308_vm0, %v858_v9  ;;  %821 = vmatmul.mubr.msk.bf16.gmra.mrb[4].mxu1 %vm308_vm0, %v862_v10 }
  0xf1   : > { %v810_v11 = vpop.f32.mrb[0].mxu0  ;;  %v818_v12 = vpop.f32.mrb[0].mxu1 }
  0xf2   : > { %v367_v13 = vpop.f32.mrb[1].mxu0  ;;  %v399_v14 = vpop.f32.mrb[1].mxu1  ;;  %v537_v26 = vmul.f32 %v810_v11, %v810_v11  ;;  %v545_v62 = vmul.f32 %v818_v12, %v818_v12 }
  0xf3   : > { %v811_v15 = vpop.f32.mrb[2].mxu0  ;;  %v819_v16 = vpop.f32.mrb[2].mxu1  ;;  %v535_v17 = vmul.f32 %v367_v13, %v367_v13  ;;  %v543_v56 = vmul.f32 %v399_v14, %v399_v14 }
  0xf4   : > { %v755_v18 = vpack.c.bf16 %v811_v15, %v810_v11  ;;  %v370_v19 = vpop.f32.mrb[3].mxu0  ;;  %v775_v20 = vpack.c.bf16 %v819_v16, %v818_v12  ;;  %v402_v21 = vpop.f32.mrb[3].mxu1  ;;  %v538_v29 = vmul.f32 %v811_v15, %v811_v15  ;;  %v546_v1 = vmul.f32 %v819_v16, %v819_v16 }
  0xf5   : > { %v750_v22 = vpack.c.bf16 %v370_v19, %v367_v13  ;;  %v511_v23 = vadd.f32 %v370_v19, %v367_v13  ;;  %v536_v24 = vmul.f32 %v370_v19, %v370_v19  ;;  %v770_v25 = vpack.c.bf16 %v402_v21, %v399_v14 }
  0xf6   : > { %787 = vst [vmem:[%s937_s26 + $0x8] sm:$0xff] %v755_v18   ;;  %791 = vst [vmem:[%s937_s26 + $0x28] sm:$0xff] %v775_v20   ;;  %v544_v61 = vmul.f32 %v402_v21, %v402_v21 }
  0xf7   : > { %751 = vst [vmem:[%s937_s26] sm:$0xff] %v750_v22   ;;  %v512_v27 = vadd.f32 %v810_v11, %v511_v23  ;;  %v551_v28 = vadd.f32 %v536_v24, %v535_v17  ;;  %790 = vst [vmem:[%s937_s26 + $0x20] sm:$0xff] %v770_v25  }
  0xf9   : > { %v552_v30 = vadd.f32 %v551_v28, %v537_v26  ;;  %v814_v31 = vpop.f32.mrb[4].mxu0  ;;  %v513_v32 = vadd.f32 %v811_v15, %v512_v27  ;;  %v822_v33 = vpop.f32.mrb[4].mxu1  ;;  %v510_v26 = vld [vmem:[%s990_s3] sm:$0x1] }
  0xfa   : > { %v383_v34 = vpop.f32.mrb[5].mxu0  ;;  %v415_v35 = vpop.f32.mrb[5].mxu1  ;;  %v541_v50 = vmul.f32 %v814_v31, %v814_v31  ;;  %v549_v10 = vmul.f32 %v822_v33, %v822_v33 }
  0xfb   : > { %v514_v36 = vadd.f32 %v513_v32, %v383_v34  ;;  %v539_v37 = vmul.f32 %v383_v34, %v383_v34  ;;  %v553_v38 = vadd.f32 %v552_v30, %v538_v29  ;;  %v815_v39 = vpop.f32.mrb[6].mxu0  ;;  %v823_v40 = vpop.f32.mrb[6].mxu1  ;;  %v547_v4 = vmul.f32 %v415_v35, %v415_v35  ;;  %v534_v29 = vld [vmem:[%s990_s3 + $0x1] sm:$0x1] }
  0xfc   : > { %v765_v41 = vpack.c.bf16 %v815_v39, %v814_v31  ;;  %v386_v42 = vpop.f32.mrb[7].mxu0  ;;  %v785_v43 = vpack.c.bf16 %v823_v40, %v822_v33  ;;  %v418_v44 = vpop.f32.mrb[7].mxu1  ;;  %v542_v53 = vmul.f32 %v815_v39, %v815_v39 }
  0xfd   : > { %v554_v45 = vadd.f32 %v553_v38, %v539_v37  ;;  %v760_v46 = vpack.c.bf16 %v386_v42, %v383_v34  ;;  %v515_v47 = vadd.f32 %v514_v36, %v386_v42  ;;  %v540_v48 = vmul.f32 %v386_v42, %v386_v42 }
  0xfe   : > { %789 = vst [vmem:[%s937_s26 + $0x18] sm:$0xff] %v765_v41   ;;  %793 = vst [vmem:[%s937_s26 + $0x38] sm:$0xff] %v785_v43   ;;  %v780_v49 = vpack.c.bf16 %v418_v44, %v415_v35  ;;  %v548_v9 = vmul.f32 %v418_v44, %v418_v44 }
  0xff   : > { %788 = vst [vmem:[%s937_s26 + $0x10] sm:$0xff] %v760_v46   ;;  %v516_v51 = vadd.f32 %v814_v31, %v515_v47  ;;  %v555_v52 = vadd.f32 %v554_v45, %v540_v48 }
 0x100   : > { %792 = vst [vmem:[%s937_s26 + $0x30] sm:$0xff] %v780_v49  }
 0x101   : > { %v556_v54 = vadd.f32 %v555_v52, %v541_v50  ;;  %v517_v55 = vadd.f32 %v815_v39, %v516_v51 }
 0x103   : > { %v518_v57 = vadd.f32 %v517_v55, %v399_v14  ;;  %v557_v58 = vadd.f32 %v556_v54, %v542_v53  ;;  %v550_v14 = vmul.f32 %v823_v40, %v823_v40 }
 0x105   : > { %v558_v59 = vadd.f32 %v557_v58, %v543_v56  ;;  %v519_v60 = vadd.f32 %v518_v57, %v402_v21 }
 0x107   : > { %v520_v63 = vadd.f32 %v818_v12, %v519_v60  ;;  %v559_v0 = vadd.f32 %v558_v59, %v544_v61 }
 0x109   : > { %v560_v2 = vadd.f32 %v559_v0, %v545_v62  ;;  %v521_v3 = vadd.f32 %v819_v16, %v520_v63 }
 0x10b   : > { %v522_v5 = vadd.f32 %v521_v3, %v415_v35  ;;  %v561_v6 = vadd.f32 %v560_v2, %v546_v1 }
 0x10d   : > { %v562_v7 = vadd.f32 %v561_v6, %v547_v4  ;;  %v523_v8 = vadd.f32 %v522_v5, %v418_v44 }
 0x10f   : > { %v524_v11 = vadd.f32 %v822_v33, %v523_v8  ;;  %v563_v13 = vadd.f32 %v562_v7, %v548_v9 }
 0x111   : > { %v525_v15 = vadd.f32 %v823_v40, %v524_v11  ;;  %v564_v17 = vadd.f32 %v563_v13, %v549_v10 }
 0x113   : > { %v526_v18 = vrot.slane %v525_v15, 4  ;;  %v565_v19 = vadd.f32 %v564_v17, %v550_v14 }
 0x115   : > { %v527_v20 = vadd.f32 %v526_v18, %v525_v15  ;;  %v566_v12 = vrot.slane %v565_v19, 4 }
 0x117   : > { %v528_v21 = vrot.slane %v527_v20, 2  ;;  %v567_v22 = vadd.f32 %v566_v12, %v565_v19 }
 0x119   : > { %v529_v23 = vadd.f32 %v528_v21, %v527_v20  ;;  %v568_v16 = vrot.slane %v567_v22, 2 }
 0x11b   : > { %v530_v24 = vrot.slane %v529_v23, 1  ;;  %v569_v25 = vadd.f32 %v568_v16, %v567_v22 }
 0x11d   : > { %v531_v27 = vadd.f32 %v530_v24, %v529_v23  ;;  %v570_v28 = vrot.slane %v569_v25, 1 }
 0x11f   : > { %v532_v30 = vadd.f32 %v531_v27, %v510_v26  ;;  %v571_v31 = vadd.f32 %v570_v28, %v569_v25 }
 0x121   : > { %533 = vst [vmem:[%s990_s3] sm:$0x1] %v532_v30  ;;  %v572_v32 = vadd.f32 %v571_v31, %v534_v29 }
 0x123   : > { %573 = vst [vmem:[%s990_s3 + $0x1] sm:$0x1] %v572_v32 }
 0x124 PF: > { %s14_s14 = sadd.s32 1, %s885_s14   ;;  %s991_s12 = smov %s881_s13 }
 0x125   : > { %p11_p6 = scmp.ge.s32.totalorder %s14_s14, 6   ;;  %s992_s13 = smov %s994_s15 }
 0x127   :  { %13 = sbr.rel (!%p11_p6) target bundleno = 2 (0x2), region = 73 }

// kernel: generator_forward.14
= control target key start
LH: loop header
LB: loop body
LE: loop exit
PB: predicated region body
PF: predicated region fallthrough
CT: control target
= control target key end

     0   :  { %s1502_s0 = inlined_call_operand.vmem [shape: bf16[512,128], index: 0, kind: input, shape index: {}]   ;;  %s1503_s1 = inlined_call_operand.vmem [shape: f32[1,128], index: 1, kind: input, shape index: {}]   ;;  %s1504_s2 = inlined_call_operand.vmem [shape: f32[1,128], index: 2, kind: input, shape index: {}]   ;;  %s1505_s3 = inlined_call_operand.vmem [shape: bf16[512,128], index: 3, kind: output, shape index: {}]  }
   0x1   :  { %v803_v0 = vld [vmem:[%s1502_s0] sm:$0xff]   ;;  %v1090_v4 = vld [vmem:[%s1502_s0 + $0x8] sm:$0xff]   ;;  %v1091_v5 = vld [vmem:[%s1502_s0 + $0x10] sm:$0xff]  }
   0x2   :  { %v1178_v1 = vld [vmem:[%s1503_s1] ss:$0 sm:$0xff]  ;;  %v804_v2 = vunpack.c.l.bf16 %v803_v0  ;;  %v805_v3 = vunpack.c.h.bf16 %v803_v0  ;;  %v1092_v6 = vld [vmem:[%s1502_s0 + $0x18] sm:$0xff]   ;;  %v808_v8 = vunpack.c.l.bf16 %v1090_v4  ;;  %v809_v9 = vunpack.c.h.bf16 %v1090_v4  ;;  %v1094_v33 = vld [vmem:[%s1502_s0 + $0x28] sm:$0xff]  }
   0x3   :  { %v1192_v7 = vld [vmem:[%s1504_s2] ss:$0 sm:$0xff]  ;;  %v812_v10 = vunpack.c.l.bf16 %v1091_v5  ;;  %v813_v11 = vunpack.c.h.bf16 %v1091_v5  ;;  %v816_v14 = vunpack.c.l.bf16 %v1092_v6  ;;  %v817_v15 = vunpack.c.h.bf16 %v1092_v6  ;;  %v1095_v38 = vld [vmem:[%s1502_s0 + $0x30] sm:$0xff]   ;;  %v1096_v43 = vld [vmem:[%s1502_s0 + $0x38] sm:$0xff]  }
   0x4   :  { %v149_v12 = vmul.f32 %v804_v2, %v1178_v1  ;;  %v150_v13 = vmul.f32 %v805_v3, %v1178_v1  ;;  %v151_v16 = vmul.f32 %v808_v8, %v1178_v1  ;;  %v152_v17 = vmul.f32 %v809_v9, %v1178_v1  ;;  %v1093_v28 = vld [vmem:[%s1502_s0 + $0x20] sm:$0xff]  }
   0x5   :  { %v153_v18 = vmul.f32 %v812_v10, %v1178_v1  ;;  %v154_v19 = vmul.f32 %v813_v11, %v1178_v1  ;;  %v155_v22 = vmul.f32 %v816_v14, %v1178_v1  ;;  %v156_v23 = vmul.f32 %v817_v15, %v1178_v1  ;;  %v1097_v0 = vld [vmem:[%s1502_s0 + $0x40] sm:$0xff]   ;;  %v1098_v11 = vld [vmem:[%s1502_s0 + $0x48] sm:$0xff]  }
   0x6   :  { %v220_v20 = vadd.f32 %v1192_v7, %v149_v12  ;;  %v221_v21 = vadd.f32 %v1192_v7, %v150_v13  ;;  %v222_v24 = vadd.f32 %v1192_v7, %v151_v16  ;;  %v223_v25 = vadd.f32 %v1192_v7, %v152_v17  ;;  %v1099_v16 = vld [vmem:[%s1502_s0 + $0x50] sm:$0xff]  }
   0x7   :  { %v224_v26 = vadd.f32 %v1192_v7, %v153_v18  ;;  %v225_v27 = vadd.f32 %v1192_v7, %v154_v19  ;;  %v226_v31 = vadd.f32 %v1192_v7, %v155_v22  ;;  %v227_v32 = vadd.f32 %v1192_v7, %v156_v23 }
   0x8   :  { %v284_v29 = vmax.f32 %v220_v20, 0.0  ;;  %v285_v30 = vmax.f32 %v221_v21, 0.0  ;;  %v286_v34 = vmax.f32 %v222_v24, 0.0  ;;  %v287_v35 = vmax.f32 %v223_v25, 0.0  ;;  %v1100_v25 = vld [vmem:[%s1502_s0 + $0x58] sm:$0xff]  }
   0x9   :  { %v288_v36 = vmax.f32 %v224_v26, 0.0  ;;  %v289_v37 = vmax.f32 %v225_v27, 0.0  ;;  %v290_v40 = vmax.f32 %v226_v31, 0.0  ;;  %v291_v41 = vmax.f32 %v227_v32, 0.0 }
   0xa   :  { %v933_v39 = vpack.c.bf16 %v285_v30, %v284_v29  ;;  %v820_v42 = vunpack.c.l.bf16 %v1093_v28  ;;  %v938_v44 = vpack.c.bf16 %v287_v35, %v286_v34  ;;  %v821_v46 = vunpack.c.h.bf16 %v1093_v28 }
   0xb   :  { %v943_v45 = vpack.c.bf16 %v289_v37, %v288_v36  ;;  %v824_v47 = vunpack.c.l.bf16 %v1094_v33  ;;  %v948_v48 = vpack.c.bf16 %v291_v41, %v290_v40  ;;  %v825_v50 = vunpack.c.h.bf16 %v1094_v33 }
   0xc   :  { %934 = vst [vmem:[%s1505_s3] sm:$0xff] %v933_v39   ;;  %v157_v49 = vmul.f32 %v820_v42, %v1178_v1  ;;  %v828_v51 = vunpack.c.l.bf16 %v1095_v38  ;;  %1121 = vst [vmem:[%s1505_s3 + $0x8] sm:$0xff] %v938_v44   ;;  %v158_v52 = vmul.f32 %v821_v46, %v1178_v1  ;;  %v829_v54 = vunpack.c.h.bf16 %v1095_v38  ;;  %v1101_v38 = vld [vmem:[%s1502_s0 + $0x60] sm:$0xff]  }
   0xd   :  { %1122 = vst [vmem:[%s1505_s3 + $0x10] sm:$0xff] %v943_v45   ;;  %v159_v53 = vmul.f32 %v824_v47, %v1178_v1  ;;  %v832_v55 = vunpack.c.l.bf16 %v1096_v43  ;;  %1123 = vst [vmem:[%s1505_s3 + $0x18] sm:$0xff] %v948_v48   ;;  %v160_v57 = vmul.f32 %v825_v50, %v1178_v1  ;;  %v833_v59 = vunpack.c.h.bf16 %v1096_v43 }
   0xe   :  { %v228_v56 = vadd.f32 %v1192_v7, %v157_v49  ;;  %v161_v58 = vmul.f32 %v828_v51, %v1178_v1  ;;  %v229_v60 = vadd.f32 %v1192_v7, %v158_v52  ;;  %v162_v62 = vmul.f32 %v829_v54, %v1178_v1  ;;  %v1102_v51 = vld [vmem:[%s1502_s0 + $0x68] sm:$0xff]  }
   0xf   :  { %v230_v61 = vadd.f32 %v1192_v7, %v159_v53  ;;  %v163_v63 = vmul.f32 %v832_v55, %v1178_v1  ;;  %v231_v3 = vadd.f32 %v1192_v7, %v160_v57  ;;  %v164_v5 = vmul.f32 %v833_v59, %v1178_v1 }
  0x10   :  { %v292_v2 = vmax.f32 %v228_v56, 0.0  ;;  %v232_v4 = vadd.f32 %v1192_v7, %v161_v58  ;;  %v293_v6 = vmax.f32 %v229_v60, 0.0  ;;  %v233_v9 = vadd.f32 %v1192_v7, %v162_v62  ;;  %v1103_v60 = vld [vmem:[%s1502_s0 + $0x70] sm:$0xff]  }
  0x11   :  { %v294_v8 = vmax.f32 %v230_v61, 0.0  ;;  %v234_v10 = vadd.f32 %v1192_v7, %v163_v63  ;;  %v295_v12 = vmax.f32 %v231_v3, 0.0  ;;  %v235_v14 = vadd.f32 %v1192_v7, %v164_v5 }
  0x12   :  { %v296_v13 = vmax.f32 %v232_v4, 0.0  ;;  %v836_v15 = vunpack.c.l.bf16 %v1097_v0  ;;  %v953_v17 = vpack.c.bf16 %v293_v6, %v292_v2  ;;  %v297_v18 = vmax.f32 %v233_v9, 0.0  ;;  %v1104_v2 = vld [vmem:[%s1502_s0 + $0x78] sm:$0xff]  }
  0x13   :  { %v298_v19 = vmax.f32 %v234_v10, 0.0  ;;  %v837_v20 = vunpack.c.h.bf16 %v1097_v0  ;;  %v958_v21 = vpack.c.bf16 %v295_v12, %v294_v8  ;;  %v299_v22 = vmax.f32 %v235_v14, 0.0  ;;  %v1105_v12 = vld [vmem:[%s1502_s0 + $0x80] sm:$0xff]  }
  0x14   :  { %v165_v23 = vmul.f32 %v836_v15, %v1178_v1  ;;  %v840_v24 = vunpack.c.l.bf16 %v1098_v11  ;;  %1124 = vst [vmem:[%s1505_s3 + $0x20] sm:$0xff] %v953_v17   ;;  %v963_v26 = vpack.c.bf16 %v297_v18, %v296_v13  ;;  %v841_v28 = vunpack.c.h.bf16 %v1098_v11 }
  0x15   :  { %v166_v27 = vmul.f32 %v837_v20, %v1178_v1  ;;  %v844_v29 = vunpack.c.l.bf16 %v1099_v16  ;;  %1125 = vst [vmem:[%s1505_s3 + $0x28] sm:$0xff] %v958_v21   ;;  %v968_v30 = vpack.c.bf16 %v299_v22, %v298_v19  ;;  %v845_v33 = vunpack.c.h.bf16 %v1099_v16 }
  0x16   :  { %v236_v31 = vadd.f32 %v1192_v7, %v165_v23  ;;  %v167_v32 = vmul.f32 %v840_v24, %v1178_v1  ;;  %1126 = vst [vmem:[%s1505_s3 + $0x30] sm:$0xff] %v963_v26   ;;  %v168_v35 = vmul.f32 %v841_v28, %v1178_v1  ;;  %v848_v37 = vunpack.c.l.bf16 %v1100_v25 }
  0x17   :  { %v237_v34 = vadd.f32 %v1192_v7, %v166_v27  ;;  %v169_v36 = vmul.f32 %v844_v29, %v1178_v1  ;;  %1127 = vst [vmem:[%s1505_s3 + $0x38] sm:$0xff] %v968_v30   ;;  %v170_v41 = vmul.f32 %v845_v33, %v1178_v1  ;;  %v849_v42 = vunpack.c.h.bf16 %v1100_v25  ;;  %v1106_v29 = vld [vmem:[%s1502_s0 + $0x88] sm:$0xff]  }
  0x18   :  { %v300_v39 = vmax.f32 %v236_v31, 0.0  ;;  %v238_v40 = vadd.f32 %v1192_v7, %v167_v32  ;;  %v239_v44 = vadd.f32 %v1192_v7, %v168_v35  ;;  %v171_v46 = vmul.f32 %v848_v37, %v1178_v1 }
  0x19   :  { %v301_v43 = vmax.f32 %v237_v34, 0.0  ;;  %v240_v45 = vadd.f32 %v1192_v7, %v169_v36  ;;  %v241_v48 = vadd.f32 %v1192_v7, %v170_v41  ;;  %v172_v49 = vmul.f32 %v849_v42, %v1178_v1  ;;  %v1107_v34 = vld [vmem:[%s1502_s0 + $0x90] sm:$0xff]  }
  0x1a   :  { %v302_v47 = vmax.f32 %v238_v40, 0.0  ;;  %v852_v50 = vunpack.c.l.bf16 %v1101_v38  ;;  %v303_v53 = vmax.f32 %v239_v44, 0.0  ;;  %v242_v55 = vadd.f32 %v1192_v7, %v171_v46 }
  0x1b   :  { %v973_v52 = vpack.c.bf16 %v301_v43, %v300_v39  ;;  %v304_v54 = vmax.f32 %v240_v45, 0.0  ;;  %v305_v56 = vmax.f32 %v241_v48, 0.0  ;;  %v243_v57 = vadd.f32 %v1192_v7, %v172_v49  ;;  %v1108_v43 = vld [vmem:[%s1502_s0 + $0x98] sm:$0xff]  }
  0x1c   :  { %v853_v58 = vunpack.c.h.bf16 %v1101_v38  ;;  %v173_v59 = vmul.f32 %v852_v50, %v1178_v1  ;;  %v978_v61 = vpack.c.bf16 %v303_v53, %v302_v47  ;;  %v306_v62 = vmax.f32 %v242_v55, 0.0 }
  0x1d   :  { %1128 = vst [vmem:[%s1505_s3 + $0x40] sm:$0xff] %v973_v52   ;;  %v856_v63 = vunpack.c.l.bf16 %v1102_v51  ;;  %v857_v0 = vunpack.c.h.bf16 %v1102_v51  ;;  %v983_v3 = vpack.c.bf16 %v305_v56, %v304_v54  ;;  %v307_v4 = vmax.f32 %v243_v57, 0.0  ;;  %v1109_v56 = vld [vmem:[%s1502_s0 + $0xa0] sm:$0xff]  }
  0x1e   :  { %v174_v5 = vmul.f32 %v853_v58, %v1178_v1  ;;  %v244_v6 = vadd.f32 %v1192_v7, %v173_v59  ;;  %1129 = vst [vmem:[%s1505_s3 + $0x48] sm:$0xff] %v978_v61   ;;  %v860_v10 = vunpack.c.l.bf16 %v1103_v60  ;;  %v861_v11 = vunpack.c.h.bf16 %v1103_v60 }
  0x1f   :  { %v175_v8 = vmul.f32 %v856_v63, %v1178_v1  ;;  %v176_v9 = vmul.f32 %v857_v0, %v1178_v1  ;;  %1130 = vst [vmem:[%s1505_s3 + $0x50] sm:$0xff] %v983_v3   ;;  %v988_v13 = vpack.c.bf16 %v307_v4, %v306_v62  ;;  %v864_v16 = vunpack.c.l.bf16 %v1104_v2 }
  0x20   :  { %v245_v14 = vadd.f32 %v1192_v7, %v174_v5  ;;  %v308_v15 = vmax.f32 %v244_v6, 0.0  ;;  %v177_v19 = vmul.f32 %v860_v10, %v1178_v1  ;;  %v178_v20 = vmul.f32 %v861_v11, %v1178_v1 }
  0x21   :  { %v246_v17 = vadd.f32 %v1192_v7, %v175_v8  ;;  %v247_v18 = vadd.f32 %v1192_v7, %v176_v9  ;;  %1131 = vst [vmem:[%s1505_s3 + $0x58] sm:$0xff] %v988_v13   ;;  %v865_v22 = vunpack.c.h.bf16 %v1104_v2  ;;  %v179_v23 = vmul.f32 %v864_v16, %v1178_v1  ;;  %v1110_v2 = vld [vmem:[%s1502_s0 + $0xa8] sm:$0xff]   ;;  %v1111_v16 = vld [vmem:[%s1502_s0 + $0xb0] sm:$0xff]  }
  0x22   :  { %v309_v21 = vmax.f32 %v245_v14, 0.0  ;;  %v868_v24 = vunpack.c.l.bf16 %v1105_v12  ;;  %v248_v27 = vadd.f32 %v1192_v7, %v177_v19  ;;  %v249_v28 = vadd.f32 %v1192_v7, %v178_v20 }
  0x23   :  { %v310_v25 = vmax.f32 %v246_v17, 0.0  ;;  %v311_v26 = vmax.f32 %v247_v18, 0.0  ;;  %v180_v31 = vmul.f32 %v865_v22, %v1178_v1  ;;  %v250_v32 = vadd.f32 %v1192_v7, %v179_v23 }
  0x24   :  { %v993_v30 = vpack.c.bf16 %v309_v21, %v308_v15  ;;  %v869_v33 = vunpack.c.h.bf16 %v1105_v12  ;;  %v312_v36 = vmax.f32 %v248_v27, 0.0  ;;  %v313_v37 = vmax.f32 %v249_v28, 0.0  ;;  %v1112_v21 = vld [vmem:[%s1502_s0 + $0xb8] sm:$0xff]  }
  0x25   :  { %v998_v35 = vpack.c.bf16 %v311_v26, %v310_v25  ;;  %v181_v38 = vmul.f32 %v868_v24, %v1178_v1  ;;  %v251_v39 = vadd.f32 %v1192_v7, %v180_v31  ;;  %v314_v40 = vmax.f32 %v250_v32, 0.0 }
  0x26   :  { %1132 = vst [vmem:[%s1505_s3 + $0x60] sm:$0xff] %v993_v30   ;;  %v182_v41 = vmul.f32 %v869_v33, %v1178_v1  ;;  %v872_v42 = vunpack.c.l.bf16 %v1106_v29  ;;  %v1003_v44 = vpack.c.bf16 %v313_v37, %v312_v36  ;;  %v873_v46 = vunpack.c.h.bf16 %v1106_v29 }
  0x27   :  { %1133 = vst [vmem:[%s1505_s3 + $0x68] sm:$0xff] %v998_v35   ;;  %v252_v45 = vadd.f32 %v1192_v7, %v181_v38  ;;  %v876_v47 = vunpack.c.l.bf16 %v1107_v34  ;;  %v315_v48 = vmax.f32 %v251_v39, 0.0  ;;  %v877_v51 = vunpack.c.h.bf16 %v1107_v34  ;;  %v1113_v34 = vld [vmem:[%s1502_s0 + $0xc0] sm:$0xff]  }
  0x28   :  { %v253_v49 = vadd.f32 %v1192_v7, %v182_v41  ;;  %v183_v50 = vmul.f32 %v872_v42, %v1178_v1  ;;  %1134 = vst [vmem:[%s1505_s3 + $0x70] sm:$0xff] %v1003_v44   ;;  %v184_v53 = vmul.f32 %v873_v46, %v1178_v1  ;;  %v880_v55 = vunpack.c.l.bf16 %v1108_v43 }
  0x29   :  { %v316_v52 = vmax.f32 %v252_v45, 0.0  ;;  %v185_v54 = vmul.f32 %v876_v47, %v1178_v1  ;;  %v1008_v57 = vpack.c.bf16 %v315_v48, %v314_v40  ;;  %v186_v60 = vmul.f32 %v877_v51, %v1178_v1  ;;  %v1114_v47 = vld [vmem:[%s1502_s0 + $0xc8] sm:$0xff]  }
  0x2a   :  { %v317_v58 = vmax.f32 %v253_v49, 0.0  ;;  %v254_v59 = vadd.f32 %v1192_v7, %v183_v50  ;;  %v255_v61 = vadd.f32 %v1192_v7, %v184_v53  ;;  %v881_v63 = vunpack.c.h.bf16 %v1108_v43 }
  0x2b   :  { %v256_v62 = vadd.f32 %v1192_v7, %v185_v54  ;;  %v187_v0 = vmul.f32 %v880_v55, %v1178_v1  ;;  %1135 = vst [vmem:[%s1505_s3 + $0x78] sm:$0xff] %v1008_v57   ;;  %v257_v5 = vadd.f32 %v1192_v7, %v186_v60  ;;  %v884_v6 = vunpack.c.l.bf16 %v1109_v56 }
  0x2c   :  { %v1013_v3 = vpack.c.bf16 %v317_v58, %v316_v52  ;;  %v318_v4 = vmax.f32 %v254_v59, 0.0  ;;  %v319_v8 = vmax.f32 %v255_v61, 0.0  ;;  %v188_v10 = vmul.f32 %v881_v63, %v1178_v1  ;;  %v1115_v52 = vld [vmem:[%s1502_s0 + $0xd0] sm:$0xff]   ;;  %v1116_v61 = vld [vmem:[%s1502_s0 + $0xd8] sm:$0xff]  }
  0x2d   :  { %v320_v9 = vmax.f32 %v256_v62, 0.0  ;;  %v258_v11 = vadd.f32 %v1192_v7, %v187_v0  ;;  %v321_v12 = vmax.f32 %v257_v5, 0.0  ;;  %v885_v13 = vunpack.c.h.bf16 %v1109_v56 }
  0x2e   :  { %1136 = vst [vmem:[%s1505_s3 + $0x80] sm:$0xff] %v1013_v3   ;;  %v189_v14 = vmul.f32 %v884_v6, %v1178_v1  ;;  %v888_v15 = vunpack.c.l.bf16 %v1110_v2  ;;  %v1018_v17 = vpack.c.bf16 %v319_v8, %v318_v4  ;;  %v259_v18 = vadd.f32 %v1192_v7, %v188_v10 }
  0x2f   :  { %v322_v19 = vmax.f32 %v258_v11, 0.0  ;;  %v889_v20 = vunpack.c.h.bf16 %v1110_v2  ;;  %v1023_v22 = vpack.c.bf16 %v321_v12, %v320_v9  ;;  %v190_v23 = vmul.f32 %v885_v13, %v1178_v1  ;;  %v1117_v12 = vld [vmem:[%s1502_s0 + $0xe0] sm:$0xff]  }
  0x30   :  { %v260_v24 = vadd.f32 %v1192_v7, %v189_v14  ;;  %v191_v25 = vmul.f32 %v888_v15, %v1178_v1  ;;  %1137 = vst [vmem:[%s1505_s3 + $0x88] sm:$0xff] %v1018_v17   ;;  %v323_v26 = vmax.f32 %v259_v18, 0.0  ;;  %v892_v28 = vunpack.c.l.bf16 %v1111_v16 }
  0x31   :  { %v192_v27 = vmul.f32 %v889_v20, %v1178_v1  ;;  %v893_v29 = vunpack.c.h.bf16 %v1111_v16  ;;  %1138 = vst [vmem:[%s1505_s3 + $0x90] sm:$0xff] %v1023_v22   ;;  %v261_v30 = vadd.f32 %v1192_v7, %v190_v23  ;;  %v896_v33 = vunpack.c.l.bf16 %v1112_v21 }
  0x32   :  { %v324_v31 = vmax.f32 %v260_v24, 0.0  ;;  %v262_v32 = vadd.f32 %v1192_v7, %v191_v25  ;;  %v1028_v35 = vpack.c.bf16 %v323_v26, %v322_v19  ;;  %v193_v37 = vmul.f32 %v892_v28, %v1178_v1 }
  0x33   :  { %v263_v36 = vadd.f32 %v1192_v7, %v192_v27  ;;  %v194_v38 = vmul.f32 %v893_v29, %v1178_v1  ;;  %v325_v39 = vmax.f32 %v261_v30, 0.0  ;;  %v897_v41 = vunpack.c.h.bf16 %v1112_v21  ;;  %v1118_v21 = vld [vmem:[%s1502_s0 + $0xe8] sm:$0xff]  }
  0x34   :  { %v326_v40 = vmax.f32 %v262_v32, 0.0  ;;  %v195_v42 = vmul.f32 %v896_v33, %v1178_v1  ;;  %1139 = vst [vmem:[%s1505_s3 + $0x98] sm:$0xff] %v1028_v35   ;;  %v264_v44 = vadd.f32 %v1192_v7, %v193_v37  ;;  %v900_v46 = vunpack.c.l.bf16 %v1113_v34 }
  0x35   :  { %v327_v43 = vmax.f32 %v263_v36, 0.0  ;;  %v265_v45 = vadd.f32 %v1192_v7, %v194_v38  ;;  %v1033_v48 = vpack.c.bf16 %v325_v39, %v324_v31  ;;  %v196_v49 = vmul.f32 %v897_v41, %v1178_v1  ;;  %v1120_v39 = vld [vmem:[%s1502_s0 + $0xf8] sm:$0xff]  }
  0x36   :  { %v266_v50 = vadd.f32 %v1192_v7, %v195_v42  ;;  %v901_v51 = vunpack.c.h.bf16 %v1113_v34  ;;  %v328_v54 = vmax.f32 %v264_v44, 0.0  ;;  %v197_v56 = vmul.f32 %v900_v46, %v1178_v1  ;;  %v1119_v34 = vld [vmem:[%s1502_s0 + $0xf0] sm:$0xff]  }
  0x37   :  { %v1038_v53 = vpack.c.bf16 %v327_v43, %v326_v40  ;;  %v329_v55 = vmax.f32 %v265_v45, 0.0  ;;  %1140 = vst [vmem:[%s1505_s3 + $0xa0] sm:$0xff] %v1033_v48   ;;  %v267_v57 = vadd.f32 %v1192_v7, %v196_v49  ;;  %v904_v60 = vunpack.c.l.bf16 %v1114_v47 }
  0x38   :  { %v330_v58 = vmax.f32 %v266_v50, 0.0  ;;  %v198_v59 = vmul.f32 %v901_v51, %v1178_v1  ;;  %v268_v63 = vadd.f32 %v1192_v7, %v197_v56  ;;  %v905_v0 = vunpack.c.h.bf16 %v1114_v47 }
  0x39   :  { %1141 = vst [vmem:[%s1505_s3 + $0xa8] sm:$0xff] %v1038_v53   ;;  %v1043_v62 = vpack.c.bf16 %v329_v55, %v328_v54  ;;  %v908_v2 = vunpack.c.l.bf16 %v1115_v52  ;;  %v331_v3 = vmax.f32 %v267_v57, 0.0  ;;  %v199_v5 = vmul.f32 %v904_v60, %v1178_v1 }
  0x3a   :  { %v269_v4 = vadd.f32 %v1192_v7, %v198_v59  ;;  %v909_v6 = vunpack.c.h.bf16 %v1115_v52  ;;  %v332_v8 = vmax.f32 %v268_v63, 0.0  ;;  %v200_v9 = vmul.f32 %v905_v0, %v1178_v1 }
  0x3b   :  { %1142 = vst [vmem:[%s1505_s3 + $0xb0] sm:$0xff] %v1043_v62   ;;  %v201_v10 = vmul.f32 %v908_v2, %v1178_v1  ;;  %v912_v11 = vunpack.c.l.bf16 %v1116_v61  ;;  %v1048_v13 = vpack.c.bf16 %v331_v3, %v330_v58  ;;  %v270_v15 = vadd.f32 %v1192_v7, %v199_v5 }
  0x3c   :  { %v333_v14 = vmax.f32 %v269_v4, 0.0  ;;  %v202_v16 = vmul.f32 %v909_v6, %v1178_v1  ;;  %v271_v17 = vadd.f32 %v1192_v7, %v200_v9  ;;  %v913_v19 = vunpack.c.h.bf16 %v1116_v61 }
  0x3d   :  { %v272_v18 = vadd.f32 %v1192_v7, %v201_v10  ;;  %v203_v20 = vmul.f32 %v912_v11, %v1178_v1  ;;  %1143 = vst [vmem:[%s1505_s3 + $0xb8] sm:$0xff] %v1048_v13   ;;  %v334_v23 = vmax.f32 %v270_v15, 0.0  ;;  %v916_v25 = vunpack.c.l.bf16 %v1117_v12 }
  0x3e   :  { %v1053_v22 = vpack.c.bf16 %v333_v14, %v332_v8  ;;  %v273_v24 = vadd.f32 %v1192_v7, %v202_v16  ;;  %v335_v26 = vmax.f32 %v271_v17, 0.0  ;;  %v204_v28 = vmul.f32 %v913_v19, %v1178_v1 }
  0x3f   :  { %v336_v27 = vmax.f32 %v272_v18, 0.0  ;;  %v274_v29 = vadd.f32 %v1192_v7, %v203_v20  ;;  %v917_v31 = vunpack.c.h.bf16 %v1117_v12  ;;  %v205_v32 = vmul.f32 %v916_v25, %v1178_v1 }
  0x40   :  { %1144 = vst [vmem:[%s1505_s3 + $0xc0] sm:$0xff] %v1053_v22   ;;  %v337_v30 = vmax.f32 %v273_v24, 0.0  ;;  %v920_v33 = vunpack.c.l.bf16 %v1118_v21  ;;  %v1058_v35 = vpack.c.bf16 %v335_v26, %v334_v23  ;;  %v275_v36 = vadd.f32 %v1192_v7, %v204_v28 }
  0x41   :  { %v338_v37 = vmax.f32 %v274_v29, 0.0  ;;  %v921_v38 = vunpack.c.h.bf16 %v1118_v21  ;;  %v206_v41 = vmul.f32 %v917_v31, %v1178_v1  ;;  %v276_v42 = vadd.f32 %v1192_v7, %v205_v32 }
  0x42   :  { %v1063_v40 = vpack.c.bf16 %v337_v30, %v336_v27  ;;  %v207_v43 = vmul.f32 %v920_v33, %v1178_v1  ;;  %1145 = vst [vmem:[%s1505_s3 + $0xc8] sm:$0xff] %v1058_v35   ;;  %v339_v44 = vmax.f32 %v275_v36, 0.0  ;;  %v924_v46 = vunpack.c.l.bf16 %v1119_v34 }
  0x43   :  { %v208_v45 = vmul.f32 %v921_v38, %v1178_v1  ;;  %v925_v47 = vunpack.c.h.bf16 %v1119_v34  ;;  %v277_v48 = vadd.f32 %v1192_v7, %v206_v41  ;;  %v340_v49 = vmax.f32 %v276_v42, 0.0 }
  0x44   :  { %1146 = vst [vmem:[%s1505_s3 + $0xd0] sm:$0xff] %v1063_v40   ;;  %v278_v50 = vadd.f32 %v1192_v7, %v207_v43  ;;  %v928_v51 = vunpack.c.l.bf16 %v1120_v39  ;;  %v1068_v52 = vpack.c.bf16 %v339_v44, %v338_v37  ;;  %v209_v54 = vmul.f32 %v924_v46, %v1178_v1 }
  0x45   :  { %v279_v53 = vadd.f32 %v1192_v7, %v208_v45  ;;  %v210_v55 = vmul.f32 %v925_v47, %v1178_v1  ;;  %v341_v56 = vmax.f32 %v277_v48, 0.0  ;;  %v929_v58 = vunpack.c.h.bf16 %v1120_v39 }
  0x46   :  { %v342_v57 = vmax.f32 %v278_v50, 0.0  ;;  %v211_v59 = vmul.f32 %v928_v51, %v1178_v1  ;;  %1147 = vst [vmem:[%s1505_s3 + $0xd8] sm:$0xff] %v1068_v52   ;;  %v280_v61 = vadd.f32 %v1192_v7, %v209_v54 }
  0x47   :  { %v343_v60 = vmax.f32 %v279_v53, 0.0  ;;  %v281_v62 = vadd.f32 %v1192_v7, %v210_v55  ;;  %v1073_v63 = vpack.c.bf16 %v341_v56, %v340_v49  ;;  %v212_v0 = vmul.f32 %v929_v58, %v1178_v1 }
  0x48   :  { %v282_v2 = vadd.f32 %v1192_v7, %v211_v59  ;;  %v344_v4 = vmax.f32 %v280_v61, 0.0 }
  0x49   :  { %v1078_v3 = vpack.c.bf16 %v343_v60, %v342_v57  ;;  %v345_v5 = vmax.f32 %v281_v62, 0.0  ;;  %1148 = vst [vmem:[%s1505_s3 + $0xe0] sm:$0xff] %v1073_v63   ;;  %v283_v6 = vadd.f32 %v1192_v7, %v212_v0 }
  0x4a   :  { %v346_v8 = vmax.f32 %v282_v2, 0.0 }
  0x4b   :  { %1149 = vst [vmem:[%s1505_s3 + $0xe8] sm:$0xff] %v1078_v3   ;;  %v1083_v9 = vpack.c.bf16 %v345_v5, %v344_v4  ;;  %v347_v10 = vmax.f32 %v283_v6, 0.0 }
  0x4d   :  { %1150 = vst [vmem:[%s1505_s3 + $0xf0] sm:$0xff] %v1083_v9   ;;  %v1088_v1 = vpack.c.bf16 %v347_v10, %v346_v8 }
  0x4f   :  { %1151 = vst [vmem:[%s1505_s3 + $0xf8] sm:$0xff] %v1088_v1  }

// kernel: generator_forward.15
= control target key start
LH: loop header
LB: loop body
LE: loop exit
PB: predicated region body
PF: predicated region fallthrough
CT: control target
= control target key end

     0   :  { %s1495_s12 = smov 0   ;;  %s1497_s13 = smov 0   ;;  %s1737_s0 = inlined_call_operand.vmem [shape: bf16[4,512,16], index: 0, kind: input, shape index: {}]   ;;  %s1738_s1 = inlined_call_operand.vmem [shape: bf16[4,16,128], index: 1, kind: input, shape index: {}]   ;;  %s1739_s2 = inlined_call_operand.vmem [shape: f32[1,128], index: 2, kind: input, shape index: {}]   ;;  %s1740_s3 = inlined_call_operand.vmem [shape: f32[4,512,128], index: 3, kind: output, shape index: {}]  }
   0x1   :  { %s1499_s14 = smov 0  }
   0x2 LB: > { %s25_s15 = sadd.s32 1, %s1469_s13  ;;  %p1087_p0 = scmp.ge.s32.totalorder %s1473_s14, 1  ;;  %s1473_s14 = sphi %s1499_s14, %s13_s14   ;;  %s1469_s13 = sphi %s1497_s13, %s1742_s13   ;;  %s1465_s12 = sphi %s1495_s12, %s1741_s12  }
   0x3   : > { %p27_p1 = scmp.ge.s32.totalorder %s25_s15, 4  ;;  %p168_p2 = scmp.lt.s32.totalorder %s1473_s14, 5 }
   0x5   : > { %s1744_s15 = smov (%p27_p1, %s25_s15), 0  ;;  %p169_p3 = pnand %p1087_p0, %p168_p2 }
   0x6   : > { %p206_p4 = scmp.lt.s32.totalorder (!%p169_p3), %s1465_s12, 3  ;;  %vm470_vm0 = vcmask (!%p169_p3), 130048   ;;  %v1592_v33 = vld [vmem:[%s1739_s2] ss:$0 sm:$0xff] (!%p169_p3) }
   0x7   : > { %172 = sbr.rel (%p169_p3) target bundleno = 314 (0x13a), region = 32 }
   0xe   : > { %s1746_s12 = smov (!%p206_p4, %s1465_s12), 3 }
   0xf   : > { %s1162_s16 = sshll.u32 %s1746_s12, 8  ;;  %s1163_s17 = sshll.u32 %s1746_s12, 3 }
  0x10   : > { %s1520_s20 = scalar_lea.vmem %s1737_s0, %s1162_s16  ;;  %s219_s23 = scalar_lea.vmem %s1738_s1, %s1163_s17 }
  0x11   : > { %v1290_v0 = vld [vmem:[%s219_s23] sm:$0xff]   ;;  %v1293_v3 = vld [vmem:[%s1520_s20 + $0x8] sm:$0xff]   ;;  %v1295_v5 = vld [vmem:[%s1520_s20 + $0x10] sm:$0xff]   ;;  %s1164_s26 = sshll.u32 %s1746_s12, 9 }
  0x12   : > { %v1291_v1 = vld [vmem:[%s1520_s20] sm:$0xff]   ;;  %1198 = vmatprep.subr.bf16.mxu0 %v1290_v0  ;;  %1264 = vmatprep.subr.bf16.mxu1 %v1290_v0  ;;  %v1294_v4 = vld [vmem:[%s1520_s20 + $0x88] sm:$0xff]   ;;  %v1296_v6 = vld [vmem:[%s1520_s20 + $0x90] sm:$0xff]   ;;  %s1610_s29 = scalar_lea.vmem %s1740_s3, %s1164_s26 }
  0x13   : > { %v1292_v2 = vld [vmem:[%s1520_s20 + $0x80] sm:$0xff]   ;;  %1199 = vmatpush3.bf16.msra.mxu0 %v1290_v0  ;;  %1265 = vmatpush3.bf16.msra.mxu1 %v1290_v0  ;;  %v1297_v7 = vld [vmem:[%s1520_s20 + $0x18] sm:$0xff]   ;;  %v1301_v11 = vld [vmem:[%s1520_s20 + $0x28] sm:$0xff]  }
  0x14   : > { %1200 = vmatprep.mubr.msk.bf16.mxu0 %vm470_vm0, %v1291_v1  ;;  %1232 = vmatprep.mubr.msk.bf16.mxu1 %vm470_vm0, %v1292_v2  ;;  %v1298_v8 = vld [vmem:[%s1520_s20 + $0x98] sm:$0xff]   ;;  %v1299_v9 = vld [vmem:[%s1520_s20 + $0x20] sm:$0xff]   ;;  %v1302_v12 = vld [vmem:[%s1520_s20 + $0xa8] sm:$0xff]  }
  0x15   : > { %v1300_v10 = vld [vmem:[%s1520_s20 + $0xa0] sm:$0xff]   ;;  %v1303_v13 = vld [vmem:[%s1520_s20 + $0x30] sm:$0xff]   ;;  %v1305_v15 = vld [vmem:[%s1520_s20 + $0x38] sm:$0xff]  }
  0x16   : > { %1201 = vmatmul.mubr.msk.bf16.vlgmr.msra.gmra.mrb[0].mxu0 %vm470_vm0, %v1293_v3  ;;  %1233 = vmatmul.mubr.msk.bf16.vlgmr.msra.gmra.mrb[0].mxu1 %vm470_vm0, %v1294_v4  ;;  %v1304_v14 = vld [vmem:[%s1520_s20 + $0xb0] sm:$0xff]   ;;  %v1306_v16 = vld [vmem:[%s1520_s20 + $0xb8] sm:$0xff]   ;;  %v1307_v17 = vld [vmem:[%s1520_s20 + $0x40] sm:$0xff]  }
  0x17   : > { %1204 = vmatprep.mubr.msk.bf16.mxu0 %vm470_vm0, %v1295_v5  ;;  %1236 = vmatprep.mubr.msk.bf16.mxu1 %vm470_vm0, %v1296_v6  ;;  %v1308_v18 = vld [vmem:[%s1520_s20 + $0xc0] sm:$0xff]   ;;  %v1309_v19 = vld [vmem:[%s1520_s20 + $0x48] sm:$0xff]   ;;  %v1311_v21 = vld [vmem:[%s1520_s20 + $0x50] sm:$0xff]  }
  0x18   : > { %v1310_v20 = vld [vmem:[%s1520_s20 + $0xc8] sm:$0xff]   ;;  %v1312_v22 = vld [vmem:[%s1520_s20 + $0xd0] sm:$0xff]   ;;  %v1313_v23 = vld [vmem:[%s1520_s20 + $0x58] sm:$0xff]  }
  0x19   : > { %v1314_v24 = vld [vmem:[%s1520_s20 + $0xd8] sm:$0xff]   ;;  %v1315_v25 = vld [vmem:[%s1520_s20 + $0x60] sm:$0xff]   ;;  %v1317_v27 = vld [vmem:[%s1520_s20 + $0x68] sm:$0xff]  }
  0x1a   : > { %v1316_v26 = vld [vmem:[%s1520_s20 + $0xe0] sm:$0xff]   ;;  %v1318_v28 = vld [vmem:[%s1520_s20 + $0xe8] sm:$0xff]   ;;  %v1319_v29 = vld [vmem:[%s1520_s20 + $0x70] sm:$0xff]  }
  0x1b   : > { %v1320_v30 = vld [vmem:[%s1520_s20 + $0xf0] sm:$0xff]   ;;  %v1321_v31 = vld [vmem:[%s1520_s20 + $0x78] sm:$0xff]  }
  0x1c   : > { %v1322_v32 = vld [vmem:[%s1520_s20 + $0xf8] sm:$0xff]  }
  0x1e   : > { %1205 = vmatmul.mubr.msk.bf16.gmra.mrb[4].mxu0 %vm470_vm0, %v1297_v7  ;;  %1237 = vmatmul.mubr.msk.bf16.gmra.mrb[4].mxu1 %vm470_vm0, %v1298_v8 }
  0x1f   : > { %1208 = vmatprep.mubr.msk.bf16.mxu0 %vm470_vm0, %v1299_v9  ;;  %1240 = vmatprep.mubr.msk.bf16.mxu1 %vm470_vm0, %v1300_v10 }
  0x26   : > { %1209 = vmatmul.mubr.msk.bf16.gmra.mrb[8].mxu0 %vm470_vm0, %v1301_v11  ;;  %1241 = vmatmul.mubr.msk.bf16.gmra.mrb[8].mxu1 %vm470_vm0, %v1302_v12 }
  0x27   : > { %1212 = vmatprep.mubr.msk.bf16.mxu0 %vm470_vm0, %v1303_v13  ;;  %1244 = vmatprep.mubr.msk.bf16.mxu1 %vm470_vm0, %v1304_v14 }
  0x2e   : > { %1213 = vmatmul.mubr.msk.bf16.gmra.mrb[12].mxu0 %vm470_vm0, %v1305_v15  ;;  %1245 = vmatmul.mubr.msk.bf16.gmra.mrb[12].mxu1 %vm470_vm0, %v1306_v16 }
  0x2f   : > { %1216 = vmatprep.mubr.msk.bf16.mxu0 %vm470_vm0, %v1307_v17  ;;  %1248 = vmatprep.mubr.msk.bf16.mxu1 %vm470_vm0, %v1308_v18 }
  0x36   : > { %1217 = vmatmul.mubr.msk.bf16.gmra.mrb[16].mxu0 %vm470_vm0, %v1309_v19  ;;  %1249 = vmatmul.mubr.msk.bf16.gmra.mrb[16].mxu1 %vm470_vm0, %v1310_v20 }
  0x37   : > { %1220 = vmatprep.mubr.msk.bf16.mxu0 %vm470_vm0, %v1311_v21  ;;  %1252 = vmatprep.mubr.msk.bf16.mxu1 %vm470_vm0, %v1312_v22 }
  0x3e   : > { %1221 = vmatmul.mubr.msk.bf16.gmra.mrb[20].mxu0 %vm470_vm0, %v1313_v23  ;;  %1253 = vmatmul.mubr.msk.bf16.gmra.mrb[20].mxu1 %vm470_vm0, %v1314_v24 }
  0x3f   : > { %1224 = vmatprep.mubr.msk.bf16.mxu0 %vm470_vm0, %v1315_v25  ;;  %1256 = vmatprep.mubr.msk.bf16.mxu1 %vm470_vm0, %v1316_v26 }
  0x46   : > { %1225 = vmatmul.mubr.msk.bf16.gmra.mrb[24].mxu0 %vm470_vm0, %v1317_v27  ;;  %1257 = vmatmul.mubr.msk.bf16.gmra.mrb[24].mxu1 %vm470_vm0, %v1318_v28 }
  0x47   : > { %1228 = vmatprep.mubr.msk.bf16.mxu0 %vm470_vm0, %v1319_v29  ;;  %1260 = vmatprep.mubr.msk.bf16.mxu1 %vm470_vm0, %v1320_v30 }
  0x4e   : > { %1229 = vmatmul.mubr.msk.bf16.gmra.mrb[28].mxu0 %vm470_vm0, %v1321_v31  ;;  %1261 = vmatmul.mubr.msk.bf16.gmra.mrb[28].mxu1 %vm470_vm0, %v1322_v32 }
  0xe9   : > { %v1202_v34 = vpop.f32.mrb[0].mxu0  ;;  %v1234_v35 = vpop.f32.mrb[0].mxu1 }
  0xea   : > { %v610_v36 = vadd.f32 %v1202_v34, %v1592_v33  ;;  %v738_v37 = vadd.f32 %v1234_v35, %v1592_v33  ;;  %v601_v38 = vpop.f32.mrb[1].mxu0  ;;  %v729_v39 = vpop.f32.mrb[1].mxu1 }
  0xeb   : > { %v602_v40 = vadd.f32 %v1592_v33, %v601_v38  ;;  %v730_v41 = vadd.f32 %v1592_v33, %v729_v39  ;;  %v1203_v42 = vpop.f32.mrb[2].mxu0  ;;  %v1235_v43 = vpop.f32.mrb[2].mxu1 }
  0xec   : > { %1323 = vtanh.f32 %v610_v36  ;;  %v613_v44 = vadd.f32 %v1203_v42, %v1592_v33  ;;  %v604_v45 = vpop.f32.mrb[3].mxu0  ;;  %v732_v46 = vpop.f32.mrb[3].mxu1  ;;  %v741_v47 = vadd.f32 %v1235_v43, %v1592_v33 }
  0xed   : > { %1325 = vtanh.f32 %v738_v37  ;;  %v605_v48 = vadd.f32 %v1592_v33, %v604_v45  ;;  %v733_v49 = vadd.f32 %v1592_v33, %v732_v46 }
  0xee   : > { %1327 = vtanh.f32 %v602_v40 }
  0xef   : > { %1329 = vtanh.f32 %v730_v41 }
  0xf0   : > { %1331 = vtanh.f32 %v613_v44 }
  0xf1   : > { %1333 = vtanh.f32 %v741_v47  ;;  %v1206_v50 = vpop.f32.mrb[4].mxu0  ;;  %v1238_v51 = vpop.f32.mrb[4].mxu1 }
  0xf2   : > { %1335 = vtanh.f32 %v605_v48  ;;  %v626_v52 = vadd.f32 %v1206_v50, %v1592_v33  ;;  %v754_v53 = vadd.f32 %v1238_v51, %v1592_v33  ;;  %v617_v54 = vpop.f32.mrb[5].mxu0  ;;  %v745_v55 = vpop.f32.mrb[5].mxu1 }
  0xf3   : > { %1337 = vtanh.f32 %v733_v49  ;;  %v618_v56 = vadd.f32 %v1592_v33, %v617_v54  ;;  %v746_v57 = vadd.f32 %v1592_v33, %v745_v55  ;;  %v1207_v58 = vpop.f32.mrb[6].mxu0  ;;  %v1239_v59 = vpop.f32.mrb[6].mxu1 }
  0xf4   : > { %1339 = vtanh.f32 %v626_v52  ;;  %v629_v60 = vadd.f32 %v1207_v58, %v1592_v33  ;;  %v620_v61 = vpop.f32.mrb[7].mxu0  ;;  %v748_v62 = vpop.f32.mrb[7].mxu1  ;;  %v757_v63 = vadd.f32 %v1239_v59, %v1592_v33 }
  0xf5   : > { %1341 = vtanh.f32 %v754_v53  ;;  %v621_v1 = vadd.f32 %v1592_v33, %v620_v61  ;;  %v749_v3 = vadd.f32 %v1592_v33, %v748_v62 }
  0xf6   : > { %v1324_v0 = vpop.eup %1323  ;;  %1343 = vtanh.f32 %v618_v56 }
  0xf7   : > { %v1326_v2 = vpop.eup %1325  ;;  %922 = vst [vmem:[%s1610_s29 + $0x10] sm:$0xff] %v1324_v0  ;;  %1345 = vtanh.f32 %v746_v57 }
  0xf8   : > { %v1328_v4 = vpop.eup %1327  ;;  %954 = vst [vmem:[%s1610_s29 + $0x110] sm:$0xff] %v1326_v2  ;;  %1347 = vtanh.f32 %v629_v60 }
  0xf9   : > { %v1330_v5 = vpop.eup %1329  ;;  %920 = vst [vmem:[%s1610_s29] sm:$0xff] %v1328_v4  ;;  %1349 = vtanh.f32 %v757_v63  ;;  %v1210_v6 = vpop.f32.mrb[8].mxu0 }
  0xfa   : > { %v1242_v7 = vpop.f32.mrb[8].mxu1  ;;  %v1332_v8 = vpop.eup %1331  ;;  %952 = vst [vmem:[%s1610_s29 + $0x100] sm:$0xff] %v1330_v5  ;;  %1351 = vtanh.f32 %v621_v1  ;;  %v642_v9 = vadd.f32 %v1210_v6, %v1592_v33 }
  0xfb   : > { %v770_v10 = vadd.f32 %v1242_v7, %v1592_v33  ;;  %v633_v11 = vpop.f32.mrb[9].mxu0  ;;  %v761_v12 = vpop.f32.mrb[9].mxu1  ;;  %923 = vst [vmem:[%s1610_s29 + $0x18] sm:$0xff] %v1332_v8  ;;  %1353 = vtanh.f32 %v749_v3 }
  0xfc   : > { %v1334_v13 = vpop.eup %1333  ;;  %v634_v14 = vadd.f32 %v1592_v33, %v633_v11  ;;  %v762_v15 = vadd.f32 %v1592_v33, %v761_v12  ;;  %v1211_v16 = vpop.f32.mrb[10].mxu0  ;;  %1355 = vtanh.f32 %v642_v9 }
  0xfd   : > { %v1243_v17 = vpop.f32.mrb[10].mxu1  ;;  %v1336_v18 = vpop.eup %1335  ;;  %955 = vst [vmem:[%s1610_s29 + $0x118] sm:$0xff] %v1334_v13  ;;  %v645_v19 = vadd.f32 %v1211_v16, %v1592_v33  ;;  %1357 = vtanh.f32 %v770_v10 }
  0xfe   : > { %v636_v20 = vpop.f32.mrb[11].mxu0  ;;  %v764_v21 = vpop.f32.mrb[11].mxu1  ;;  %921 = vst [vmem:[%s1610_s29 + $0x8] sm:$0xff] %v1336_v18  ;;  %v773_v23 = vadd.f32 %v1243_v17, %v1592_v33  ;;  %1359 = vtanh.f32 %v634_v14 }
  0xff   : > { %v1338_v22 = vpop.eup %1337  ;;  %v637_v25 = vadd.f32 %v1592_v33, %v636_v20  ;;  %1361 = vtanh.f32 %v762_v15  ;;  %v765_v27 = vadd.f32 %v1592_v33, %v764_v21 }
 0x100   : > { %v1340_v24 = vpop.eup %1339  ;;  %953 = vst [vmem:[%s1610_s29 + $0x108] sm:$0xff] %v1338_v22  ;;  %1363 = vtanh.f32 %v645_v19 }
 0x101   : > { %v1342_v26 = vpop.eup %1341  ;;  %926 = vst [vmem:[%s1610_s29 + $0x30] sm:$0xff] %v1340_v24  ;;  %1365 = vtanh.f32 %v773_v23  ;;  %v1214_v30 = vpop.f32.mrb[12].mxu0 }
 0x102   : > { %v1344_v28 = vpop.eup %1343  ;;  %958 = vst [vmem:[%s1610_s29 + $0x130] sm:$0xff] %v1342_v26  ;;  %v1246_v31 = vpop.f32.mrb[12].mxu1  ;;  %1367 = vtanh.f32 %v637_v25  ;;  %v658_v34 = vadd.f32 %v1214_v30, %v1592_v33 }
 0x103   : > { %v1346_v29 = vpop.eup %1345  ;;  %924 = vst [vmem:[%s1610_s29 + $0x20] sm:$0xff] %v1344_v28  ;;  %v786_v35 = vadd.f32 %v1246_v31, %v1592_v33  ;;  %v649_v36 = vpop.f32.mrb[13].mxu0  ;;  %1369 = vtanh.f32 %v765_v27 }
 0x104   : > { %v1348_v32 = vpop.eup %1347  ;;  %956 = vst [vmem:[%s1610_s29 + $0x120] sm:$0xff] %v1346_v29  ;;  %v777_v37 = vpop.f32.mrb[13].mxu1  ;;  %v650_v39 = vadd.f32 %v1592_v33, %v649_v36  ;;  %1371 = vtanh.f32 %v658_v34 }
 0x105   : > { %v1350_v38 = vpop.eup %1349  ;;  %927 = vst [vmem:[%s1610_s29 + $0x38] sm:$0xff] %v1348_v32  ;;  %v778_v40 = vadd.f32 %v1592_v33, %v777_v37  ;;  %v1215_v41 = vpop.f32.mrb[14].mxu0  ;;  %1373 = vtanh.f32 %v786_v35 }
 0x106   : > { %v1247_v42 = vpop.f32.mrb[14].mxu1  ;;  %v1352_v43 = vpop.eup %1351  ;;  %959 = vst [vmem:[%s1610_s29 + $0x138] sm:$0xff] %v1350_v38  ;;  %v661_v44 = vadd.f32 %v1215_v41, %v1592_v33  ;;  %1375 = vtanh.f32 %v650_v39 }
 0x107   : > { %v652_v45 = vpop.f32.mrb[15].mxu0  ;;  %v780_v46 = vpop.f32.mrb[15].mxu1  ;;  %925 = vst [vmem:[%s1610_s29 + $0x28] sm:$0xff] %v1352_v43  ;;  %v789_v48 = vadd.f32 %v1247_v42, %v1592_v33  ;;  %1377 = vtanh.f32 %v778_v40 }
 0x108   : > { %v1354_v47 = vpop.eup %1353  ;;  %v653_v50 = vadd.f32 %v1592_v33, %v652_v45  ;;  %v781_v52 = vadd.f32 %v1592_v33, %v780_v46  ;;  %1379 = vtanh.f32 %v661_v44 }
 0x109   : > { %v1356_v49 = vpop.eup %1355  ;;  %957 = vst [vmem:[%s1610_s29 + $0x128] sm:$0xff] %v1354_v47  ;;  %1381 = vtanh.f32 %v789_v48  ;;  %v1218_v55 = vpop.f32.mrb[16].mxu0 }
 0x10a   : > { %v1358_v51 = vpop.eup %1357  ;;  %930 = vst [vmem:[%s1610_s29 + $0x50] sm:$0xff] %v1356_v49  ;;  %v1250_v56 = vpop.f32.mrb[16].mxu1  ;;  %1383 = vtanh.f32 %v653_v50  ;;  %v674_v58 = vadd.f32 %v1218_v55, %v1592_v33 }
 0x10b   : > { %v1360_v53 = vpop.eup %1359  ;;  %962 = vst [vmem:[%s1610_s29 + $0x150] sm:$0xff] %v1358_v51  ;;  %v802_v59 = vadd.f32 %v1250_v56, %v1592_v33  ;;  %v665_v60 = vpop.f32.mrb[17].mxu0  ;;  %1385 = vtanh.f32 %v781_v52 }
 0x10c   : > { %v1362_v54 = vpop.eup %1361  ;;  %928 = vst [vmem:[%s1610_s29 + $0x40] sm:$0xff] %v1360_v53  ;;  %v793_v61 = vpop.f32.mrb[17].mxu1  ;;  %v666_v63 = vadd.f32 %v1592_v33, %v665_v60  ;;  %1387 = vtanh.f32 %v674_v58 }
 0x10d   : > { %v1364_v57 = vpop.eup %1363  ;;  %960 = vst [vmem:[%s1610_s29 + $0x140] sm:$0xff] %v1362_v54  ;;  %v794_v0 = vadd.f32 %v1592_v33, %v793_v61  ;;  %v1219_v1 = vpop.f32.mrb[18].mxu0  ;;  %1389 = vtanh.f32 %v802_v59 }
 0x10e   : > { %v1366_v62 = vpop.eup %1365  ;;  %931 = vst [vmem:[%s1610_s29 + $0x58] sm:$0xff] %v1364_v57  ;;  %v1251_v2 = vpop.f32.mrb[18].mxu1  ;;  %v677_v4 = vadd.f32 %v1219_v1, %v1592_v33  ;;  %1391 = vtanh.f32 %v666_v63 }
 0x10f   : > { %v1368_v3 = vpop.eup %1367  ;;  %963 = vst [vmem:[%s1610_s29 + $0x158] sm:$0xff] %v1366_v62  ;;  %v668_v5 = vpop.f32.mrb[19].mxu0  ;;  %v805_v8 = vadd.f32 %v1251_v2, %v1592_v33  ;;  %1393 = vtanh.f32 %v794_v0 }
 0x110   : > { %v796_v6 = vpop.f32.mrb[19].mxu1  ;;  %v1370_v7 = vpop.eup %1369  ;;  %929 = vst [vmem:[%s1610_s29 + $0x48] sm:$0xff] %v1368_v3  ;;  %v669_v10 = vadd.f32 %v1592_v33, %v668_v5  ;;  %1395 = vtanh.f32 %v677_v4 }
 0x111   : > { %v1372_v9 = vpop.eup %1371  ;;  %961 = vst [vmem:[%s1610_s29 + $0x148] sm:$0xff] %v1370_v7  ;;  %v797_v12 = vadd.f32 %v1592_v33, %v796_v6  ;;  %1397 = vtanh.f32 %v805_v8  ;;  %v1222_v15 = vpop.f32.mrb[20].mxu0 }
 0x112   : > { %v1374_v11 = vpop.eup %1373  ;;  %934 = vst [vmem:[%s1610_s29 + $0x70] sm:$0xff] %v1372_v9  ;;  %v1254_v16 = vpop.f32.mrb[20].mxu1  ;;  %1399 = vtanh.f32 %v669_v10  ;;  %v690_v18 = vadd.f32 %v1222_v15, %v1592_v33 }
 0x113   : > { %v1376_v13 = vpop.eup %1375  ;;  %966 = vst [vmem:[%s1610_s29 + $0x170] sm:$0xff] %v1374_v11  ;;  %v818_v19 = vadd.f32 %v1254_v16, %v1592_v33  ;;  %v681_v20 = vpop.f32.mrb[21].mxu0  ;;  %1401 = vtanh.f32 %v797_v12 }
 0x114   : > { %v1378_v14 = vpop.eup %1377  ;;  %932 = vst [vmem:[%s1610_s29 + $0x60] sm:$0xff] %v1376_v13  ;;  %v809_v21 = vpop.f32.mrb[21].mxu1  ;;  %v682_v23 = vadd.f32 %v1592_v33, %v681_v20  ;;  %1403 = vtanh.f32 %v690_v18 }
 0x115   : > { %v1380_v17 = vpop.eup %1379  ;;  %964 = vst [vmem:[%s1610_s29 + $0x160] sm:$0xff] %v1378_v14  ;;  %v810_v24 = vadd.f32 %v1592_v33, %v809_v21  ;;  %v1223_v25 = vpop.f32.mrb[22].mxu0  ;;  %1405 = vtanh.f32 %v818_v19 }
 0x116   : > { %v1382_v22 = vpop.eup %1381  ;;  %935 = vst [vmem:[%s1610_s29 + $0x78] sm:$0xff] %v1380_v17  ;;  %v1255_v26 = vpop.f32.mrb[22].mxu1  ;;  %v693_v28 = vadd.f32 %v1223_v25, %v1592_v33  ;;  %1407 = vtanh.f32 %v682_v23 }
 0x117   : > { %v1384_v27 = vpop.eup %1383  ;;  %967 = vst [vmem:[%s1610_s29 + $0x178] sm:$0xff] %v1382_v22  ;;  %v684_v29 = vpop.f32.mrb[23].mxu0  ;;  %v821_v32 = vadd.f32 %v1255_v26, %v1592_v33  ;;  %1409 = vtanh.f32 %v810_v24 }
 0x118   : > { %v812_v30 = vpop.f32.mrb[23].mxu1  ;;  %v1386_v31 = vpop.eup %1385  ;;  %933 = vst [vmem:[%s1610_s29 + $0x68] sm:$0xff] %v1384_v27  ;;  %v685_v35 = vadd.f32 %v1592_v33, %v684_v29  ;;  %1411 = vtanh.f32 %v693_v28 }
 0x119   : > { %v1388_v34 = vpop.eup %1387  ;;  %965 = vst [vmem:[%s1610_s29 + $0x168] sm:$0xff] %v1386_v31  ;;  %v813_v37 = vadd.f32 %v1592_v33, %v812_v30  ;;  %1413 = vtanh.f32 %v821_v32  ;;  %v1226_v40 = vpop.f32.mrb[24].mxu0 }
 0x11a   : > { %v1390_v36 = vpop.eup %1389  ;;  %938 = vst [vmem:[%s1610_s29 + $0x90] sm:$0xff] %v1388_v34  ;;  %v1258_v41 = vpop.f32.mrb[24].mxu1  ;;  %1415 = vtanh.f32 %v685_v35  ;;  %v706_v43 = vadd.f32 %v1226_v40, %v1592_v33 }
 0x11b   : > { %v1392_v38 = vpop.eup %1391  ;;  %970 = vst [vmem:[%s1610_s29 + $0x190] sm:$0xff] %v1390_v36  ;;  %v834_v44 = vadd.f32 %v1258_v41, %v1592_v33  ;;  %v697_v45 = vpop.f32.mrb[25].mxu0  ;;  %1417 = vtanh.f32 %v813_v37 }
 0x11c   : > { %v1394_v39 = vpop.eup %1393  ;;  %936 = vst [vmem:[%s1610_s29 + $0x80] sm:$0xff] %v1392_v38  ;;  %v825_v46 = vpop.f32.mrb[25].mxu1  ;;  %v698_v48 = vadd.f32 %v1592_v33, %v697_v45  ;;  %1419 = vtanh.f32 %v706_v43 }
 0x11d   : > { %v1396_v42 = vpop.eup %1395  ;;  %968 = vst [vmem:[%s1610_s29 + $0x180] sm:$0xff] %v1394_v39  ;;  %v826_v49 = vadd.f32 %v1592_v33, %v825_v46  ;;  %v1227_v50 = vpop.f32.mrb[26].mxu0  ;;  %1421 = vtanh.f32 %v834_v44 }
 0x11e   : > { %v1398_v47 = vpop.eup %1397  ;;  %939 = vst [vmem:[%s1610_s29 + $0x98] sm:$0xff] %v1396_v42  ;;  %v1259_v51 = vpop.f32.mrb[26].mxu1  ;;  %v709_v53 = vadd.f32 %v1227_v50, %v1592_v33  ;;  %1423 = vtanh.f32 %v698_v48 }
 0x11f   : > { %v1400_v52 = vpop.eup %1399  ;;  %971 = vst [vmem:[%s1610_s29 + $0x198] sm:$0xff] %v1398_v47  ;;  %v700_v54 = vpop.f32.mrb[27].mxu0  ;;  %v837_v57 = vadd.f32 %v1259_v51, %v1592_v33  ;;  %1425 = vtanh.f32 %v826_v49 }
 0x120   : > { %v828_v55 = vpop.f32.mrb[27].mxu1  ;;  %v1402_v56 = vpop.eup %1401  ;;  %937 = vst [vmem:[%s1610_s29 + $0x88] sm:$0xff] %v1400_v52  ;;  %v701_v59 = vadd.f32 %v1592_v33, %v700_v54  ;;  %1427 = vtanh.f32 %v709_v53 }
 0x121   : > { %v1404_v58 = vpop.eup %1403  ;;  %969 = vst [vmem:[%s1610_s29 + $0x188] sm:$0xff] %v1402_v56  ;;  %v829_v61 = vadd.f32 %v1592_v33, %v828_v55  ;;  %1429 = vtanh.f32 %v837_v57  ;;  %v1230_v0 = vpop.f32.mrb[28].mxu0 }
 0x122   : > { %v1406_v60 = vpop.eup %1405  ;;  %942 = vst [vmem:[%s1610_s29 + $0xb0] sm:$0xff] %v1404_v58  ;;  %v1262_v1 = vpop.f32.mrb[28].mxu1  ;;  %1431 = vtanh.f32 %v701_v59  ;;  %v722_v3 = vadd.f32 %v1230_v0, %v1592_v33 }
 0x123   : > { %v1408_v62 = vpop.eup %1407  ;;  %974 = vst [vmem:[%s1610_s29 + $0x1b0] sm:$0xff] %v1406_v60  ;;  %v850_v4 = vadd.f32 %v1262_v1, %v1592_v33  ;;  %v713_v5 = vpop.f32.mrb[29].mxu0  ;;  %1433 = vtanh.f32 %v829_v61 }
 0x124   : > { %v1410_v63 = vpop.eup %1409  ;;  %940 = vst [vmem:[%s1610_s29 + $0xa0] sm:$0xff] %v1408_v62  ;;  %v841_v6 = vpop.f32.mrb[29].mxu1  ;;  %v714_v8 = vadd.f32 %v1592_v33, %v713_v5  ;;  %1435 = vtanh.f32 %v722_v3 }
 0x125   : > { %v1412_v2 = vpop.eup %1411  ;;  %972 = vst [vmem:[%s1610_s29 + $0x1a0] sm:$0xff] %v1410_v63  ;;  %v842_v9 = vadd.f32 %v1592_v33, %v841_v6  ;;  %v1231_v10 = vpop.f32.mrb[30].mxu0  ;;  %1437 = vtanh.f32 %v850_v4 }
 0x126   : > { %v1414_v7 = vpop.eup %1413  ;;  %943 = vst [vmem:[%s1610_s29 + $0xb8] sm:$0xff] %v1412_v2  ;;  %v1263_v11 = vpop.f32.mrb[30].mxu1  ;;  %v725_v13 = vadd.f32 %v1231_v10, %v1592_v33  ;;  %1439 = vtanh.f32 %v714_v8 }
 0x127   : > { %v1416_v12 = vpop.eup %1415  ;;  %975 = vst [vmem:[%s1610_s29 + $0x1b8] sm:$0xff] %v1414_v7  ;;  %v716_v14 = vpop.f32.mrb[31].mxu0  ;;  %v853_v17 = vadd.f32 %v1263_v11, %v1592_v33  ;;  %1441 = vtanh.f32 %v842_v9 }
 0x128   : > { %v844_v15 = vpop.f32.mrb[31].mxu1  ;;  %v1418_v16 = vpop.eup %1417  ;;  %941 = vst [vmem:[%s1610_s29 + $0xa8] sm:$0xff] %v1416_v12  ;;  %v717_v19 = vadd.f32 %v1592_v33, %v716_v14  ;;  %1443 = vtanh.f32 %v725_v13 }
 0x129   : > { %v1420_v18 = vpop.eup %1419  ;;  %973 = vst [vmem:[%s1610_s29 + $0x1a8] sm:$0xff] %v1418_v16  ;;  %v845_v21 = vadd.f32 %v1592_v33, %v844_v15  ;;  %1445 = vtanh.f32 %v853_v17 }
 0x12a   : > { %v1422_v20 = vpop.eup %1421  ;;  %946 = vst [vmem:[%s1610_s29 + $0xd0] sm:$0xff] %v1420_v18  ;;  %1447 = vtanh.f32 %v717_v19 }
 0x12b   : > { %v1424_v22 = vpop.eup %1423  ;;  %978 = vst [vmem:[%s1610_s29 + $0x1d0] sm:$0xff] %v1422_v20  ;;  %1449 = vtanh.f32 %v845_v21 }
 0x12c   : > { %v1426_v23 = vpop.eup %1425  ;;  %944 = vst [vmem:[%s1610_s29 + $0xc0] sm:$0xff] %v1424_v22 }
 0x12d   : > { %v1428_v24 = vpop.eup %1427  ;;  %976 = vst [vmem:[%s1610_s29 + $0x1c0] sm:$0xff] %v1426_v23 }
 0x12e   : > { %v1430_v25 = vpop.eup %1429  ;;  %947 = vst [vmem:[%s1610_s29 + $0xd8] sm:$0xff] %v1428_v24 }
 0x12f   : > { %v1432_v33 = vpop.eup %1431  ;;  %979 = vst [vmem:[%s1610_s29 + $0x1d8] sm:$0xff] %v1430_v25 }
 0x130   : > { %v1434_v26 = vpop.eup %1433  ;;  %945 = vst [vmem:[%s1610_s29 + $0xc8] sm:$0xff] %v1432_v33 }
 0x131   : > { %v1436_v27 = vpop.eup %1435  ;;  %977 = vst [vmem:[%s1610_s29 + $0x1c8] sm:$0xff] %v1434_v26 }
 0x132   : > { %v1438_v28 = vpop.eup %1437  ;;  %950 = vst [vmem:[%s1610_s29 + $0xf0] sm:$0xff] %v1436_v27 }
 0x133   : > { %v1440_v29 = vpop.eup %1439  ;;  %982 = vst [vmem:[%s1610_s29 + $0x1f0] sm:$0xff] %v1438_v28 }
 0x134   : > { %v1442_v30 = vpop.eup %1441  ;;  %948 = vst [vmem:[%s1610_s29 + $0xe0] sm:$0xff] %v1440_v29 }
 0x135   : > { %v1444_v31 = vpop.eup %1443  ;;  %980 = vst [vmem:[%s1610_s29 + $0x1e0] sm:$0xff] %v1442_v30 }
 0x136   : > { %v1446_v32 = vpop.eup %1445  ;;  %951 = vst [vmem:[%s1610_s29 + $0xf8] sm:$0xff] %v1444_v31 }
 0x137   : > { %v1448_v34 = vpop.eup %1447  ;;  %983 = vst [vmem:[%s1610_s29 + $0x1f8] sm:$0xff] %v1446_v32 }
 0x138   : > { %v1450_v35 = vpop.eup %1449  ;;  %949 = vst [vmem:[%s1610_s29 + $0xe8] sm:$0xff] %v1448_v34 }
 0x139   : > { %981 = vst [vmem:[%s1610_s29 + $0x1e8] sm:$0xff] %v1450_v35 }
 0x13a PF: > { %s13_s14 = sadd.s32 1, %s1473_s14   ;;  %s1741_s12 = smov %s1469_s13 }
 0x13b   : > { %p10_p5 = scmp.ge.s32.totalorder %s13_s14, 6   ;;  %s1742_s13 = smov %s1744_s15 }
 0x13d   :  { %12 = sbr.rel (!%p10_p5) target bundleno = 2 (0x2), region = 65 }

</bundles_post_ra>
